<compile_context>
chip_gen: v6e
topology: v6e:2x2x1
jax: 0.10.0
libtpu: 0.0.40
codegen_flags: <defaults>
</compile_context>

<pallas_src>
import functools

import jax
import jax.numpy as jnp
from jax.experimental import pallas as pl
from jax.experimental.pallas import tpu as pltpu

_BN_EPS = 1e-5
_CPAD = 8        # pad the 3 xyz input channels to 8 (sublane friendly)
_HEAD_PAD = 128  # pad the narrow output heads (9 / k_classes) to a lane-dense width


def _mm_bias(h, w, b, relu):
    """y = maybe_relu(h @ w + b); bf16 MXU inputs, f32 accumulation."""
    y = jnp.dot(h, w, preferred_element_type=jnp.float32) + b
    if relu:
        y = jnp.maximum(y, 0.0)
    return y


# ----------------------------------------------------------------------------
# Kernel A: per-point MLP + global max pool
#   conv1(+bn+relu) -> conv2(+bn+relu) -> conv3 (dot only) -> running max
#   conv3 bias (+relu3) applied once per batch in the last-tile epilogue.
# ----------------------------------------------------------------------------
def _pointnet_pool_kernel(x_ref, w1, b1, w2, b2, w3, b3, o_ref, gmax_ref,
                          *, relu3, w1_per_batch):
    nt = pl.program_id(1)

    @pl.when(nt == 0)
    def _init():
        gmax_ref[...] = jnp.full_like(gmax_ref, -jnp.inf)

    # ---- per-point MLP on this tile of points ----
    w1v = w1[0] if w1_per_batch else w1[...]
    x = x_ref[0]                                                    # (TN, 8)  bf16
    h = _mm_bias(x, w1v, b1[...], True).astype(jnp.bfloat16)        # (TN, 64)
    h = _mm_bias(h, w2[...], b2[...], True).astype(jnp.bfloat16)    # (TN, 128)
    h = jnp.dot(h, w3[...], preferred_element_type=jnp.float32)     # (TN, 1024) f32
    # (bias + relu hoisted to the epilogue below)

    # ---- running global max over the point axis ----
    tn, c = h.shape
    # fold tn rows -> 8 sublane rows with elementwise (VPU) maxes; vreg-aligned reshape
    folded = jnp.max(h.reshape(tn // 8, 8, c), axis=0)              # (8, C)
    gmax_ref[...] = jnp.maximum(gmax_ref[...], folded)

    # ---- per-batch epilogue: 8->1 sublane reduce, hoisted bias (+relu), store ----
    @pl.when(nt == pl.num_programs(1) - 1)
    def _epilogue():
        g = jnp.max(gmax_ref[...], axis=0, keepdims=True) + b3[...]  # (1, C) f32
        if relu3:
            g = jnp.maximum(g, 0.0)
        o_ref[0] = g.astype(o_ref.dtype)


def fused_pointnet_pool(x, w1, b1, w2, b2, w3, b3, *, relu3, w1_per_batch, tn):
    """x: (B, N, _CPAD) bf16 -> pooled feature (B, 1, C3) bf16."""
    B, N, Cp = x.shape
    assert N % tn == 0 and tn % 8 == 0
    n_tiles = N // tn
    cout = w3.shape[1]

    vmem = pl.BlockSpec(memory_space=pltpu.MemorySpace.VMEM)  # kernel-resident, untiled
    if w1_per_batch:
        w1_spec = pl.BlockSpec((1,) + w1.shape[1:], lambda b, n: (b, 0, 0))
    else:
        w1_spec = vmem

    kernel = functools.partial(_pointnet_pool_kernel,
                               relu3=relu3, w1_per_batch=w1_per_batch)
    return pl.pallas_call(
        kernel,
        out_shape=jax.ShapeDtypeStruct((B, 1, cout), jnp.bfloat16),
        grid=(B, n_tiles),
        in_specs=[
            pl.BlockSpec((1, tn, Cp), lambda b, n: (b, n, 0)),   # points tile
            w1_spec, vmem,                                       # w1, b1
            vmem, vmem,                                          # w2, b2
            vmem, vmem,                                          # w3, b3
        ],
        out_specs=pl.BlockSpec((1, 1, cout), lambda b, n: (b, 0, 0)),
        scratch_shapes=[pltpu.VMEM((8, cout), jnp.float32)],     # folded running max
        compiler_params=pltpu.CompilerParams(
            dimension_semantics=("parallel", "arbitrary"),
            vmem_limit_bytes=48 * 1024 * 1024,
        ),
    )(x, w1, b1, w2, b2, w3, b3)


# ----------------------------------------------------------------------------
# Kernel B: batched FC head (fc1 -> bn -> relu -> fc2 -> bn -> relu -> fc3)
# Runs once over all B rows (no per-batch M=1 matmuls).
# ----------------------------------------------------------------------------
def _fc_head_kernel(g_ref, w1, b1, w2, b2, w3, b3, o_ref):
    h = g_ref[...]                                                  # (B, 1024) bf16
    h = _mm_bias(h, w1[...], b1[...], True).astype(jnp.bfloat16)    # (B, 512)
    h = _mm_bias(h, w2[...], b2[...], True).astype(jnp.bfloat16)    # (B, 256)
    o_ref[...] = _mm_bias(h, w3[...], b3[...], False)               # (B, 128) f32


def fused_fc_head(g, w1, b1, w2, b2, w3, b3):
    B = g.shape[0]
    return pl.pallas_call(
        _fc_head_kernel,
        out_shape=jax.ShapeDtypeStruct((B, w3.shape[1]), jnp.float32),
    )(g, w1, b1, w2, b2, w3, b3)


# ----------------------------------------------------------------------------
# Deterministic parameter construction (synthetic, not a checkpoint load).
# BN folded into (weight, bias); layout/dtype prepared for the fused kernels.
# ----------------------------------------------------------------------------
def make_params(key, k_classes=8):
    def dense(k, fan_in, fan_out):
        kw, kb = jax.random.split(k)
        w = jax.random.normal(kw, (fan_in, fan_out), jnp.float32) / jnp.sqrt(fan_in)
        b = 0.01 * jax.random.normal(kb, (fan_out,), jnp.float32)
        return w, b

    def bn(k, c):
        kg, kb_, km, kv = jax.random.split(k, 4)
        gamma = 1.0 + 0.1 * jax.random.normal(kg, (c,), jnp.float32)
        beta = 0.05 * jax.random.normal(kb_, (c,), jnp.float32)
        mean = 0.01 * jax.random.normal(km, (c,), jnp.float32)
        var = 1.0 + 0.1 * jnp.abs(jax.random.normal(kv, (c,), jnp.float32))
        return gamma, beta, mean, var

    layer_defs = [
        ("stn_c1", 3, 64, True), ("stn_c2", 64, 128, True), ("stn_c3", 128, 1024, True),
        ("stn_f1", 1024, 512, True), ("stn_f2", 512, 256, True), ("stn_f3", 256, 9, False),
        ("c1", 3, 64, True), ("c2", 64, 128, True), ("c3", 128, 1024, True),
        ("f1", 1024, 512, True), ("f2", 512, 256, True), ("f3", 256, k_classes, False),
    ]
    keys = jax.random.split(key, 2 * len(layer_defs))
    raw = {}
    for idx, (name, fi, fo, has_bn) in enumerate(layer_defs):
        w, b = dense(keys[2 * idx], fi, fo)
        if name == "stn_f3":
            # STN3d adds the flattened 3x3 identity to its output; fold into bias.
            b = b + jnp.eye(3, dtype=jnp.float32).reshape(-1)
        if has_bn:
            gamma, beta, mean, var = bn(keys[2 * idx + 1], fo)
            scale = gamma / jnp.sqrt(var + _BN_EPS)
            w = w * scale[None, :]                 # fold BN scale into the weight
            b = (b - mean) * scale + beta
        raw[name] = (w, b)

    params = {}
    for name, (w, b) in raw.items():
        fi, fo = w.shape
        if name == "c1":
            # kept f32 / unpadded; folded with the per-batch STN transform at run time
            params[name] = (w, b[None, :].astype(jnp.float32))
            continue
        if name == "stn_c1":
            w = jnp.pad(w, ((0, _CPAD - fi), (0, 0)))
        if name in ("stn_f3", "f3"):
            w = jnp.pad(w, ((0, 0), (0, _HEAD_PAD - fo)))
            b = jnp.pad(b, (0, _HEAD_PAD - fo))
        params[name] = (w.astype(jnp.bfloat16), b[None, :].astype(jnp.float32))
    return params


# ----------------------------------------------------------------------------
# Point-tile sizing: big tiles (<=2048) to amortize per-step overhead; the point
# axis is edge-padded (duplicated real points, exact for the max) so any N works.
# ----------------------------------------------------------------------------
def _point_tiling(n, cap=2048):
    if n <= cap:
        tn = ((n + 15) // 16) * 16          # single tile, sublane-aligned
    else:
        tn = cap
    n_padded = ((n + tn - 1) // tn) * tn
    return tn, n_padded - n


# ----------------------------------------------------------------------------
# Comparator forward = PointNetfeat (global_feat) + fc1/bn1/ReLU/fc2/bn2/ReLU/fc3
# ----------------------------------------------------------------------------
def comparator_forward(x_bcn, params, k_classes=8):
    B, C, N = x_bcn.shape  # PyTorch NCW input: (B, 3, n_points)
    tn, n_pad = _point_tiling(N)
    p = params

    # transpose -> bf16 cast -> pads (only the bf16 buffer is materialized)
    x = jnp.transpose(x_bcn, (0, 2, 1)).astype(jnp.bfloat16)          # (B, N, 3)
    if n_pad:
        # duplicate real points; global max is unaffected (exact, no masking needed)
        x = jnp.pad(x, ((0, 0), (0, n_pad), (0, 0)), mode="edge")
    x = jnp.pad(x, ((0, 0), (0, 0), (0, _CPAD - C)))                  # (B, Np, 8)

    # ---- STN3d: pooled feature kernel + batched FC head ----
    stn_pool = fused_pointnet_pool(
        x,
        p["stn_c1"][0], p["stn_c1"][1],
        p["stn_c2"][0], p["stn_c2"][1],
        p["stn_c3"][0], p["stn_c3"][1],
        relu3=True, w1_per_batch=False, tn=tn,
    )                                                                 # (B, 1, 1024) bf16
    stn_out = fused_fc_head(
        stn_pool[:, 0, :],
        p["stn_f1"][0], p["stn_f1"][1],
        p["stn_f2"][0], p["stn_f2"][1],
        p["stn_f3"][0], p["stn_f3"][1],
    )                                                                 # (B, 128) f32
    trans = stn_out[:, :9].reshape(B, 3, 3)                           # per-batch transform

    # ---- fold the input transform into the first trunk layer: W_eff[b] = trans[b] @ W_c1 ----
    w_c1, b_c1 = p["c1"]                                              # (3, 64), (1, 64) f32
    w_eff = jnp.einsum("bij,jk->bik", trans, w_c1)                    # (B, 3, 64) f32
    w_eff = jnp.pad(w_eff, ((0, 0), (0, _CPAD - 3), (0, 0))).astype(jnp.bfloat16)

    # ---- trunk + classifier head ----
    pooled = fused_pointnet_pool(
        x,
        w_eff, b_c1,
        p["c2"][0], p["c2"][1],
        p["c3"][0], p["c3"][1],                                       # bn3, no ReLU before max
        relu3=False, w1_per_batch=True, tn=tn,
    )                                                                 # (B, 1, 1024) bf16
    logits = fused_fc_head(
        pooled[:, 0, :],
        p["f1"][0], p["f1"][1],                                       # fc1 -> bn1 -> ReLU
        p["f2"][0], p["f2"][1],                                       # fc2 -> (dropout=id) -> bn2 -> ReLU
        p["f3"][0], p["f3"][1],                                       # fc3 (raw logits)
    )                                                                 # (B, 128) f32
    return logits[:, :k_classes]


if __name__ == "__main__":
    key = jax.random.PRNGKey(0)
    kx, kp = jax.random.split(key)

    B, N_POINTS, K_CLASSES = 2, 128, 8
    x = jax.random.normal(kx, (B, 3, N_POINTS), jnp.float32)
    params = make_params(kp, k_classes=K_CLASSES)

    fwd = jax.jit(lambda a: comparator_forward(a, params, K_CLASSES))
    out = jax.block_until_ready(fwd(x))
    assert out.shape == (B, K_CLASSES)
    assert bool(jnp.all(jnp.isfinite(out)))
    print("KERNEL_OK")
</pallas_src>

<mosaic_0001>
module attributes {stable_mosaic.version = 11 : i64} {
  func.func @_fc_head_kernel(%arg0: memref<2x1024xbf16, #tpu.memory_space<vmem>>, %arg1: memref<1024x512xbf16, #tpu.memory_space<vmem>>, %arg2: memref<1x512xf32, #tpu.memory_space<vmem>>, %arg3: memref<512x256xbf16, #tpu.memory_space<vmem>>, %arg4: memref<1x256xf32, #tpu.memory_space<vmem>>, %arg5: memref<256x128xbf16, #tpu.memory_space<vmem>>, %arg6: memref<1x128xf32, #tpu.memory_space<vmem>>, %arg7: memref<2x128xf32, #tpu.memory_space<vmem>>) attributes {dimension_semantics = [], scalar_prefetch = 0 : i64, scratch_operands = 0 : i64, tpu.core_type = #tpu.core_type<tc>} {
    %c0 = arith.constant 0 : index
    %c0_0 = arith.constant 0 : index
    %0 = vector.load %arg0[%c0, %c0_0] : memref<2x1024xbf16, #tpu.memory_space<vmem>>, vector<2x1024xbf16>
    %c0_1 = arith.constant 0 : index
    %c0_2 = arith.constant 0 : index
    %1 = vector.load %arg1[%c0_1, %c0_2] : memref<1024x512xbf16, #tpu.memory_space<vmem>>, vector<1024x512xbf16>
    %c0_3 = arith.constant 0 : index
    %c0_4 = arith.constant 0 : index
    %2 = vector.load %arg2[%c0_3, %c0_4] : memref<1x512xf32, #tpu.memory_space<vmem>>, vector<1x512xf32>
    %cst = arith.constant dense<0.000000e+00> : vector<2x512xf32>
    %3 = tpu.matmul %0, %1, %cst {dimension_numbers = #tpu.dot_dimension_numbers<[1], [0], [0], [1], [0, 0, 1, 1], [], []>} : vector<2x1024xbf16>, vector<1024x512xbf16>, vector<2x512xf32> -> vector<2x512xf32>
    %4 = vector.broadcast %2 : vector<1x512xf32> to vector<2x512xf32>
    %5 = arith.addf %3, %4 : vector<2x512xf32>
    %cst_5 = arith.constant 0.000000e+00 : f32
    %6 = vector.broadcast %cst_5 : f32 to vector<2x512xf32>
    %7 = arith.maximumf %5, %6 : vector<2x512xf32>
    %8 = arith.truncf %7 : vector<2x512xf32> to vector<2x512xbf16>
    %c0_6 = arith.constant 0 : index
    %c0_7 = arith.constant 0 : index
    %9 = vector.load %arg3[%c0_6, %c0_7] : memref<512x256xbf16, #tpu.memory_space<vmem>>, vector<512x256xbf16>
    %c0_8 = arith.constant 0 : index
    %c0_9 = arith.constant 0 : index
    %10 = vector.load %arg4[%c0_8, %c0_9] : memref<1x256xf32, #tpu.memory_space<vmem>>, vector<1x256xf32>
    %cst_10 = arith.constant dense<0.000000e+00> : vector<2x256xf32>
    %11 = tpu.matmul %8, %9, %cst_10 {dimension_numbers = #tpu.dot_dimension_numbers<[1], [0], [0], [1], [0, 0, 1, 1], [], []>} : vector<2x512xbf16>, vector<512x256xbf16>, vector<2x256xf32> -> vector<2x256xf32>
    %12 = vector.broadcast %10 : vector<1x256xf32> to vector<2x256xf32>
    %13 = arith.addf %11, %12 : vector<2x256xf32>
    %cst_11 = arith.constant 0.000000e+00 : f32
    %14 = vector.broadcast %cst_11 : f32 to vector<2x256xf32>
    %15 = arith.maximumf %13, %14 : vector<2x256xf32>
    %16 = arith.truncf %15 : vector<2x256xf32> to vector<2x256xbf16>
    %c0_12 = arith.constant 0 : index
    %c0_13 = arith.constant 0 : index
    %17 = vector.load %arg5[%c0_12, %c0_13] : memref<256x128xbf16, #tpu.memory_space<vmem>>, vector<256x128xbf16>
    %c0_14 = arith.constant 0 : index
    %c0_15 = arith.constant 0 : index
    %18 = vector.load %arg6[%c0_14, %c0_15] : memref<1x128xf32, #tpu.memory_space<vmem>>, vector<1x128xf32>
    %cst_16 = arith.constant dense<0.000000e+00> : vector<2x128xf32>
    %19 = tpu.matmul %16, %17, %cst_16 {dimension_numbers = #tpu.dot_dimension_numbers<[1], [0], [0], [1], [0, 0, 1, 1], [], []>} : vector<2x256xbf16>, vector<256x128xbf16>, vector<2x128xf32> -> vector<2x128xf32>
    %20 = vector.broadcast %18 : vector<1x128xf32> to vector<2x128xf32>
    %21 = arith.addf %19, %20 : vector<2x128xf32>
    %c0_17 = arith.constant 0 : index
    %c0_18 = arith.constant 0 : index
    %22 = vector.load %arg7[%c0_17, %c0_18] : memref<2x128xf32, #tpu.memory_space<vmem>>, vector<2x128xf32>
    tpu.vector_store %arg7[%c0_17, %c0_18], %21 {strides = array<i32>} : memref<2x128xf32, #tpu.memory_space<vmem>>, vector<2x128xf32>,
    return
  }
}

module attributes {stable_mosaic.version = 11 : i64} {
  func.func @_pointnet_pool_kernel(%arg0: i32, %arg1: i32, %arg2: memref<1x128x8xbf16, #tpu.memory_space<vmem>>, %arg3: memref<8x64xbf16, #tpu.memory_space<vmem>>, %arg4: memref<1x64xf32, #tpu.memory_space<vmem>>, %arg5: memref<64x128xbf16, #tpu.memory_space<vmem>>, %arg6: memref<1x128xf32, #tpu.memory_space<vmem>>, %arg7: memref<128x1024xbf16, #tpu.memory_space<vmem>>, %arg8: memref<1x1024xf32, #tpu.memory_space<vmem>>, %arg9: memref<1x1x1024xbf16, #tpu.memory_space<vmem>>, %arg10: memref<8x1024xf32, #tpu.memory_space<vmem>>) attributes {dimension_semantics = [#tpu.dimension_semantics<parallel>, #tpu.dimension_semantics<arbitrary>], iteration_bounds = array<i64: 2, 1>, scalar_prefetch = 0 : i64, scratch_operands = 1 : i64, tpu.core_type = #tpu.core_type<tc>, window_params = [{transform_indices = @transform_0, window_bounds = array<i64: 1, 128, 8>}, {pipeline_mode = #tpu.pipeline_mode<synchronous>, transform_indices = @transform_1, window_bounds = array<i64: 8, 64>}, {pipeline_mode = #tpu.pipeline_mode<synchronous>, transform_indices = @transform_2, window_bounds = array<i64: 1, 64>}, {pipeline_mode = #tpu.pipeline_mode<synchronous>, transform_indices = @transform_3, window_bounds = array<i64: 64, 128>}, {pipeline_mode = #tpu.pipeline_mode<synchronous>, transform_indices = @transform_4, window_bounds = array<i64: 1, 128>}, {pipeline_mode = #tpu.pipeline_mode<synchronous>, transform_indices = @transform_5, window_bounds = array<i64: 128, 1024>}, {pipeline_mode = #tpu.pipeline_mode<synchronous>, transform_indices = @transform_6, window_bounds = array<i64: 1, 1024>}, {transform_indices = @transform_7, window_bounds = array<i64: 1, 1, 1024>}]} {
    %c0_i32 = arith.constant 0 : i32
    %0 = arith.cmpi eq, %arg1, %c0_i32 : i32
    %1 = arith.extui %0 : i1 to i32
    %c0_i32_0 = arith.constant 0 : i32
    %2 = arith.cmpi ne, %1, %c0_i32_0 : i32
    scf.if %2 {
      %cst_24 = arith.constant 0xFF800000 : f32
      %31 = vector.broadcast %cst_24 : f32 to vector<8x1024xf32>
      %c0_25 = arith.constant 0 : index
      %c0_26 = arith.constant 0 : index
      %32 = vector.load %arg10[%c0_25, %c0_26] : memref<8x1024xf32, #tpu.memory_space<vmem>>, vector<8x1024xf32>
      tpu.vector_store %arg10[%c0_25, %c0_26], %31 {strides = array<i32>} : memref<8x1024xf32, #tpu.memory_space<vmem>>, vector<8x1024xf32>,
    } else {
    }
    %c0 = arith.constant 0 : index
    %c0_1 = arith.constant 0 : index
    %3 = vector.load %arg3[%c0, %c0_1] : memref<8x64xbf16, #tpu.memory_space<vmem>>, vector<8x64xbf16>
    %c0_2 = arith.constant 0 : index
    %c0_3 = arith.constant 0 : index
    %c0_4 = arith.constant 0 : index
    %4 = vector.load %arg2[%c0_2, %c0_3, %c0_4] : memref<1x128x8xbf16, #tpu.memory_space<vmem>>, vector<1x128x8xbf16>
    %5 = vector.shape_cast %4 : vector<1x128x8xbf16> to vector<128x8xbf16>
    %c0_5 = arith.constant 0 : index
    %c0_6 = arith.constant 0 : index
    %6 = vector.load %arg4[%c0_5, %c0_6] : memref<1x64xf32, #tpu.memory_space<vmem>>, vector<1x64xf32>
    %cst = arith.constant dense<0.000000e+00> : vector<128x64xf32>
    %7 = tpu.matmul %5, %3, %cst {dimension_numbers = #tpu.dot_dimension_numbers<[1], [0], [0], [1], [0, 0, 1, 1], [], []>} : vector<128x8xbf16>, vector<8x64xbf16>, vector<128x64xf32> -> vector<128x64xf32>
    %8 = vector.broadcast %6 : vector<1x64xf32> to vector<128x64xf32>
    %9 = arith.addf %7, %8 : vector<128x64xf32>
    %cst_7 = arith.constant 0.000000e+00 : f32
    %10 = vector.broadcast %cst_7 : f32 to vector<128x64xf32>
    %11 = arith.maximumf %9, %10 : vector<128x64xf32>
    %12 = arith.truncf %11 : vector<128x64xf32> to vector<128x64xbf16>
    %c0_8 = arith.constant 0 : index
    %c0_9 = arith.constant 0 : index
    %13 = vector.load %arg5[%c0_8, %c0_9] : memref<64x128xbf16, #tpu.memory_space<vmem>>, vector<64x128xbf16>
    %c0_10 = arith.constant 0 : index
    %c0_11 = arith.constant 0 : index
    %14 = vector.load %arg6[%c0_10, %c0_11] : memref<1x128xf32, #tpu.memory_space<vmem>>, vector<1x128xf32>
    %cst_12 = arith.constant dense<0.000000e+00> : vector<128x128xf32>
    %15 = tpu.matmul %12, %13, %cst_12 {dimension_numbers = #tpu.dot_dimension_numbers<[1], [0], [0], [1], [0, 0, 1, 1], [], []>} : vector<128x64xbf16>, vector<64x128xbf16>, vector<128x128xf32> -> vector<128x128xf32>
    %16 = vector.broadcast %14 : vector<1x128xf32> to vector<128x128xf32>
    %17 = arith.addf %15, %16 : vector<128x128xf32>
    %cst_13 = arith.constant 0.000000e+00 : f32
    %18 = vector.broadcast %cst_13 : f32 to vector<128x128xf32>
    %19 = arith.maximumf %17, %18 : vector<128x128xf32>
    %20 = arith.truncf %19 : vector<128x128xf32> to vector<128x128xbf16>
    %c0_14 = arith.constant 0 : index
    %c0_15 = arith.constant 0 : index
    %21 = vector.load %arg7[%c0_14, %c0_15] : memref<128x1024xbf16, #tpu.memory_space<vmem>>, vector<128x1024xbf16>
    %cst_16 = arith.constant dense<0.000000e+00> : vector<128x1024xf32>
    %22 = tpu.matmul %20, %21, %cst_16 {dimension_numbers = #tpu.dot_dimension_numbers<[1], [0], [0], [1], [0, 0, 1, 1], [], []>} : vector<128x128xbf16>, vector<128x1024xbf16>, vector<128x1024xf32> -> vector<128x1024xf32>
    %23 = vector.shape_cast %22 : vector<128x1024xf32> to vector<16x8x1024xf32>
    %cst_17 = arith.constant dense<0xFF800000> : vector<8x1024xf32>
    %24 = vector.multi_reduction <maximumf>, %23, %cst_17 [0] : vector<16x8x1024xf32> to vector<8x1024xf32>
    %c0_18 = arith.constant 0 : index
    %c0_19 = arith.constant 0 : index
    %25 = vector.load %arg10[%c0_18, %c0_19] : memref<8x1024xf32, #tpu.memory_space<vmem>>, vector<8x1024xf32>
    %26 = arith.maximumf %25, %24 : vector<8x1024xf32>
    %c0_20 = arith.constant 0 : index
    %c0_21 = arith.constant 0 : index
    %27 = vector.load %arg10[%c0_20, %c0_21] : memref<8x1024xf32, #tpu.memory_space<vmem>>, vector<8x1024xf32>
    tpu.vector_store %arg10[%c0_20, %c0_21], %26 {strides = array<i32>} : memref<8x1024xf32, #tpu.memory_space<vmem>>, vector<8x1024xf32>,
    %c0_i32_22 = arith.constant 0 : i32
    %28 = arith.cmpi eq, %arg1, %c0_i32_22 : i32
    %29 = arith.extui %28 : i1 to i32
    %c0_i32_23 = arith.constant 0 : i32
    %30 = arith.cmpi ne, %29, %c0_i32_23 : i32
    scf.if %30 {
      %c0_24 = arith.constant 0 : index
      %c0_25 = arith.constant 0 : index
      %31 = vector.load %arg10[%c0_24, %c0_25] : memref<8x1024xf32, #tpu.memory_space<vmem>>, vector<8x1024xf32>
      %cst_26 = arith.constant dense<0xFF800000> : vector<1024xf32>
      %32 = vector.multi_reduction <maximumf>, %31, %cst_26 [0] : vector<8x1024xf32> to vector<1024xf32>
      %33 = vector.shape_cast %32 : vector<1024xf32> to vector<1x1024xf32>
      %c0_27 = arith.constant 0 : index
      %c0_28 = arith.constant 0 : index
      %34 = vector.load %arg8[%c0_27, %c0_28] : memref<1x1024xf32, #tpu.memory_space<vmem>>, vector<1x1024xf32>
      %35 = arith.addf %33, %34 : vector<1x1024xf32>
      %cst_29 = arith.constant 0.000000e+00 : f32
      %36 = vector.broadcast %cst_29 : f32 to vector<1x1024xf32>
      %37 = arith.maximumf %35, %36 : vector<1x1024xf32>
      %38 = arith.truncf %37 : vector<1x1024xf32> to vector<1x1024xbf16>
      %c0_30 = arith.constant 0 : index
      %c0_31 = arith.constant 0 : index
      %c0_32 = arith.constant 0 : index
      %39 = vector.load %arg9[%c0_30, %c0_31, %c0_32] : memref<1x1x1024xbf16, #tpu.memory_space<vmem>>, vector<1x1x1024xbf16>
      %40 = vector.shape_cast %39 : vector<1x1x1024xbf16> to vector<1x1024xbf16>
      %41 = vector.shape_cast %38 : vector<1x1024xbf16> to vector<1x1x1024xbf16>
      tpu.vector_store %arg9[%c0_30, %c0_31, %c0_32], %41 {strides = array<i32>} : memref<1x1x1024xbf16, #tpu.memory_space<vmem>>, vector<1x1x1024xbf16>,
    } else {
    }
    return
  }
  func.func @transform_0(%arg0: i32, %arg1: i32) -> (i32, i32, i32) {
    %c0_i32 = arith.constant 0 : i32
    %c0_i32_0 = arith.constant 0 : i32
    return %arg0, %arg1, %c0_i32 : i32, i32, i32
  }
  func.func @transform_1(%arg0: i32, %arg1: i32) -> (i32, i32) {
    %c0_i32 = arith.constant 0 : i32
    %c0_i32_0 = arith.constant 0 : i32
    %c0_i32_1 = arith.constant 0 : i32
    return %c0_i32, %c0_i32_0 : i32, i32
  }
  func.func @transform_2(%arg0: i32, %arg1: i32) -> (i32, i32) {
    %c0_i32 = arith.constant 0 : i32
    %c0_i32_0 = arith.constant 0 : i32
    %c0_i32_1 = arith.constant 0 : i32
    return %c0_i32, %c0_i32_0 : i32, i32
  }
  func.func @transform_3(%arg0: i32, %arg1: i32) -> (i32, i32) {
    %c0_i32 = arith.constant 0 : i32
    %c0_i32_0 = arith.constant 0 : i32
    %c0_i32_1 = arith.constant 0 : i32
    return %c0_i32, %c0_i32_0 : i32, i32
  }
  func.func @transform_4(%arg0: i32, %arg1: i32) -> (i32, i32) {
    %c0_i32 = arith.constant 0 : i32
    %c0_i32_0 = arith.constant 0 : i32
    %c0_i32_1 = arith.constant 0 : i32
    return %c0_i32, %c0_i32_0 : i32, i32
  }
  func.func @transform_5(%arg0: i32, %arg1: i32) -> (i32, i32) {
    %c0_i32 = arith.constant 0 : i32
    %c0_i32_0 = arith.constant 0 : i32
    %c0_i32_1 = arith.constant 0 : i32
    return %c0_i32, %c0_i32_0 : i32, i32
  }
  func.func @transform_6(%arg0: i32, %arg1: i32) -> (i32, i32) {
    %c0_i32 = arith.constant 0 : i32
    %c0_i32_0 = arith.constant 0 : i32
    %c0_i32_1 = arith.constant 0 : i32
    return %c0_i32, %c0_i32_0 : i32, i32
  }
  func.func @transform_7(%arg0: i32, %arg1: i32) -> (i32, i32, i32) {
    %c0_i32 = arith.constant 0 : i32
    %c0_i32_0 = arith.constant 0 : i32
    %c0_i32_1 = arith.constant 0 : i32
    return %arg0, %c0_i32, %c0_i32_0 : i32, i32, i32
  }
}

module attributes {stable_mosaic.version = 11 : i64} {
  func.func @_fc_head_kernel(%arg0: memref<2x1024xbf16, #tpu.memory_space<vmem>>, %arg1: memref<1024x512xbf16, #tpu.memory_space<vmem>>, %arg2: memref<1x512xf32, #tpu.memory_space<vmem>>, %arg3: memref<512x256xbf16, #tpu.memory_space<vmem>>, %arg4: memref<1x256xf32, #tpu.memory_space<vmem>>, %arg5: memref<256x128xbf16, #tpu.memory_space<vmem>>, %arg6: memref<1x128xf32, #tpu.memory_space<vmem>>, %arg7: memref<2x128xf32, #tpu.memory_space<vmem>>) attributes {dimension_semantics = [], scalar_prefetch = 0 : i64, scratch_operands = 0 : i64, tpu.core_type = #tpu.core_type<tc>} {
    %c0 = arith.constant 0 : index
    %c0_0 = arith.constant 0 : index
    %0 = vector.load %arg0[%c0, %c0_0] : memref<2x1024xbf16, #tpu.memory_space<vmem>>, vector<2x1024xbf16>
    %c0_1 = arith.constant 0 : index
    %c0_2 = arith.constant 0 : index
    %1 = vector.load %arg1[%c0_1, %c0_2] : memref<1024x512xbf16, #tpu.memory_space<vmem>>, vector<1024x512xbf16>
    %c0_3 = arith.constant 0 : index
    %c0_4 = arith.constant 0 : index
    %2 = vector.load %arg2[%c0_3, %c0_4] : memref<1x512xf32, #tpu.memory_space<vmem>>, vector<1x512xf32>
    %cst = arith.constant dense<0.000000e+00> : vector<2x512xf32>
    %3 = tpu.matmul %0, %1, %cst {dimension_numbers = #tpu.dot_dimension_numbers<[1], [0], [0], [1], [0, 0, 1, 1], [], []>} : vector<2x1024xbf16>, vector<1024x512xbf16>, vector<2x512xf32> -> vector<2x512xf32>
    %4 = vector.broadcast %2 : vector<1x512xf32> to vector<2x512xf32>
    %5 = arith.addf %3, %4 : vector<2x512xf32>
    %cst_5 = arith.constant 0.000000e+00 : f32
    %6 = vector.broadcast %cst_5 : f32 to vector<2x512xf32>
    %7 = arith.maximumf %5, %6 : vector<2x512xf32>
    %8 = arith.truncf %7 : vector<2x512xf32> to vector<2x512xbf16>
    %c0_6 = arith.constant 0 : index
    %c0_7 = arith.constant 0 : index
    %9 = vector.load %arg3[%c0_6, %c0_7] : memref<512x256xbf16, #tpu.memory_space<vmem>>, vector<512x256xbf16>
    %c0_8 = arith.constant 0 : index
    %c0_9 = arith.constant 0 : index
    %10 = vector.load %arg4[%c0_8, %c0_9] : memref<1x256xf32, #tpu.memory_space<vmem>>, vector<1x256xf32>
    %cst_10 = arith.constant dense<0.000000e+00> : vector<2x256xf32>
    %11 = tpu.matmul %8, %9, %cst_10 {dimension_numbers = #tpu.dot_dimension_numbers<[1], [0], [0], [1], [0, 0, 1, 1], [], []>} : vector<2x512xbf16>, vector<512x256xbf16>, vector<2x256xf32> -> vector<2x256xf32>
    %12 = vector.broadcast %10 : vector<1x256xf32> to vector<2x256xf32>
    %13 = arith.addf %11, %12 : vector<2x256xf32>
    %cst_11 = arith.constant 0.000000e+00 : f32
    %14 = vector.broadcast %cst_11 : f32 to vector<2x256xf32>
    %15 = arith.maximumf %13, %14 : vector<2x256xf32>
    %16 = arith.truncf %15 : vector<2x256xf32> to vector<2x256xbf16>
    %c0_12 = arith.constant 0 : index
    %c0_13 = arith.constant 0 : index
    %17 = vector.load %arg5[%c0_12, %c0_13] : memref<256x128xbf16, #tpu.memory_space<vmem>>, vector<256x128xbf16>
    %c0_14 = arith.constant 0 : index
    %c0_15 = arith.constant 0 : index
    %18 = vector.load %arg6[%c0_14, %c0_15] : memref<1x128xf32, #tpu.memory_space<vmem>>, vector<1x128xf32>
    %cst_16 = arith.constant dense<0.000000e+00> : vector<2x128xf32>
    %19 = tpu.matmul %16, %17, %cst_16 {dimension_numbers = #tpu.dot_dimension_numbers<[1], [0], [0], [1], [0, 0, 1, 1], [], []>} : vector<2x256xbf16>, vector<256x128xbf16>, vector<2x128xf32> -> vector<2x128xf32>
    %20 = vector.broadcast %18 : vector<1x128xf32> to vector<2x128xf32>
    %21 = arith.addf %19, %20 : vector<2x128xf32>
    %c0_17 = arith.constant 0 : index
    %c0_18 = arith.constant 0 : index
    %22 = vector.load %arg7[%c0_17, %c0_18] : memref<2x128xf32, #tpu.memory_space<vmem>>, vector<2x128xf32>
    tpu.vector_store %arg7[%c0_17, %c0_18], %21 {strides = array<i32>} : memref<2x128xf32, #tpu.memory_space<vmem>>, vector<2x128xf32>,
    return
  }
}

module attributes {stable_mosaic.version = 11 : i64} {
  func.func @_pointnet_pool_kernel(%arg0: i32, %arg1: i32, %arg2: memref<1x128x8xbf16, #tpu.memory_space<vmem>>, %arg3: memref<1x8x64xbf16, #tpu.memory_space<vmem>>, %arg4: memref<1x64xf32, #tpu.memory_space<vmem>>, %arg5: memref<64x128xbf16, #tpu.memory_space<vmem>>, %arg6: memref<1x128xf32, #tpu.memory_space<vmem>>, %arg7: memref<128x1024xbf16, #tpu.memory_space<vmem>>, %arg8: memref<1x1024xf32, #tpu.memory_space<vmem>>, %arg9: memref<1x1x1024xbf16, #tpu.memory_space<vmem>>, %arg10: memref<8x1024xf32, #tpu.memory_space<vmem>>) attributes {dimension_semantics = [#tpu.dimension_semantics<parallel>, #tpu.dimension_semantics<arbitrary>], iteration_bounds = array<i64: 2, 1>, scalar_prefetch = 0 : i64, scratch_operands = 1 : i64, tpu.core_type = #tpu.core_type<tc>, window_params = [{transform_indices = @transform_0, window_bounds = array<i64: 1, 128, 8>}, {transform_indices = @transform_1, window_bounds = array<i64: 1, 8, 64>}, {pipeline_mode = #tpu.pipeline_mode<synchronous>, transform_indices = @transform_2, window_bounds = array<i64: 1, 64>}, {pipeline_mode = #tpu.pipeline_mode<synchronous>, transform_indices = @transform_3, window_bounds = array<i64: 64, 128>}, {pipeline_mode = #tpu.pipeline_mode<synchronous>, transform_indices = @transform_4, window_bounds = array<i64: 1, 128>}, {pipeline_mode = #tpu.pipeline_mode<synchronous>, transform_indices = @transform_5, window_bounds = array<i64: 128, 1024>}, {pipeline_mode = #tpu.pipeline_mode<synchronous>, transform_indices = @transform_6, window_bounds = array<i64: 1, 1024>}, {transform_indices = @transform_7, window_bounds = array<i64: 1, 1, 1024>}]} {
    %c0_i32 = arith.constant 0 : i32
    %0 = arith.cmpi eq, %arg1, %c0_i32 : i32
    %1 = arith.extui %0 : i1 to i32
    %c0_i32_0 = arith.constant 0 : i32
    %2 = arith.cmpi ne, %1, %c0_i32_0 : i32
    scf.if %2 {
      %cst_25 = arith.constant 0xFF800000 : f32
      %32 = vector.broadcast %cst_25 : f32 to vector<8x1024xf32>
      %c0_26 = arith.constant 0 : index
      %c0_27 = arith.constant 0 : index
      %33 = vector.load %arg10[%c0_26, %c0_27] : memref<8x1024xf32, #tpu.memory_space<vmem>>, vector<8x1024xf32>
      tpu.vector_store %arg10[%c0_26, %c0_27], %32 {strides = array<i32>} : memref<8x1024xf32, #tpu.memory_space<vmem>>, vector<8x1024xf32>,
    } else {
    }
    %c0 = arith.constant 0 : index
    %c0_1 = arith.constant 0 : index
    %c0_2 = arith.constant 0 : index
    %3 = vector.load %arg3[%c0, %c0_1, %c0_2] : memref<1x8x64xbf16, #tpu.memory_space<vmem>>, vector<1x8x64xbf16>
    %4 = vector.shape_cast %3 : vector<1x8x64xbf16> to vector<8x64xbf16>
    %c0_3 = arith.constant 0 : index
    %c0_4 = arith.constant 0 : index
    %c0_5 = arith.constant 0 : index
    %5 = vector.load %arg2[%c0_3, %c0_4, %c0_5] : memref<1x128x8xbf16, #tpu.memory_space<vmem>>, vector<1x128x8xbf16>
    %6 = vector.shape_cast %5 : vector<1x128x8xbf16> to vector<128x8xbf16>
    %c0_6 = arith.constant 0 : index
    %c0_7 = arith.constant 0 : index
    %7 = vector.load %arg4[%c0_6, %c0_7] : memref<1x64xf32, #tpu.memory_space<vmem>>, vector<1x64xf32>
    %cst = arith.constant dense<0.000000e+00> : vector<128x64xf32>
    %8 = tpu.matmul %6, %4, %cst {dimension_numbers = #tpu.dot_dimension_numbers<[1], [0], [0], [1], [0, 0, 1, 1], [], []>} : vector<128x8xbf16>, vector<8x64xbf16>, vector<128x64xf32> -> vector<128x64xf32>
    %9 = vector.broadcast %7 : vector<1x64xf32> to vector<128x64xf32>
    %10 = arith.addf %8, %9 : vector<128x64xf32>
    %cst_8 = arith.constant 0.000000e+00 : f32
    %11 = vector.broadcast %cst_8 : f32 to vector<128x64xf32>
    %12 = arith.maximumf %10, %11 : vector<128x64xf32>
    %13 = arith.truncf %12 : vector<128x64xf32> to vector<128x64xbf16>
    %c0_9 = arith.constant 0 : index
    %c0_10 = arith.constant 0 : index
    %14 = vector.load %arg5[%c0_9, %c0_10] : memref<64x128xbf16, #tpu.memory_space<vmem>>, vector<64x128xbf16>
    %c0_11 = arith.constant 0 : index
    %c0_12 = arith.constant 0 : index
    %15 = vector.load %arg6[%c0_11, %c0_12] : memref<1x128xf32, #tpu.memory_space<vmem>>, vector<1x128xf32>
    %cst_13 = arith.constant dense<0.000000e+00> : vector<128x128xf32>
    %16 = tpu.matmul %13, %14, %cst_13 {dimension_numbers = #tpu.dot_dimension_numbers<[1], [0], [0], [1], [0, 0, 1, 1], [], []>} : vector<128x64xbf16>, vector<64x128xbf16>, vector<128x128xf32> -> vector<128x128xf32>
    %17 = vector.broadcast %15 : vector<1x128xf32> to vector<128x128xf32>
    %18 = arith.addf %16, %17 : vector<128x128xf32>
    %cst_14 = arith.constant 0.000000e+00 : f32
    %19 = vector.broadcast %cst_14 : f32 to vector<128x128xf32>
    %20 = arith.maximumf %18, %19 : vector<128x128xf32>
    %21 = arith.truncf %20 : vector<128x128xf32> to vector<128x128xbf16>
    %c0_15 = arith.constant 0 : index
    %c0_16 = arith.constant 0 : index
    %22 = vector.load %arg7[%c0_15, %c0_16] : memref<128x1024xbf16, #tpu.memory_space<vmem>>, vector<128x1024xbf16>
    %cst_17 = arith.constant dense<0.000000e+00> : vector<128x1024xf32>
    %23 = tpu.matmul %21, %22, %cst_17 {dimension_numbers = #tpu.dot_dimension_numbers<[1], [0], [0], [1], [0, 0, 1, 1], [], []>} : vector<128x128xbf16>, vector<128x1024xbf16>, vector<128x1024xf32> -> vector<128x1024xf32>
    %24 = vector.shape_cast %23 : vector<128x1024xf32> to vector<16x8x1024xf32>
    %cst_18 = arith.constant dense<0xFF800000> : vector<8x1024xf32>
    %25 = vector.multi_reduction <maximumf>, %24, %cst_18 [0] : vector<16x8x1024xf32> to vector<8x1024xf32>
    %c0_19 = arith.constant 0 : index
    %c0_20 = arith.constant 0 : index
    %26 = vector.load %arg10[%c0_19, %c0_20] : memref<8x1024xf32, #tpu.memory_space<vmem>>, vector<8x1024xf32>
    %27 = arith.maximumf %26, %25 : vector<8x1024xf32>
    %c0_21 = arith.constant 0 : index
    %c0_22 = arith.constant 0 : index
    %28 = vector.load %arg10[%c0_21, %c0_22] : memref<8x1024xf32, #tpu.memory_space<vmem>>, vector<8x1024xf32>
    tpu.vector_store %arg10[%c0_21, %c0_22], %27 {strides = array<i32>} : memref<8x1024xf32, #tpu.memory_space<vmem>>, vector<8x1024xf32>,
    %c0_i32_23 = arith.constant 0 : i32
    %29 = arith.cmpi eq, %arg1, %c0_i32_23 : i32
    %30 = arith.extui %29 : i1 to i32
    %c0_i32_24 = arith.constant 0 : i32
    %31 = arith.cmpi ne, %30, %c0_i32_24 : i32
    scf.if %31 {
      %c0_25 = arith.constant 0 : index
      %c0_26 = arith.constant 0 : index
      %32 = vector.load %arg10[%c0_25, %c0_26] : memref<8x1024xf32, #tpu.memory_space<vmem>>, vector<8x1024xf32>
      %cst_27 = arith.constant dense<0xFF800000> : vector<1024xf32>
      %33 = vector.multi_reduction <maximumf>, %32, %cst_27 [0] : vector<8x1024xf32> to vector<1024xf32>
      %34 = vector.shape_cast %33 : vector<1024xf32> to vector<1x1024xf32>
      %c0_28 = arith.constant 0 : index
      %c0_29 = arith.constant 0 : index
      %35 = vector.load %arg8[%c0_28, %c0_29] : memref<1x1024xf32, #tpu.memory_space<vmem>>, vector<1x1024xf32>
      %36 = arith.addf %34, %35 : vector<1x1024xf32>
      %37 = arith.truncf %36 : vector<1x1024xf32> to vector<1x1024xbf16>
      %c0_30 = arith.constant 0 : index
      %c0_31 = arith.constant 0 : index
      %c0_32 = arith.constant 0 : index
      %38 = vector.load %arg9[%c0_30, %c0_31, %c0_32] : memref<1x1x1024xbf16, #tpu.memory_space<vmem>>, vector<1x1x1024xbf16>
      %39 = vector.shape_cast %38 : vector<1x1x1024xbf16> to vector<1x1024xbf16>
      %40 = vector.shape_cast %37 : vector<1x1024xbf16> to vector<1x1x1024xbf16>
      tpu.vector_store %arg9[%c0_30, %c0_31, %c0_32], %40 {strides = array<i32>} : memref<1x1x1024xbf16, #tpu.memory_space<vmem>>, vector<1x1x1024xbf16>,
    } else {
    }
    return
  }
  func.func @transform_0(%arg0: i32, %arg1: i32) -> (i32, i32, i32) {
    %c0_i32 = arith.constant 0 : i32
    %c0_i32_0 = arith.constant 0 : i32
    return %arg0, %arg1, %c0_i32 : i32, i32, i32
  }
  func.func @transform_1(%arg0: i32, %arg1: i32) -> (i32, i32, i32) {
    %c0_i32 = arith.constant 0 : i32
    %c0_i32_0 = arith.constant 0 : i32
    %c0_i32_1 = arith.constant 0 : i32
    return %arg0, %c0_i32, %c0_i32_0 : i32, i32, i32
  }
  func.func @transform_2(%arg0: i32, %arg1: i32) -> (i32, i32) {
    %c0_i32 = arith.constant 0 : i32
    %c0_i32_0 = arith.constant 0 : i32
    %c0_i32_1 = arith.constant 0 : i32
    return %c0_i32, %c0_i32_0 : i32, i32
  }
  func.func @transform_3(%arg0: i32, %arg1: i32) -> (i32, i32) {
    %c0_i32 = arith.constant 0 : i32
    %c0_i32_0 = arith.constant 0 : i32
    %c0_i32_1 = arith.constant 0 : i32
    return %c0_i32, %c0_i32_0 : i32, i32
  }
  func.func @transform_4(%arg0: i32, %arg1: i32) -> (i32, i32) {
    %c0_i32 = arith.constant 0 : i32
    %c0_i32_0 = arith.constant 0 : i32
    %c0_i32_1 = arith.constant 0 : i32
    return %c0_i32, %c0_i32_0 : i32, i32
  }
  func.func @transform_5(%arg0: i32, %arg1: i32) -> (i32, i32) {
    %c0_i32 = arith.constant 0 : i32
    %c0_i32_0 = arith.constant 0 : i32
    %c0_i32_1 = arith.constant 0 : i32
    return %c0_i32, %c0_i32_0 : i32, i32
  }
  func.func @transform_6(%arg0: i32, %arg1: i32) -> (i32, i32) {
    %c0_i32 = arith.constant 0 : i32
    %c0_i32_0 = arith.constant 0 : i32
    %c0_i32_1 = arith.constant 0 : i32
    return %c0_i32, %c0_i32_0 : i32, i32
  }
  func.func @transform_7(%arg0: i32, %arg1: i32) -> (i32, i32, i32) {
    %c0_i32 = arith.constant 0 : i32
    %c0_i32_0 = arith.constant 0 : i32
    %c0_i32_1 = arith.constant 0 : i32
    return %arg0, %c0_i32, %c0_i32_0 : i32, i32, i32
  }
}

</mosaic_0001>

<bundles_post_ra>
// kernel: _lambda_.6
= control target key start
LH: loop header
LB: loop body
LE: loop exit
PB: predicated region body
PF: predicated region fallthrough
CT: control target
= control target key end

     0   :  { %s2280_s24 = smov 0   ;;  %s2282_s25 = smov 0   ;;  %s2756_s0 = inlined_call_operand.vmem [shape: bf16[2,128,8], index: 0, kind: input, shape index: {}]   ;;  %s2757_s1 = inlined_call_operand.vmem [shape: bf16[2,8,64], index: 1, kind: input, shape index: {}]   ;;  %s2758_s2 = inlined_call_operand.vmem [shape: f32[1,64], index: 2, kind: input, shape index: {}]   ;;  %s2759_s3 = inlined_call_operand.vmem [shape: bf16[64,128], index: 3, kind: input, shape index: {}]   ;;  %s2760_s4 = inlined_call_operand.vmem [shape: f32[1,128], index: 4, kind: input, shape index: {}]   ;;  %s2761_s5 = inlined_call_operand.vmem [shape: bf16[128,1024], index: 5, kind: input, shape index: {}]   ;;  %s2762_s6 = inlined_call_operand.vmem [shape: f32[1,1024], index: 6, kind: input, shape index: {}]   ;;  %s2763_s7 = inlined_call_operand.vmem [shape: bf16[2,1,1024], index: 7, kind: output, shape index: {}]  }
   0x1   :  { %s2284_s26 = smov 0  }
   0x2 LB: > { %s29_s27 = sadd.s32 1, %s2232_s25  ;;  %p2006_p0 = scmp.ge.s32.totalorder %s2236_s26, 1  ;;  %s2236_s26 = sphi %s2284_s26, %s17_s26   ;;  %s2232_s25 = sphi %s2282_s25, %s2777_s25   ;;  %s2228_s24 = sphi %s2280_s24, %s2776_s24  }
   0x3   : > { %p31_p1 = scmp.ge.s32.totalorder %s29_s27, 2  ;;  %p265_p2 = scmp.lt.s32.totalorder %s2236_s26, 3 }
   0x5   : > { %s2779_s27 = smov (%p31_p1, %s29_s27), 0  ;;  %p266_p3 = pnand %p2006_p0, %p265_p2 }
   0x6   : > { %p305_p4 = scmp.lt.s32.totalorder (!%p266_p3), %s2228_s24, 1 }
   0x7   : > { %269 = sbr.rel (%p266_p3) target bundleno = 778 (0x30a), region = 48 }
   0xc   : > { %v2210_v0 = vld [vmem:[%s2759_s3 + $0x18] sm:$0xff]   ;;  %s2781_s24 = smov (!%p305_p4, %s2228_s24), 1  ;;  %vm424_vm0 = vcmask 1043456   ;;  %vm399_vm1 = vcmask 64512   ;;  %v2211_v11 = vld [vmem:[%s2759_s3 + $0x10] sm:$0xff]   ;;  %v2212_v12 = vld [vmem:[%s2759_s3 + $0x8] sm:$0xff]  }
   0xd   : > { %2151 = vmatprep.subr.bf16.mxu1 %v2210_v0  ;;  %s2111_s30 = sshll.u32 %s2781_s24, 6  ;;  %s2009_s8 = sshll.u32 %s2781_s24, 2  ;;  %v2213_v13 = vld [vmem:[%s2759_s3] sm:$0xff]   ;;  %v2337_v16 = vld [vmem:[%s2761_s5 + $0x1c8] sm:$0xff]  ;;  %vm588_vm2 = vcmask 523264   ;;  %vm1889_vm3 = vcmask 1040384  }
   0xe   : > { %2152 = vmatpush3.bf16.msra.mxu1 %v2210_v0  ;;  %s312_s11 = scalar_lea.vmem %s2756_s0, %s2111_s30  ;;  %s317_s14 = scalar_lea.vmem %s2757_s1, %s2009_s8  ;;  %v790_v14 = vld [vmem:[%s2761_s5 + $0x1c0] sm:$0xff]  ;;  %v2342_v19 = vld [vmem:[%s2761_s5 + $0x1e8] sm:$0xff]  ;;  %vm1890_vm4 = vsmask.f32 256  ;;  %vm1892_vm5 = vcmask 1041409   ;;  %vm1896_vm9 = vcmask 1042434  }
   0xf   : > { %v335_v1 = vld [vmem:[%s317_s14] sm:$0xf]  ;;  %v2203_v4 = vld [vmem:[%s312_s11 + $0x8] sm:$0xff]   ;;  %v2204_v5 = vld [vmem:[%s312_s11 + $0x10] sm:$0xff]   ;;  %2153 = vmatprep.subr.bf16.mxu1 %v2211_v11  ;;  %v2099_v22 = vcombine.low %v2337_v16, %v2342_v19  ;;  %v2100_v23 = vcombine.high %v2337_v16, %v2342_v19  ;;  %vm1893_vm6 = vsmask.f32 1280 }
  0x10   : > { %v2202_v2 = vld [vmem:[%s312_s11] sm:$0xff]   ;;  %2175 = vmatprep.subr.msk.bf16.mxu0 %vm424_vm0, %v335_v1  ;;  %v426_v3 = vsel %vm424_vm0, %v335_v1, 0  ;;  %v2205_v6 = vld [vmem:[%s312_s11 + $0x18] sm:$0xff]   ;;  %v2207_v8 = vld [vmem:[%s312_s11 + $0x28] sm:$0xff]   ;;  %vm1897_vm10 = vsmask.f32 2304 }
  0x11   : > { %2134 = vmatpush3.bf16.msra.mxu0 %v426_v3  ;;  %2135 = vmatprep.mubr.msk.bf16.mxu0 %vm399_vm1, %v2202_v2  ;;  %v2206_v7 = vld [vmem:[%s312_s11 + $0x20] sm:$0xff]   ;;  %v2208_v9 = vld [vmem:[%s312_s11 + $0x30] sm:$0xff]   ;;  %v2209_v10 = vld [vmem:[%s312_s11 + $0x38] sm:$0xff]   ;;  %vm1900_vm13 = vcmask 1043459   ;;  %vm1901_vm14 = vsmask.f32 3328 }
  0x12   : > { %2154 = vmatpush3.bf16.msra.mxu1 %v2211_v11  ;;  %v794_v15 = vld [vmem:[%s2761_s5 + $0x1e0] sm:$0xff]  ;;  %v783_v51 = vld [vmem:[%s2761_s5 + $0x188] sm:$0xff]  ;;  %vm2692_vm7 = vmand %vm1889_vm3, %vm1890_vm4  ;;  %s2010_s22 = sshll.u32 %s2781_s24, 3 }
  0x13   : > { %2155 = vmatprep.subr.bf16.mxu1 %v2212_v12  ;;  %v2097_v17 = vcombine.low %v790_v14, %v794_v15  ;;  %v2098_v18 = vcombine.high %v790_v14, %v794_v15  ;;  %v782_v20 = vld [vmem:[%s2761_s5 + $0x180] sm:$0xff]  ;;  %v787_v52 = vld [vmem:[%s2761_s5 + $0x1a8] sm:$0xff]  ;;  %vm2696_vm8 = vmand %vm1892_vm5, %vm1893_vm6  ;;  %vm1908_vm5 = vcmask 1045509   ;;  %vm1909_vm6 = vsmask.f32 5376  ;;  %s321_s29 = scalar_lea.vmem %s2763_s7, %s2010_s22 }
  0x14   : > { %2136 = vmatmul.mubr.msk.bf16.vlgmr.msra.gmra.mxu0 %vm399_vm1, %v2203_v4  ;;  %v786_v21 = vld [vmem:[%s2761_s5 + $0x1a0] sm:$0xff]  ;;  %v2092_v60 = vcombine.high %v783_v51, %v787_v52  ;;  %v775_v62 = vld [vmem:[%s2761_s5 + $0x148] sm:$0xff]  ;;  %vm1895_vm11 = vmor %vm2696_vm8, %vm2692_vm7 }
  0x15   : > { %2139 = vmatprep.mubr.msk.bf16.mxu0 %vm399_vm1, %v2204_v5  ;;  %v2090_v24 = vcombine.high %v782_v20, %v786_v21  ;;  %v774_v25 = vld [vmem:[%s2761_s5 + $0x140] sm:$0xff]  ;;  %1118 = vmatprep.subr.bf16.mxu0 %v2098_v18  ;;  %v2089_v27 = vcombine.low %v782_v20, %v786_v21  ;;  %v779_v63 = vld [vmem:[%s2761_s5 + $0x168] sm:$0xff]  ;;  %v2091_v5 = vcombine.low %v783_v51, %v787_v52  ;;  %vm1898_vm12 = vmand %vm1896_vm9, %vm1897_vm10  ;;  %vm1912_vm9 = vcmask 1046534  }
  0x16   : > { %2156 = vmatpush3.bf16.msra.mxu1 %v2212_v12  ;;  %v778_v26 = vld [vmem:[%s2761_s5 + $0x160] sm:$0xff]  ;;  %1119 = vmatpush1.bf16.msra.mxu0 %v2097_v17  ;;  %v2083_v16 = vcombine.low %v775_v62, %v779_v63  ;;  %v759_v20 = vld [vmem:[%s2761_s5 + $0xc8] sm:$0xff]  ;;  %vm2706_vm15 = vmor %vm1898_vm12, %vm1895_vm11  ;;  %vm1913_vm10 = vsmask.f32 6400 }
  0x17   : > { %2157 = vmatprep.subr.bf16.mxu1 %v2213_v13  ;;  %1120 = vmatprep.subr.bf16.mxu0 %v2090_v24  ;;  %v2082_v28 = vcombine.high %v774_v25, %v778_v26  ;;  %v766_v29 = vld [vmem:[%s2761_s5 + $0x100] sm:$0xff]  ;;  %v2081_v31 = vcombine.low %v774_v25, %v778_v26  ;;  %v763_v21 = vld [vmem:[%s2761_s5 + $0xe8] sm:$0xff]  ;;  %vm2710_vm0 = vmand %vm1900_vm13, %vm1901_vm14  ;;  %vm1916_vm13 = vcmask 1047559   ;;  %vm1917_vm14 = vsmask.f32 7424 }
  0x18   : > { %v770_v30 = vld [vmem:[%s2761_s5 + $0x120] sm:$0xff]  ;;  %v755_v51 = vld [vmem:[%s2761_s5 + $0xa8] sm:$0xff]  ;;  %vm1903_vm3 = vmor %vm2710_vm0, %vm2706_vm15 }
  0x19   : > { %v2074_v32 = vcombine.high %v766_v29, %v770_v30  ;;  %v758_v33 = vld [vmem:[%s2761_s5 + $0xc0] sm:$0xff]  ;;  %v2073_v35 = vcombine.low %v766_v29, %v770_v30  ;;  %v2068_v29 = vcombine.high %v759_v20, %v763_v21  ;;  %vm2728_vm8 = vmand %vm1908_vm5, %vm1909_vm6 }
  0x1a   : > { %2158 = vmatpush3.bf16.msra.mxu1 %v2213_v13  ;;  %1121 = vmatpush1.bf16.msra.mxu0 %v2089_v27  ;;  %v762_v34 = vld [vmem:[%s2761_s5 + $0xe0] sm:$0xff]  ;;  %vm1914_vm12 = vmand %vm1912_vm9, %vm1913_vm10 }
  0x1b   : > { %1231 = vmatprep.subr.bf16.mxu1 %v2100_v23  ;;  %1122 = vmatprep.subr.bf16.mxu0 %v2082_v28  ;;  %v2066_v36 = vcombine.high %v758_v33, %v762_v34  ;;  %v2065_v37 = vcombine.low %v758_v33, %v762_v34  ;;  %v2375_v40 = vld [vmem:[%s2758_s2] ss:$0 sm:$0xff]  ;;  %vm1918_vm0 = vmand %vm1916_vm13, %vm1917_vm14 }
  0x1c   : > { %2140 = vmatmul.mubr.msk.bf16.gmra.mxu0 %vm399_vm1, %v2205_v6 }
  0x1d   : > { %2143 = vmatprep.mubr.msk.bf16.mxu0 %vm399_vm1, %v2206_v7  ;;  %v2084_v7 = vcombine.high %v775_v62, %v779_v63  ;;  %v734_v63 = vld [vmem:[%s2761_s5] sm:$0xff] }
  0x1e   : > { %1123 = vmatpush1.bf16.msra.mxu0 %v2081_v31 }
  0x1f   : > { %1124 = vmatprep.subr.bf16.mxu0 %v2074_v32 }
  0x22   : > { %1125 = vmatpush1.bf16.msra.mxu0 %v2073_v35 }
  0x23   : > { %1126 = vmatprep.subr.bf16.mxu0 %v2066_v36  ;;  %v2067_v36 = vcombine.low %v759_v20, %v763_v21 }
  0x24   : > { %2144 = vmatmul.mubr.msk.bf16.gmra.mxu0 %vm399_vm1, %v2207_v8 }
  0x25   : > { %2147 = vmatprep.mubr.msk.bf16.mxu0 %vm399_vm1, %v2208_v9  ;;  %v767_v9 = vld [vmem:[%s2761_s5 + $0x108] sm:$0xff] }
  0x26   : > { %1127 = vmatpush1.bf16.msra.mxu0 %v2065_v37 }
  0x2c   : > { %2148 = vmatmul.mubr.msk.bf16.gmra.mxu0 %vm399_vm1, %v2209_v10  ;;  %v771_v10 = vld [vmem:[%s2761_s5 + $0x128] sm:$0xff]  ;;  %vm1904_vm1 = vcmask 1044484  }
  0x2d   : > { %v2076_v18 = vcombine.high %v767_v9, %v771_v10  ;;  %v2075_v27 = vcombine.low %v767_v9, %v771_v10  ;;  %v796_v9 = vld [vmem:[%s2761_s5 + $0x1f0] sm:$0xff]  ;;  %v793_v10 = vld [vmem:[%s2761_s5 + $0x1d8] sm:$0xff] }
  0xd4   : > { %v2137_v38 = vpop.f32.mrf.mxu0 }
  0xd5   : > { %v471_v44 = vadd.f32 %v2137_v38, %v2375_v40 }
  0xd6   : > { %v462_v39 = vpop.f32.mrf.mxu0 }
  0xd7   : > { %v463_v42 = vadd.f32 %v2375_v40, %v462_v39  ;;  %v527_v53 = vmax.f32 %v471_v44, 0.0 }
  0xd8   : > { %v2138_v41 = vpop.f32.mrf.mxu0 }
  0xd9   : > { %v474_v43 = vadd.f32 %v2138_v41, %v2375_v40  ;;  %v525_v49 = vmax.f32 %v463_v42, 0.0 }
  0xda   : > { %v465_v45 = vpop.f32.mrf.mxu0 }
  0xdb   : > { %v466_v46 = vadd.f32 %v2375_v40, %v465_v45  ;;  %v528_v47 = vmax.f32 %v474_v43, 0.0 }
  0xdc   : > { %v2141_v48 = vpop.f32.mrf.mxu0 }
  0xdd   : > { %v526_v50 = vmax.f32 %v466_v46, 0.0  ;;  %v487_v54 = vadd.f32 %v2141_v48, %v2375_v40  ;;  %v542_v58 = vpack.c.bf16 %v528_v47, %v527_v53  ;;  %v750_v48 = vld [vmem:[%s2761_s5 + $0x80] sm:$0xff] }
  0xde   : > { %v478_v55 = vpop.f32.mrf.mxu0 }
  0xdf   : > { %v479_v56 = vadd.f32 %v2375_v40, %v478_v55  ;;  %v541_v57 = vpack.c.bf16 %v526_v50, %v525_v49  ;;  %v531_v0 = vmax.f32 %v487_v54, 0.0  ;;  %v754_v49 = vld [vmem:[%s2761_s5 + $0xa0] sm:$0xff] }
  0xe0   : > { %v2142_v59 = vpop.f32.mrf.mxu0  ;;  %v2058_v50 = vcombine.high %v750_v48, %v754_v49  ;;  %v2057_v52 = vcombine.low %v750_v48, %v754_v49  ;;  %v742_v55 = vld [vmem:[%s2761_s5 + $0x40] sm:$0xff]  ;;  %v768_v48 = vld [vmem:[%s2761_s5 + $0x110] sm:$0xff] }
  0xe1   : > { %v490_v61 = vadd.f32 %v2142_v59, %v2375_v40  ;;  %2159 = vmatprep.mubr.msk.bf16.mxu1 %vm588_vm2, %v541_v57  ;;  %v529_v2 = vmax.f32 %v479_v56, 0.0  ;;  %v746_v56 = vld [vmem:[%s2761_s5 + $0x60] sm:$0xff]  ;;  %v743_v57 = vld [vmem:[%s2761_s5 + $0x48] sm:$0xff] }
  0xe2   : > { %v481_v1 = vpop.f32.mrf.mxu0  ;;  %2160 = vmatmul.mubr.msk.bf16.vlgmr.msra.gmra.mxu1 %vm588_vm2, %v542_v58  ;;  %1128 = vmatprep.subr.bf16.mxu0 %v2058_v50  ;;  %v2050_v58 = vcombine.high %v742_v55, %v746_v56  ;;  %v747_v59 = vld [vmem:[%s2761_s5 + $0x68] sm:$0xff]  ;;  %v769_v50 = vld [vmem:[%s2761_s5 + $0x118] sm:$0xff] }
  0xe3   : > { %v532_v3 = vmax.f32 %v490_v61, 0.0  ;;  %v482_v4 = vadd.f32 %v2375_v40, %v481_v1  ;;  %1232 = vmatpush1.bf16.msra.mxu1 %v2099_v22  ;;  %1129 = vmatpush1.bf16.msra.mxu0 %v2057_v52  ;;  %v2051_v61 = vcombine.low %v743_v57, %v747_v59  ;;  %v2052_v62 = vcombine.high %v743_v57, %v747_v59  ;;  %v735_v1 = vld [vmem:[%s2761_s5 + $0x8] sm:$0xff]  ;;  %v760_v59 = vld [vmem:[%s2761_s5 + $0xd0] sm:$0xff] }
  0xe4   : > { %v2145_v6 = vpop.f32.mrf.mxu0  ;;  %1233 = vmatprep.subr.bf16.mxu1 %v2092_v60  ;;  %v2049_v60 = vcombine.low %v742_v55, %v746_v56  ;;  %1130 = vmatprep.subr.bf16.mxu0 %v2050_v58 }
  0xe5   : > { %v530_v8 = vmax.f32 %v482_v4, 0.0  ;;  %v544_v11 = vpack.c.bf16 %v532_v3, %v531_v0  ;;  %v503_v12 = vadd.f32 %v2145_v6, %v2375_v40  ;;  %v738_v0 = vld [vmem:[%s2761_s5 + $0x20] sm:$0xff]  ;;  %v739_v3 = vld [vmem:[%s2761_s5 + $0x28] sm:$0xff] }
  0xe6   : > { %v494_v13 = vpop.f32.mrf.mxu0  ;;  %v2041_v4 = vcombine.low %v734_v63, %v738_v0  ;;  %v2044_v6 = vcombine.high %v735_v1, %v739_v3 }
  0xe7   : > { %v543_v14 = vpack.c.bf16 %v530_v8, %v529_v2  ;;  %v495_v15 = vadd.f32 %v2375_v40, %v494_v13  ;;  %1234 = vmatpush1.bf16.msra.mxu1 %v2091_v5  ;;  %v535_v22 = vmax.f32 %v503_v12, 0.0  ;;  %1131 = vmatpush1.bf16.msra.mxu0 %v2049_v60  ;;  %v2042_v2 = vcombine.high %v734_v63, %v738_v0  ;;  %v792_v8 = vld [vmem:[%s2761_s5 + $0x1d0] sm:$0xff]  ;;  %v797_v13 = vld [vmem:[%s2761_s5 + $0x1f8] sm:$0xff] }
  0xe8   : > { %v2146_v17 = vpop.f32.mrf.mxu0  ;;  %1235 = vmatprep.subr.bf16.mxu1 %v2084_v7  ;;  %v2043_v5 = vcombine.low %v735_v1, %v739_v3  ;;  %v2238_v7 = vmov 0   ;;  %v2102_v12 = vcombine.high %v792_v8, %v796_v9  ;;  %v765_v63 = vld [vmem:[%s2761_s5 + $0xf8] sm:$0xff] }
  0xe9   : > { %2163 = vmatprep.mubr.msk.bf16.mxu1 %vm588_vm2, %v543_v14  ;;  %v506_v19 = vadd.f32 %v2146_v17, %v2375_v40  ;;  %v533_v24 = vmax.f32 %v495_v15, 0.0  ;;  %1132 = vmatprep.subr.bf16.mxu0 %v2042_v2  ;;  %v2103_v14 = vcombine.low %v793_v10, %v797_v13  ;;  %v2104_v15 = vcombine.high %v793_v10, %v797_v13  ;;  %v753_v10 = vld [vmem:[%s2761_s5 + $0x98] sm:$0xff] }
  0xea   : > { %2164 = vmatmul.mubr.msk.bf16.gmra.mxu1 %vm588_vm2, %v544_v11  ;;  %v497_v23 = vpop.f32.mrf.mxu0  ;;  %1150 = vmatprep.mubr.bf16.mxu0 %v2238_v7  ;;  %v2101_v11 = vcombine.low %v792_v8, %v796_v9  ;;  %v756_v9 = vld [vmem:[%s2761_s5 + $0xb0] sm:$0xff] }
  0xeb   : > { %v536_v25 = vmax.f32 %v506_v19, 0.0  ;;  %v498_v26 = vadd.f32 %v2375_v40, %v497_v23  ;;  %1236 = vmatpush1.bf16.msra.mxu1 %v2083_v16  ;;  %1133 = vmatpush1.bf16.msra.mxu0 %v2041_v4 }
  0xec   : > { %v2149_v28 = vpop.f32.mrf.mxu0  ;;  %1237 = vmatprep.subr.bf16.mxu1 %v2076_v18  ;;  %1344 = vmatprep.subr.bf16.mxu0 %v2102_v12  ;;  %v2478_v18 = vld [vmem:[%s2760_s4] ss:$0 sm:$0xff] }
  0xed   : > { %v534_v30 = vmax.f32 %v498_v26, 0.0  ;;  %v546_v31 = vpack.c.bf16 %v536_v25, %v535_v22  ;;  %v519_v32 = vadd.f32 %v2149_v28, %v2375_v40  ;;  %v785_v28 = vld [vmem:[%s2761_s5 + $0x198] sm:$0xff] }
  0xee   : > { %v510_v33 = vpop.f32.mrf.mxu0 }
  0xef   : > { %v545_v34 = vpack.c.bf16 %v534_v30, %v533_v24  ;;  %v511_v35 = vadd.f32 %v2375_v40, %v510_v33  ;;  %1238 = vmatpush1.bf16.msra.mxu1 %v2075_v27  ;;  %v539_v39 = vmax.f32 %v519_v32, 0.0  ;;  %v784_v24 = vld [vmem:[%s2761_s5 + $0x190] sm:$0xff] }
  0xf0   : > { %v2150_v37 = vpop.f32.mrf.mxu0  ;;  %1239 = vmatprep.subr.bf16.mxu1 %v2068_v29  ;;  %v788_v27 = vld [vmem:[%s2761_s5 + $0x1b0] sm:$0xff]  ;;  %v789_v29 = vld [vmem:[%s2761_s5 + $0x1b8] sm:$0xff] }
  0xf1   : > { %2167 = vmatprep.mubr.msk.bf16.mxu1 %vm588_vm2, %v545_v34  ;;  %v522_v38 = vadd.f32 %v2150_v37, %v2375_v40  ;;  %v537_v42 = vmax.f32 %v511_v35, 0.0  ;;  %v776_v33 = vld [vmem:[%s2761_s5 + $0x150] sm:$0xff]  ;;  %v2094_v35 = vcombine.high %v784_v24, %v788_v27 }
  0xf2   : > { %2168 = vmatmul.mubr.msk.bf16.gmra.mxu1 %vm588_vm2, %v546_v31  ;;  %v513_v41 = vpop.f32.mrf.mxu0  ;;  %v780_v37 = vld [vmem:[%s2761_s5 + $0x170] sm:$0xff] }
  0xf3   : > { %v540_v43 = vmax.f32 %v522_v38, 0.0  ;;  %v514_v44 = vadd.f32 %v2375_v40, %v513_v41  ;;  %1240 = vmatpush1.bf16.msra.mxu1 %v2067_v36  ;;  %v751_v40 = vld [vmem:[%s2761_s5 + $0x88] sm:$0xff]  ;;  %v2096_v36 = vcombine.high %v785_v28, %v789_v29  ;;  %v777_v38 = vld [vmem:[%s2761_s5 + $0x158] sm:$0xff]  ;;  %v2085_v52 = vcombine.low %v776_v33, %v780_v37 }
  0xf4   : > { %v2059_v53 = vcombine.low %v751_v40, %v755_v51  ;;  %v2060_v54 = vcombine.high %v751_v40, %v755_v51  ;;  %v772_v40 = vld [vmem:[%s2761_s5 + $0x130] sm:$0xff]  ;;  %v773_v51 = vld [vmem:[%s2761_s5 + $0x138] sm:$0xff] }
  0xf5   : > { %v538_v45 = vmax.f32 %v514_v44, 0.0  ;;  %v548_v46 = vpack.c.bf16 %v540_v43, %v539_v39  ;;  %v781_v39 = vld [vmem:[%s2761_s5 + $0x178] sm:$0xff]  ;;  %v2095_v43 = vcombine.low %v785_v28, %v789_v29  ;;  %v2078_v57 = vcombine.high %v768_v48, %v772_v40 }
  0xf6   : > { %1241 = vmatprep.subr.bf16.mxu1 %v2060_v54  ;;  %v2087_v55 = vcombine.low %v777_v38, %v781_v39  ;;  %v2080_v58 = vcombine.high %v769_v50, %v773_v51  ;;  %v2077_v1 = vcombine.low %v768_v48, %v772_v40  ;;  %v2079_v2 = vcombine.low %v769_v50, %v773_v51 }
  0xf7   : > { %v547_v47 = vpack.c.bf16 %v538_v45, %v537_v42  ;;  %1242 = vmatpush1.bf16.msra.mxu1 %v2059_v53  ;;  %v2093_v42 = vcombine.low %v784_v24, %v788_v27  ;;  %v2086_v45 = vcombine.high %v776_v33, %v780_v37  ;;  %v745_v24 = vld [vmem:[%s2761_s5 + $0x58] sm:$0xff] }
  0xf8   : > { %1243 = vmatprep.subr.bf16.mxu1 %v2052_v62  ;;  %v761_v62 = vld [vmem:[%s2761_s5 + $0xd8] sm:$0xff] }
  0xf9   : > { %2171 = vmatprep.mubr.msk.bf16.mxu1 %vm588_vm2, %v547_v47 }
  0xfa   : > { %2172 = vmatmul.mubr.msk.bf16.gmra.mxu1 %vm588_vm2, %v548_v46  ;;  %v2088_v46 = vcombine.high %v777_v38, %v781_v39  ;;  %vm1905_vm2 = vsmask.f32 4352 }
  0xfb   : > { %1244 = vmatpush1.bf16.msra.mxu1 %v2051_v61  ;;  %1263 = vmatprep.mubr.bf16.mxu1 %v2238_v7  ;;  %v764_v61 = vld [vmem:[%s2761_s5 + $0xf0] sm:$0xff]  ;;  %vm1906_vm4 = vmand %vm1904_vm1, %vm1905_vm2 }
  0xfc   : > { %1245 = vmatprep.subr.bf16.mxu1 %v2044_v6  ;;  %v2070_v4 = vcombine.high %v760_v59, %v764_v61  ;;  %v752_v6 = vld [vmem:[%s2761_s5 + $0x90] sm:$0xff]  ;;  %v2069_v12 = vcombine.low %v760_v59, %v764_v61  ;;  %vm2724_vm7 = vmor %vm1906_vm4, %vm1903_vm3 }
  0xfd   : > { %vm1911_vm11 = vmor %vm2728_vm8, %vm2724_vm7 }
  0xfe   : > { %vm1915_vm15 = vmor %vm1914_vm12, %vm1911_vm11 }
  0xff   : > { %1246 = vmatpush1.bf16.msra.mxu1 %v2043_v5  ;;  %v2072_v5 = vcombine.high %v761_v62, %v765_v63  ;;  %vm1919_vm1 = vmor %vm1918_vm0, %vm1915_vm15 }
 0x100   : > { %1457 = vmatprep.subr.bf16.mxu1 %v2104_v15  ;;  %v2071_v15 = vcombine.low %v761_v62, %v765_v63 }
 0x1a2   : > { %v2161_v16 = vpop.f32.mrf.mxu1 }
 0x1a3   : > { %v656_v41 = vadd.f32 %v2161_v16, %v2478_v18 }
 0x1a4   : > { %v647_v17 = vpop.f32.mrf.mxu1 }
 0x1a5   : > { %v648_v20 = vadd.f32 %v2478_v18, %v647_v17  ;;  %v712_v49 = vmax.f32 %v656_v41, 0.0  ;;  %v2062_v17 = vcombine.high %v752_v6, %v756_v9 }
 0x1a6   : > { %v2162_v19 = vpop.f32.mrf.mxu1 }
 0x1a7   : > { %v710_v25 = vmax.f32 %v648_v20, 0.0  ;;  %v659_v31 = vadd.f32 %v2162_v19, %v2478_v18  ;;  %v744_v20 = vld [vmem:[%s2761_s5 + $0x50] sm:$0xff] }
 0x1a8   : > { %v650_v21 = vpop.f32.mrf.mxu1 }
 0x1a9   : > { %v651_v22 = vadd.f32 %v2478_v18, %v650_v21  ;;  %v713_v44 = vmax.f32 %v659_v31, 0.0  ;;  %v736_v31 = vld [vmem:[%s2761_s5 + $0x10] sm:$0xff] }
 0x1aa   : > { %v2482_v23 = vpop.f32.mrf.mxu1 }
 0x1ab   : > { %v711_v26 = vmax.f32 %v651_v22, 0.0  ;;  %v2528_v53 = vpack.c.bf16 %v713_v44, %v712_v49  ;;  %v672_v21 = vadd.f32 %v2482_v23, %v2478_v18  ;;  %v748_v22 = vld [vmem:[%s2761_s5 + $0x70] sm:$0xff] }
 0x1ac   : > { %v663_v30 = vpop.f32.mrf.mxu1  ;;  %v2054_v29 = vcombine.high %v744_v20, %v748_v22  ;;  %v2053_v37 = vcombine.low %v744_v20, %v748_v22 }
 0x1ad   : > { %v2497_v32 = vpack.c.bf16 %v711_v26, %v710_v25  ;;  %v664_v60 = vadd.f32 %v2478_v18, %v663_v30  ;;  %v749_v25 = vld [vmem:[%s2761_s5 + $0x78] sm:$0xff]  ;;  %v2061_v26 = vcombine.low %v752_v6, %v756_v9  ;;  %v716_v33 = vmax.f32 %v672_v21, 0.0 }
 0x1ae   : > { %v2166_v34 = vpop.f32.mrf.mxu1  ;;  %v2056_v30 = vcombine.high %v745_v24, %v749_v25  ;;  %v2055_v38 = vcombine.low %v745_v24, %v749_v25 }
 0x1af   : > { %1151 = vmatmul.mubr.bf16.vlgmr.msra.gmra.mxu0 %v2497_v32  ;;  %1264 = vmatmul.mubr.bf16.vlgmr.msra.gmra.mxu1 %v2497_v32  ;;  %v714_v8 = vmax.f32 %v664_v60, 0.0  ;;  %v675_v13 = vadd.f32 %v2166_v34, %v2478_v18  ;;  %v740_v34 = vld [vmem:[%s2761_s5 + $0x30] sm:$0xff] }
 0x1b0   : > { %1345 = vmatpush1.bf16.msra.mxu0 %v2101_v11  ;;  %1458 = vmatpush1.bf16.msra.mxu1 %v2103_v14  ;;  %v666_v47 = vpop.f32.mrf.mxu1  ;;  %v757_v11 = vld [vmem:[%s2761_s5 + $0xb8] sm:$0xff]  ;;  %v2046_v44 = vcombine.high %v736_v31, %v740_v34  ;;  %v2045_v48 = vcombine.low %v736_v31, %v740_v34 }
 0x1b1   : > { %1160 = vmatprep.mubr.bf16.mxu0 %v2238_v7  ;;  %1273 = vmatprep.mubr.bf16.mxu1 %v2238_v7  ;;  %v667_v54 = vadd.f32 %v2478_v18, %v666_v47  ;;  %v2064_v19 = vcombine.high %v753_v10, %v757_v11  ;;  %v717_v23 = vmax.f32 %v675_v13, 0.0  ;;  %v2063_v27 = vcombine.low %v753_v10, %v757_v11 }
 0x1b2   : > { %1346 = vmatprep.subr.bf16.mxu0 %v2094_v35  ;;  %1459 = vmatprep.subr.bf16.mxu1 %v2096_v36  ;;  %v2531_v56 = vpop.f32.mrf.mxu1  ;;  %v737_v35 = vld [vmem:[%s2761_s5 + $0x18] sm:$0xff] }
 0x1b3   : > { %v715_v0 = vmax.f32 %v667_v54, 0.0  ;;  %v741_v36 = vld [vmem:[%s2761_s5 + $0x38] sm:$0xff]  ;;  %v2595_v39 = vpack.c.bf16 %v717_v23, %v716_v33  ;;  %v688_v50 = vadd.f32 %v2531_v56, %v2478_v18 }
 0x1b4   : > { %1347 = vmatpush1.bf16.msra.mxu0 %v2093_v42  ;;  %1460 = vmatpush1.bf16.msra.mxu1 %v2095_v43  ;;  %v679_v3 = vpop.f32.mrf.mxu1  ;;  %v2047_v49 = vcombine.low %v737_v35, %v741_v36 }
 0x1b5   : > { %1348 = vmatprep.subr.bf16.mxu0 %v2086_v45  ;;  %1461 = vmatprep.subr.bf16.mxu1 %v2088_v46  ;;  %v2563_v14 = vpack.c.bf16 %v715_v0, %v714_v8  ;;  %v680_v41 = vadd.f32 %v2478_v18, %v679_v3  ;;  %v2048_v45 = vcombine.high %v737_v35, %v741_v36 }
 0x1b6   : > { %v2170_v16 = vpop.f32.mrf.mxu1 }
 0x1b7   : > { %1161 = vmatmul.mubr.bf16.gmra.mxu0 %v2528_v53  ;;  %1274 = vmatmul.mubr.bf16.gmra.mxu1 %v2528_v53  ;;  %v718_v46 = vmax.f32 %v680_v41, 0.0  ;;  %v691_v51 = vadd.f32 %v2170_v16, %v2478_v18 }
 0x1b8   : > { %1170 = vmatprep.mubr.bf16.mxu0 %v2238_v7  ;;  %1283 = vmatprep.mubr.bf16.mxu1 %v2238_v7  ;;  %v682_v28 = vpop.f32.mrf.mxu1 }
 0x1b9   : > { %1349 = vmatpush1.bf16.msra.mxu0 %v2085_v52  ;;  %1462 = vmatpush1.bf16.msra.mxu1 %v2087_v55  ;;  %v683_v42 = vadd.f32 %v2478_v18, %v682_v28  ;;  %v720_v55 = vmax.f32 %v688_v50, 0.0 }
 0x1ba   : > { %1350 = vmatprep.subr.bf16.mxu0 %v2078_v57  ;;  %1463 = vmatprep.subr.bf16.mxu1 %v2080_v58  ;;  %v2173_v43 = vpop.f32.mrf.mxu1  ;;  %v721_v57 = vmax.f32 %v691_v51, 0.0 }
 0x1bb   : > { %v719_v47 = vmax.f32 %v683_v42, 0.0  ;;  %v704_v63 = vadd.f32 %v2173_v43, %v2478_v18 }
 0x1bc   : > { %v695_v40 = vpop.f32.mrf.mxu1  ;;  %v731_v59 = vpack.c.bf16 %v721_v57, %v720_v55 }
 0x1bd   : > { %1351 = vmatpush1.bf16.msra.mxu0 %v2077_v1  ;;  %1464 = vmatpush1.bf16.msra.mxu1 %v2079_v2  ;;  %v730_v52 = vpack.c.bf16 %v719_v47, %v718_v46  ;;  %v696_v60 = vadd.f32 %v2478_v18, %v695_v40  ;;  %v724_v2 = vmax.f32 %v704_v63, 0.0 }
 0x1be   : > { %1352 = vmatprep.subr.bf16.mxu0 %v2070_v4  ;;  %1465 = vmatprep.subr.bf16.mxu1 %v2072_v5  ;;  %v2174_v54 = vpop.f32.mrf.mxu1 }
 0x1bf   : > { %1171 = vmatmul.mubr.bf16.gmra.mxu0 %v2563_v14  ;;  %1284 = vmatmul.mubr.bf16.gmra.mxu1 %v2563_v14  ;;  %v722_v61 = vmax.f32 %v696_v60, 0.0  ;;  %v707_v0 = vadd.f32 %v2174_v54, %v2478_v18 }
 0x1c0   : > { %1180 = vmatprep.mubr.bf16.mxu0 %v2238_v7  ;;  %1293 = vmatprep.mubr.bf16.mxu1 %v2238_v7  ;;  %v698_v58 = vpop.f32.mrf.mxu1 }
 0x1c1   : > { %1353 = vmatpush1.bf16.msra.mxu0 %v2069_v12  ;;  %1466 = vmatpush1.bf16.msra.mxu1 %v2071_v15  ;;  %v699_v56 = vadd.f32 %v2478_v18, %v698_v58  ;;  %v725_v3 = vmax.f32 %v707_v0, 0.0 }
 0x1c2   : > { %1354 = vmatprep.subr.bf16.mxu0 %v2062_v17  ;;  %1467 = vmatprep.subr.bf16.mxu1 %v2064_v19 }
 0x1c3   : > { %v723_v62 = vmax.f32 %v699_v56, 0.0  ;;  %v733_v4 = vpack.c.bf16 %v725_v3, %v724_v2 }
 0x1c5   : > { %1355 = vmatpush1.bf16.msra.mxu0 %v2061_v26  ;;  %1468 = vmatpush1.bf16.msra.mxu1 %v2063_v27  ;;  %v732_v1 = vpack.c.bf16 %v723_v62, %v722_v61 }
 0x1c6   : > { %1356 = vmatprep.subr.bf16.mxu0 %v2054_v29  ;;  %1469 = vmatprep.subr.bf16.mxu1 %v2056_v30 }
 0x1c7   : > { %1181 = vmatmul.mubr.bf16.gmra.mxu0 %v2595_v39  ;;  %1294 = vmatmul.mubr.bf16.gmra.mxu1 %v2595_v39 }
 0x1c8   : > { %1190 = vmatprep.mubr.bf16.mxu0 %v2238_v7  ;;  %1303 = vmatprep.mubr.bf16.mxu1 %v2238_v7 }
 0x1c9   : > { %1357 = vmatpush1.bf16.msra.mxu0 %v2053_v37  ;;  %1470 = vmatpush1.bf16.msra.mxu1 %v2055_v38 }
 0x1ca   : > { %1358 = vmatprep.subr.bf16.mxu0 %v2046_v44  ;;  %1471 = vmatprep.subr.bf16.mxu1 %v2048_v45 }
 0x1cd   : > { %1359 = vmatpush1.bf16.msra.mxu0 %v2045_v48  ;;  %1472 = vmatpush1.bf16.msra.mxu1 %v2047_v49 }
 0x1cf   : > { %1191 = vmatmul.mubr.bf16.gmra.mxu0 %v730_v52  ;;  %1304 = vmatmul.mubr.bf16.gmra.mxu1 %v730_v52 }
 0x1d0   : > { %1200 = vmatprep.mubr.bf16.mxu0 %v2238_v7  ;;  %1313 = vmatprep.mubr.bf16.mxu1 %v2238_v7 }
 0x1d7   : > { %1201 = vmatmul.mubr.bf16.gmra.mxu0 %v731_v59  ;;  %1314 = vmatmul.mubr.bf16.gmra.mxu1 %v731_v59 }
 0x1d8   : > { %1210 = vmatprep.mubr.bf16.mxu0 %v2238_v7  ;;  %1323 = vmatprep.mubr.bf16.mxu1 %v2238_v7 }
 0x1df   : > { %1211 = vmatmul.mubr.bf16.gmra.mxu0 %v732_v1  ;;  %1324 = vmatmul.mubr.bf16.gmra.mxu1 %v732_v1 }
 0x1e0   : > { %1220 = vmatprep.mubr.bf16.mxu0 %v2238_v7  ;;  %1333 = vmatprep.mubr.bf16.mxu1 %v2238_v7 }
 0x1e7   : > { %1221 = vmatmul.mubr.bf16.gmra.mxu0 %v733_v4  ;;  %1334 = vmatmul.mubr.bf16.gmra.mxu1 %v733_v4 }
 0x1e8   : > { %1376 = vmatprep.mubr.bf16.mxu0 %v2238_v7  ;;  %1489 = vmatprep.mubr.bf16.mxu1 %v2238_v7 }
 0x1ef   : > { %1377 = vmatmul.mubr.bf16.vlgmr.msra.gmra.mxu0 %v2497_v32  ;;  %1490 = vmatmul.mubr.bf16.vlgmr.msra.gmra.mxu1 %v2497_v32 }
 0x1f0   : > { %1386 = vmatprep.mubr.bf16.mxu0 %v2238_v7  ;;  %1499 = vmatprep.mubr.bf16.mxu1 %v2238_v7 }
 0x1f7   : > { %1387 = vmatmul.mubr.bf16.gmra.mxu0 %v2528_v53  ;;  %1500 = vmatmul.mubr.bf16.gmra.mxu1 %v2528_v53 }
 0x1f8   : > { %1396 = vmatprep.mubr.bf16.mxu0 %v2238_v7  ;;  %1509 = vmatprep.mubr.bf16.mxu1 %v2238_v7 }
 0x1ff   : > { %1397 = vmatmul.mubr.bf16.gmra.mxu0 %v2563_v14  ;;  %1510 = vmatmul.mubr.bf16.gmra.mxu1 %v2563_v14 }
 0x200   : > { %1406 = vmatprep.mubr.bf16.mxu0 %v2238_v7  ;;  %1519 = vmatprep.mubr.bf16.mxu1 %v2238_v7 }
 0x207   : > { %1407 = vmatmul.mubr.bf16.gmra.mxu0 %v2595_v39  ;;  %1520 = vmatmul.mubr.bf16.gmra.mxu1 %v2595_v39 }
 0x208   : > { %1416 = vmatprep.mubr.bf16.mxu0 %v2238_v7  ;;  %1529 = vmatprep.mubr.bf16.mxu1 %v2238_v7 }
 0x20f   : > { %1417 = vmatmul.mubr.bf16.gmra.mxu0 %v730_v52  ;;  %1530 = vmatmul.mubr.bf16.gmra.mxu1 %v730_v52 }
 0x210   : > { %1426 = vmatprep.mubr.bf16.mxu0 %v2238_v7  ;;  %1539 = vmatprep.mubr.bf16.mxu1 %v2238_v7 }
 0x217   : > { %1427 = vmatmul.mubr.bf16.gmra.mxu0 %v731_v59  ;;  %1540 = vmatmul.mubr.bf16.gmra.mxu1 %v731_v59 }
 0x218   : > { %1436 = vmatprep.mubr.bf16.mxu0 %v2238_v7  ;;  %1549 = vmatprep.mubr.bf16.mxu1 %v2238_v7 }
 0x21f   : > { %1437 = vmatmul.mubr.bf16.gmra.mxu0 %v732_v1  ;;  %1550 = vmatmul.mubr.bf16.gmra.mxu1 %v732_v1 }
 0x220   : > { %1446 = vmatprep.mubr.bf16.mxu0 %v2238_v7  ;;  %1559 = vmatprep.mubr.bf16.mxu1 %v2238_v7 }
 0x227   : > { %1447 = vmatmul.mubr.bf16.gmra.mxu0 %v733_v4  ;;  %1560 = vmatmul.mubr.bf16.gmra.mxu1 %v733_v4 }
 0x26f   : > { %v1152_v18 = vpop.f32.mrf.mxu0  ;;  %v1265_v32 = vpop.f32.mrf.mxu1 }
 0x271   : > { %v1154_v53 = vpop.f32.mrf.mxu0  ;;  %v1267_v5 = vpop.f32.mrf.mxu1 }
 0x273   : > { %v1156_v6 = vpop.f32.mrf.mxu0  ;;  %v1269_v8 = vpop.f32.mrf.mxu1 }
 0x274   : > { %v1570_v9 = vmax.f32 %v1152_v18, %v1156_v6  ;;  %v1600_v10 = vmax.f32 %v1265_v32, %v1269_v8 }
 0x275   : > { %v1158_v11 = vpop.f32.mrf.mxu0  ;;  %v1271_v12 = vpop.f32.mrf.mxu1 }
 0x276   : > { %v1585_v13 = vmax.f32 %v1154_v53, %v1158_v11  ;;  %v1615_v14 = vmax.f32 %v1267_v5, %v1271_v12 }
 0x277   : > { %v1162_v15 = vpop.f32.mrf.mxu0  ;;  %v1275_v16 = vpop.f32.mrf.mxu1 }
 0x278   : > { %v1571_v17 = vmax.f32 %v1570_v9, %v1162_v15  ;;  %v1601_v19 = vmax.f32 %v1600_v10, %v1275_v16 }
 0x279   : > { %v1164_v20 = vpop.f32.mrf.mxu0  ;;  %v1277_v7 = vpop.f32.mrf.mxu1 }
 0x27a   : > { %v1586_v21 = vmax.f32 %v1585_v13, %v1164_v20  ;;  %v1616_v22 = vmax.f32 %v1615_v14, %v1277_v7 }
 0x27b   : > { %v1166_v24 = vpop.f32.mrf.mxu0  ;;  %v1279_v25 = vpop.f32.mrf.mxu1 }
 0x27c   : > { %v1572_v23 = vmax.f32 %v1571_v17, %v1166_v24  ;;  %v1602_v26 = vmax.f32 %v1601_v19, %v1279_v25 }
 0x27d   : > { %v1168_v27 = vpop.f32.mrf.mxu0  ;;  %v1281_v28 = vpop.f32.mrf.mxu1 }
 0x27e   : > { %v1587_v29 = vmax.f32 %v1586_v21, %v1168_v27  ;;  %v1617_v30 = vmax.f32 %v1616_v22, %v1281_v28 }
 0x27f   : > { %v1172_v31 = vpop.f32.mrf.mxu0  ;;  %v1285_v33 = vpop.f32.mrf.mxu1 }
 0x280   : > { %v1573_v34 = vmax.f32 %v1572_v23, %v1172_v31  ;;  %v1603_v35 = vmax.f32 %v1602_v26, %v1285_v33 }
 0x281   : > { %v1174_v36 = vpop.f32.mrf.mxu0  ;;  %v1287_v37 = vpop.f32.mrf.mxu1 }
 0x282   : > { %v1588_v38 = vmax.f32 %v1587_v29, %v1174_v36  ;;  %v1618_v39 = vmax.f32 %v1617_v30, %v1287_v37 }
 0x283   : > { %v1176_v41 = vpop.f32.mrf.mxu0  ;;  %v1289_v42 = vpop.f32.mrf.mxu1 }
 0x284   : > { %v1574_v43 = vmax.f32 %v1573_v34, %v1176_v41  ;;  %v1604_v44 = vmax.f32 %v1603_v35, %v1289_v42 }
 0x285   : > { %v1178_v45 = vpop.f32.mrf.mxu0  ;;  %v1291_v46 = vpop.f32.mrf.mxu1 }
 0x286   : > { %v1589_v47 = vmax.f32 %v1588_v38, %v1178_v45  ;;  %v1619_v48 = vmax.f32 %v1618_v39, %v1291_v46 }
 0x287   : > { %v1182_v49 = vpop.f32.mrf.mxu0  ;;  %v1295_v40 = vpop.f32.mrf.mxu1 }
 0x288   : > { %v1575_v50 = vmax.f32 %v1574_v43, %v1182_v49  ;;  %v1605_v51 = vmax.f32 %v1604_v44, %v1295_v40 }
 0x289   : > { %v1184_v52 = vpop.f32.mrf.mxu0  ;;  %v1297_v54 = vpop.f32.mrf.mxu1 }
 0x28a   : > { %v1590_v55 = vmax.f32 %v1589_v47, %v1184_v52  ;;  %v1620_v57 = vmax.f32 %v1619_v48, %v1297_v54 }
 0x28b   : > { %v1186_v58 = vpop.f32.mrf.mxu0  ;;  %v1299_v59 = vpop.f32.mrf.mxu1 }
 0x28c   : > { %v1576_v60 = vmax.f32 %v1575_v50, %v1186_v58  ;;  %v1606_v56 = vmax.f32 %v1605_v51, %v1299_v59 }
 0x28d   : > { %v1188_v61 = vpop.f32.mrf.mxu0  ;;  %v1301_v62 = vpop.f32.mrf.mxu1 }
 0x28e   : > { %v1591_v63 = vmax.f32 %v1590_v55, %v1188_v61  ;;  %v1621_v0 = vmax.f32 %v1620_v57, %v1301_v62  ;;  %v1775_v55 = vlaneseq }
 0x28f   : > { %v1192_v1 = vpop.f32.mrf.mxu0  ;;  %v1305_v2 = vpop.f32.mrf.mxu1 }
 0x290   : > { %v1577_v3 = vmax.f32 %v1576_v60, %v1192_v1  ;;  %v1607_v4 = vmax.f32 %v1606_v56, %v1305_v2  ;;  %v2640_v62 = vshrl.u32 %v1775_v55, 7 }
 0x291   : > { %v1194_v18 = vpop.f32.mrf.mxu0  ;;  %v1307_v32 = vpop.f32.mrf.mxu1 }
 0x292   : > { %v1592_v53 = vmax.f32 %v1591_v63, %v1194_v18  ;;  %v1622_v5 = vmax.f32 %v1621_v0, %v1307_v32 }
 0x293   : > { %v1196_v6 = vpop.f32.mrf.mxu0  ;;  %v1309_v8 = vpop.f32.mrf.mxu1 }
 0x294   : > { %v1578_v9 = vmax.f32 %v1577_v3, %v1196_v6  ;;  %v1608_v10 = vmax.f32 %v1607_v4, %v1309_v8 }
 0x295   : > { %v1198_v11 = vpop.f32.mrf.mxu0  ;;  %v1311_v12 = vpop.f32.mrf.mxu1 }
 0x296   : > { %v1593_v13 = vmax.f32 %v1592_v53, %v1198_v11  ;;  %v1623_v14 = vmax.f32 %v1622_v5, %v1311_v12 }
 0x297   : > { %v1202_v15 = vpop.f32.mrf.mxu0  ;;  %v1315_v16 = vpop.f32.mrf.mxu1 }
 0x298   : > { %v1579_v17 = vmax.f32 %v1578_v9, %v1202_v15  ;;  %v1609_v19 = vmax.f32 %v1608_v10, %v1315_v16  ;;  %v1777_v9 = vsub.s32 0, %v2640_v62 }
 0x299   : > { %v1204_v20 = vpop.f32.mrf.mxu0  ;;  %v1317_v7 = vpop.f32.mrf.mxu1 }
 0x29a   : > { %v1594_v21 = vmax.f32 %v1593_v13, %v1204_v20  ;;  %v1624_v22 = vmax.f32 %v1623_v14, %v1317_v7  ;;  %v2654_v13 = vld [vmem:[%s2762_s6] sm:$0xff]  ;;  %v2239_v20 = vmov 1966171168  }
 0x29b   : > { %v1206_v24 = vpop.f32.mrf.mxu0  ;;  %v1319_v25 = vpop.f32.mrf.mxu1  ;;  %v1844_v7 = vunpack.c.l.s4 %v2239_v20 }
 0x29c   : > { %v1580_v23 = vmax.f32 %v1579_v17, %v1206_v24  ;;  %v1610_v26 = vmax.f32 %v1609_v19, %v1319_v25  ;;  %v1785_v17 = vsub.s32 2, %v2640_v62  ;;  %v1781_v19 = vsub.s32 1, %v2640_v62 }
 0x29d   : > { %v1208_v27 = vpop.f32.mrf.mxu0  ;;  %v1321_v28 = vpop.f32.mrf.mxu1 }
 0x29e   : > { %v1595_v29 = vmax.f32 %v1594_v21, %v1208_v27  ;;  %v1625_v30 = vmax.f32 %v1624_v22, %v1321_v28  ;;  %v1789_v21 = vsub.s32 3, %v2640_v62  ;;  %v1778_v28 = vrot.slane %v2654_v13, %v1777_v9 }
 0x29f   : > { %v1212_v31 = vpop.f32.mrf.mxu0  ;;  %v1325_v33 = vpop.f32.mrf.mxu1 }
 0x2a0   : > { %v1581_v34 = vmax.f32 %v1580_v23, %v1212_v31  ;;  %v1611_v35 = vmax.f32 %v1610_v26, %v1325_v33 }
 0x2a1   : > { %v1214_v36 = vpop.f32.mrf.mxu0  ;;  %v1327_v37 = vpop.f32.mrf.mxu1 }
 0x2a2   : > { %v1596_v38 = vmax.f32 %v1595_v29, %v1214_v36  ;;  %v1626_v39 = vmax.f32 %v1625_v30, %v1327_v37  ;;  %v1786_v36 = vrot.slane %v2654_v13, %v1785_v17  ;;  %v1782_v37 = vrot.slane %v2654_v13, %v1781_v19 }
 0x2a3   : > { %v1216_v41 = vpop.f32.mrf.mxu0  ;;  %v1329_v42 = vpop.f32.mrf.mxu1 }
 0x2a4   : > { %v1582_v43 = vmax.f32 %v1581_v34, %v1216_v41  ;;  %v1612_v44 = vmax.f32 %v1611_v35, %v1329_v42 }
 0x2a5   : > { %v1218_v45 = vpop.f32.mrf.mxu0  ;;  %v1331_v46 = vpop.f32.mrf.mxu1 }
 0x2a6   : > { %v1597_v47 = vmax.f32 %v1596_v38, %v1218_v45  ;;  %v1627_v48 = vmax.f32 %v1626_v39, %v1331_v46  ;;  %v1845_v38 = vunpack.c.0.s8 %v1844_v7  ;;  %v1790_v39 = vrot.slane %v2654_v13, %v1789_v21 }
 0x2a7   : > { %v1222_v49 = vpop.f32.mrf.mxu0  ;;  %v1335_v40 = vpop.f32.mrf.mxu1 }
 0x2a8   : > { %v1583_v50 = vmax.f32 %v1582_v43, %v1222_v49  ;;  %v1613_v51 = vmax.f32 %v1612_v44, %v1335_v40 }
 0x2a9   : > { %v1224_v52 = vpop.f32.mrf.mxu0  ;;  %v1337_v54 = vpop.f32.mrf.mxu1 }
 0x2aa   : > { %v1598_v57 = vmax.f32 %v1597_v47, %v1224_v52  ;;  %v1628_v58 = vmax.f32 %v1627_v48, %v1337_v54 }
 0x2ab   : > { %v1226_v59 = vpop.f32.mrf.mxu0  ;;  %v1339_v60 = vpop.f32.mrf.mxu1 }
 0x2ac   : > { %v1584_v56 = vmax.f32 %v1583_v50, %v1226_v59  ;;  %v1614_v61 = vmax.f32 %v1613_v51, %v1339_v60  ;;  %v2672_v50 = vsub.s32 %v1845_v38, %v2640_v62 }
 0x2ad   : > { %v1228_v63 = vpop.f32.mrf.mxu0  ;;  %v1341_v0 = vpop.f32.mrf.mxu1 }
 0x2ae   : > { %v1725_v1 = vrot.slane %v1584_v56, 4  ;;  %v1737_v2 = vrot.slane %v1614_v61, 4  ;;  %v1599_v3 = vmax.f32 %v1598_v57, %v1228_v63  ;;  %v1629_v4 = vmax.f32 %v1628_v58, %v1341_v0 }
 0x2af   : > { %v2642_v18 = vpop.f32.mrf.mxu0  ;;  %v2644_v32 = vpop.f32.mrf.mxu1 }
 0x2b0   : > { %v1726_v53 = vmax.f32 %v1584_v56, %v1725_v1  ;;  %v1738_v5 = vmax.f32 %v1614_v61, %v1737_v2  ;;  %v1731_v6 = vrot.slane %v1599_v3, 4  ;;  %v1743_v8 = vrot.slane %v1629_v4, 4 }
 0x2b1   : > { %v2647_v10 = vpop.f32.mrf.mxu0  ;;  %v2649_v11 = vpop.f32.mrf.mxu1 }
 0x2b2   : > { %v1727_v12 = vrot.slane %v1726_v53, 2  ;;  %v1739_v14 = vrot.slane %v1738_v5, 2  ;;  %v1732_v15 = vmax.f32 %v1599_v3, %v1731_v6  ;;  %v1744_v16 = vmax.f32 %v1629_v4, %v1743_v8 }
 0x2b3   : > { %v2659_v22 = vpop.f32.mrf.mxu0  ;;  %v2661_v24 = vpop.f32.mrf.mxu1 }
 0x2b4   : > { %v1728_v25 = vmax.f32 %v1726_v53, %v1727_v12  ;;  %v1740_v23 = vmax.f32 %v1738_v5, %v1739_v14  ;;  %v1733_v26 = vrot.slane %v1732_v15, 2  ;;  %v1745_v27 = vrot.slane %v1744_v16, 2 }
 0x2b5   : > { %v2664_v29 = vpop.f32.mrf.mxu0  ;;  %v2666_v30 = vpop.f32.mrf.mxu1 }
 0x2b6   : > { %v1729_v31 = vrot.slane %v1728_v25, 1  ;;  %v1741_v33 = vrot.slane %v1740_v23, 1  ;;  %v1734_v34 = vmax.f32 %v1732_v15, %v1733_v26  ;;  %v1746_v35 = vmax.f32 %v1744_v16, %v1745_v27 }
 0x2b7   : > { %v1388_v41 = vpop.f32.mrf.mxu0  ;;  %v1501_v42 = vpop.f32.mrf.mxu1  ;;  %v1660_v26 = vmax.f32 %v2644_v32, %v2661_v24 }
 0x2b8   : > { %v1730_v43 = vmax.f32 %v1728_v25, %v1729_v31  ;;  %v1742_v44 = vmax.f32 %v1740_v23, %v1741_v33  ;;  %v1735_v45 = vrot.slane %v1734_v34, 1  ;;  %v1747_v46 = vrot.slane %v1746_v35, 1 }
 0x2b9   : > { %v1390_v47 = vpop.f32.mrf.mxu0  ;;  %v1503_v48 = vpop.f32.mrf.mxu1  ;;  %v1630_v23 = vmax.f32 %v2642_v18, %v2659_v22  ;;  %v1645_v31 = vmax.f32 %v2647_v10, %v2664_v29  ;;  %v1675_v33 = vmax.f32 %v2649_v11, %v2666_v30 }
 0x2ba   : > { %v1736_v49 = vmax.f32 %v1734_v34, %v1735_v45  ;;  %v1748_v40 = vmax.f32 %v1746_v35, %v1747_v46  ;;  %v1815_v54 = vadd.f32 %v1778_v28, %v1730_v43  ;;  %v1817_v55 = vadd.f32 %v1786_v36, %v1742_v44 }
 0x2bb   : > { %v1392_v51 = vpop.f32.mrf.mxu0  ;;  %v1505_v52 = vpop.f32.mrf.mxu1  ;;  %v1631_v34 = vmax.f32 %v1630_v23, %v1388_v41  ;;  %v1661_v35 = vmax.f32 %v1660_v26, %v1501_v42  ;;  %v1646_v38 = vmax.f32 %v1645_v31, %v1390_v47 }
 0x2bc   : > { %v1816_v57 = vadd.f32 %v1782_v37, %v1736_v49  ;;  %v1818_v58 = vadd.f32 %v1790_v39, %v1748_v40  ;;  %v1676_v39 = vmax.f32 %v1675_v33, %v1503_v48 }
 0x2bd   : > { %v1394_v59 = vpop.f32.mrf.mxu0  ;;  %v1507_v60 = vpop.f32.mrf.mxu1  ;;  %v1632_v43 = vmax.f32 %v1631_v34, %v1392_v51  ;;  %v1662_v44 = vmax.f32 %v1661_v35, %v1505_v52 }
 0x2be   : > { %v2105_v56 = vpack.c.bf16 %v1816_v57, %v1815_v54  ;;  %v2106_v61 = vpack.c.bf16 %v1818_v58, %v1817_v55  ;;  %v1647_v45 = vmax.f32 %v1646_v38, %v1394_v59  ;;  %v1677_v32 = vmax.f32 %v1676_v39, %v1507_v60 }
 0x2bf   : > { %v1398_v63 = vpop.f32.mrf.mxu0  ;;  %v1511_v0 = vpop.f32.mrf.mxu1 }
 0x2c0   : > { %v2675_v1 = vrot.slane %v2105_v56, %v2672_v50  ;;  %v2678_v2 = vrot.slane %v2106_v61, %v2672_v50  ;;  %v1633_v24 = vmax.f32 %v1632_v43, %v1398_v63  ;;  %v1663_v46 = vmax.f32 %v1662_v44, %v1511_v0 }
 0x2c1   : > { %v1400_v3 = vpop.f32.mrf.mxu0  ;;  %v1513_v4 = vpop.f32.mrf.mxu1 }
 0x2c2   : > { %v1871_v53 = vcombine.low %v2675_v1, %v2678_v2  ;;  %v1648_v10 = vmax.f32 %v1647_v45, %v1400_v3  ;;  %v1678_v29 = vmax.f32 %v1677_v32, %v1513_v4 }
 0x2c3   : > { %v1402_v5 = vpop.f32.mrf.mxu0  ;;  %v1515_v6 = vpop.f32.mrf.mxu1 }
 0x2c4   : > { %v1634_v54 = vmax.f32 %v1633_v24, %v1402_v5  ;;  %v1664_v11 = vmax.f32 %v1663_v46, %v1515_v6 }
 0x2c5   : > { %v1404_v8 = vpop.f32.mrf.mxu0  ;;  %v1517_v9 = vpop.f32.mrf.mxu1 }
 0x2c6   : > { %v1649_v42 = vmax.f32 %v1648_v10, %v1404_v8  ;;  %v1679_v55 = vmax.f32 %v1678_v29, %v1517_v9 }
 0x2c7   : > { %v1408_v12 = vpop.f32.mrf.mxu0  ;;  %v1521_v14 = vpop.f32.mrf.mxu1 }
 0x2c8   : > { %v1635_v47 = vmax.f32 %v1634_v54, %v1408_v12  ;;  %v1665_v48 = vmax.f32 %v1664_v11, %v1521_v14 }
 0x2c9   : > { %v1410_v15 = vpop.f32.mrf.mxu0  ;;  %v1523_v16 = vpop.f32.mrf.mxu1 }
 0x2ca   : > { %v1650_v57 = vmax.f32 %v1649_v42, %v1410_v15  ;;  %v1680_v58 = vmax.f32 %v1679_v55, %v1523_v16 }
 0x2cb   : > { %v1412_v17 = vpop.f32.mrf.mxu0  ;;  %v1525_v19 = vpop.f32.mrf.mxu1 }
 0x2cc   : > { %v1636_v59 = vmax.f32 %v1635_v47, %v1412_v17  ;;  %v1666_v60 = vmax.f32 %v1665_v48, %v1525_v19 }
 0x2cd   : > { %v1414_v20 = vpop.f32.mrf.mxu0  ;;  %v1527_v7 = vpop.f32.mrf.mxu1 }
 0x2ce   : > { %v1651_v63 = vmax.f32 %v1650_v57, %v1414_v20  ;;  %v1681_v0 = vmax.f32 %v1680_v58, %v1527_v7 }
 0x2cf   : > { %v1418_v21 = vpop.f32.mrf.mxu0  ;;  %v1531_v25 = vpop.f32.mrf.mxu1 }
 0x2d0   : > { %v1637_v3 = vmax.f32 %v1636_v59, %v1418_v21  ;;  %v1667_v4 = vmax.f32 %v1666_v60, %v1531_v25 }
 0x2d1   : > { %v1420_v27 = vpop.f32.mrf.mxu0  ;;  %v1533_v28 = vpop.f32.mrf.mxu1 }
 0x2d2   : > { %v1652_v23 = vmax.f32 %v1651_v63, %v1420_v27  ;;  %v1682_v26 = vmax.f32 %v1681_v0, %v1533_v28  ;;  %v1793_v63 = vsub.s32 4, %v2640_v62  ;;  %v1801_v0 = vsub.s32 6, %v2640_v62 }
 0x2d3   : > { %v1422_v36 = vpop.f32.mrf.mxu0  ;;  %v1535_v37 = vpop.f32.mrf.mxu1 }
 0x2d4   : > { %v1638_v8 = vmax.f32 %v1637_v3, %v1422_v36  ;;  %v1668_v9 = vmax.f32 %v1667_v4, %v1535_v37 }
 0x2d5   : > { %v1424_v18 = vpop.f32.mrf.mxu0  ;;  %v1537_v22 = vpop.f32.mrf.mxu1 }
 0x2d6   : > { %v1653_v31 = vmax.f32 %v1652_v23, %v1424_v18  ;;  %v1683_v33 = vmax.f32 %v1682_v26, %v1537_v22 }
 0x2d7   : > { %v1428_v49 = vpop.f32.mrf.mxu0  ;;  %v1541_v40 = vpop.f32.mrf.mxu1 }
 0x2d8   : > { %v1639_v15 = vmax.f32 %v1638_v8, %v1428_v49  ;;  %v1669_v16 = vmax.f32 %v1668_v9, %v1541_v40  ;;  %v1797_v8 = vsub.s32 5, %v2640_v62  ;;  %v1805_v9 = vsub.s32 7, %v2640_v62 }
 0x2d9   : > { %v1430_v30 = vpop.f32.mrf.mxu0  ;;  %v1543_v41 = vpop.f32.mrf.mxu1 }
 0x2da   : > { %v1654_v34 = vmax.f32 %v1653_v31, %v1430_v30  ;;  %v1684_v35 = vmax.f32 %v1683_v33, %v1543_v41  ;;  %v1798_v62 = vrot.slane %v2654_v13, %v1797_v8 }
 0x2db   : > { %v1432_v51 = vpop.f32.mrf.mxu0  ;;  %v1545_v52 = vpop.f32.mrf.mxu1 }
 0x2dc   : > { %v1640_v20 = vmax.f32 %v1639_v15, %v1432_v51  ;;  %v1670_v7 = vmax.f32 %v1669_v16, %v1545_v52  ;;  %v1794_v15 = vrot.slane %v2654_v13, %v1793_v63  ;;  %v1802_v16 = vrot.slane %v2654_v13, %v1801_v0 }
 0x2dd   : > { %v1434_v56 = vpop.f32.mrf.mxu0  ;;  %v1547_v61 = vpop.f32.mrf.mxu1 }
 0x2de   : > { %v1655_v27 = vmax.f32 %v1654_v34, %v1434_v56  ;;  %v1685_v28 = vmax.f32 %v1684_v35, %v1547_v61 }
 0x2df   : > { %v1438_v5 = vpop.f32.mrf.mxu0  ;;  %v1551_v6 = vpop.f32.mrf.mxu1 }
 0x2e0   : > { %v1641_v36 = vmax.f32 %v1640_v20, %v1438_v5  ;;  %v1671_v37 = vmax.f32 %v1670_v7, %v1551_v6  ;;  %v1806_v20 = vrot.slane %v2654_v13, %v1805_v9 }
 0x2e1   : > { %v1440_v12 = vpop.f32.mrf.mxu0  ;;  %v1553_v14 = vpop.f32.mrf.mxu1 }
 0x2e2   : > { %v1656_v43 = vmax.f32 %v1655_v27, %v1440_v12  ;;  %v1686_v44 = vmax.f32 %v1685_v28, %v1553_v14 }
 0x2e3   : > { %v1442_v17 = vpop.f32.mrf.mxu0  ;;  %v1555_v19 = vpop.f32.mrf.mxu1 }
 0x2e4   : > { %v1642_v18 = vmax.f32 %v1641_v36, %v1442_v17  ;;  %v1672_v22 = vmax.f32 %v1671_v37, %v1555_v19 }
 0x2e5   : > { %v1444_v21 = vpop.f32.mrf.mxu0  ;;  %v1557_v25 = vpop.f32.mrf.mxu1 }
 0x2e6   : > { %v1657_v46 = vmax.f32 %v1656_v43, %v1444_v21  ;;  %v1687_v49 = vmax.f32 %v1686_v44, %v1557_v25 }
 0x2e7   : > { %v1448_v38 = vpop.f32.mrf.mxu0  ;;  %v1561_v39 = vpop.f32.mrf.mxu1 }
 0x2e8   : > { %v1643_v40 = vmax.f32 %v1642_v18, %v1448_v38  ;;  %v1673_v10 = vmax.f32 %v1672_v22, %v1561_v39 }
 0x2e9   : > { %v1450_v45 = vpop.f32.mrf.mxu0  ;;  %v1563_v32 = vpop.f32.mrf.mxu1 }
 0x2ea   : > { %v1658_v30 = vmax.f32 %v1657_v46, %v1450_v45  ;;  %v1688_v41 = vmax.f32 %v1687_v49, %v1563_v32  ;;  %v1879_v46 = vrot.slane %v1871_v53, %v2672_v50 }
 0x2eb   : > { %v1452_v54 = vpop.f32.mrf.mxu0  ;;  %v1565_v11 = vpop.f32.mrf.mxu1 }
 0x2ec   : > { %v1644_v42 = vmax.f32 %v1643_v40, %v1452_v54  ;;  %v1674_v55 = vmax.f32 %v1673_v10, %v1565_v11  ;;  %v1920_v40 = vld [vmem:[%s321_s29] sm:$0xff] }
 0x2ed   : > { %v1454_v47 = vpop.f32.mrf.mxu0  ;;  %v1567_v48 = vpop.f32.mrf.mxu1 }
 0x2ee   : > { %v1749_v51 = vrot.slane %v1644_v42, 4  ;;  %v1761_v52 = vrot.slane %v1674_v55, 4  ;;  %v1659_v57 = vmax.f32 %v1658_v30, %v1454_v47  ;;  %v1689_v58 = vmax.f32 %v1688_v41, %v1567_v48 }
 0x2f0   : > { %v1750_v59 = vmax.f32 %v1644_v42, %v1749_v51  ;;  %v1762_v60 = vmax.f32 %v1674_v55, %v1761_v52  ;;  %v1755_v56 = vrot.slane %v1659_v57, 4  ;;  %v1767_v61 = vrot.slane %v1689_v58, 4 }
 0x2f2   : > { %v1751_v4 = vrot.slane %v1750_v59, 2  ;;  %v1763_v5 = vrot.slane %v1762_v60, 2  ;;  %v1756_v6 = vmax.f32 %v1659_v57, %v1755_v56  ;;  %v1768_v23 = vmax.f32 %v1689_v58, %v1767_v61 }
 0x2f4   : > { %v1752_v12 = vmax.f32 %v1750_v59, %v1751_v4  ;;  %v1764_v14 = vmax.f32 %v1762_v60, %v1763_v5  ;;  %v1757_v31 = vrot.slane %v1756_v6, 2  ;;  %v1769_v33 = vrot.slane %v1768_v23, 2 }
 0x2f6   : > { %v1753_v17 = vrot.slane %v1752_v12, 1  ;;  %v1765_v19 = vrot.slane %v1764_v14, 1  ;;  %v1758_v34 = vmax.f32 %v1756_v6, %v1757_v31  ;;  %v1770_v35 = vmax.f32 %v1768_v23, %v1769_v33 }
 0x2f8   : > { %v1754_v7 = vmax.f32 %v1752_v12, %v1753_v17  ;;  %v1766_v21 = vmax.f32 %v1764_v14, %v1765_v19  ;;  %v1759_v25 = vrot.slane %v1758_v34, 1  ;;  %v1771_v27 = vrot.slane %v1770_v35, 1 }
 0x2fa   : > { %v1760_v36 = vmax.f32 %v1758_v34, %v1759_v25  ;;  %v1772_v37 = vmax.f32 %v1770_v35, %v1771_v27  ;;  %v1819_v13 = vadd.f32 %v1794_v15, %v1754_v7  ;;  %v1821_v39 = vadd.f32 %v1802_v16, %v1766_v21 }
 0x2fc   : > { %v1820_v43 = vadd.f32 %v1798_v62, %v1760_v36  ;;  %v1822_v44 = vadd.f32 %v1806_v20, %v1772_v37 }
 0x2fe   : > { %v2107_v18 = vpack.c.bf16 %v1820_v43, %v1819_v13  ;;  %v2108_v22 = vpack.c.bf16 %v1822_v44, %v1821_v39 }
 0x300   : > { %v1863_v45 = vrot.slane %v2107_v18, %v2672_v50  ;;  %v1870_v32 = vrot.slane %v2108_v22, %v2672_v50 }
 0x302   : > { %v1872_v24 = vcombine.low %v1863_v45, %v1870_v32 }
 0x304   : > { %v1886_v49 = vrot.slane %v1872_v24, %v2672_v50 }
 0x306   : > { %v1887_v10 = vcombine.low %v1879_v46, %v1886_v49 }
 0x308   : > { %v1921_v29 = vsel %vm1919_vm1, %v1887_v10, %v1920_v40 }
 0x309   : > { %1922 = vst [vmem:[%s321_s29] sm:$0xff] %v1921_v29 }
 0x30a PF: > { %s17_s26 = sadd.s32 1, %s2236_s26   ;;  %s2776_s24 = smov %s2232_s25 }
 0x30b   : > { %p14_p5 = scmp.ge.s32.totalorder %s17_s26, 4   ;;  %s2777_s25 = smov %s2779_s27 }
 0x30d   :  { %16 = sbr.rel (!%p14_p5) target bundleno = 2 (0x2), region = 89 }

// kernel: _lambda_.4
= control target key start
LH: loop header
LB: loop body
LE: loop exit
PB: predicated region body
PF: predicated region fallthrough
CT: control target
= control target key end

     0   :  { %12 = vsyncpa [#allocation4], 0  ;;  %s2334_s24 = smov 0   ;;  %s2336_s25 = smov 0   ;;  %s2642_s0 = inlined_call_operand.vmem [shape: bf16[2,128,8], index: 0, kind: input, shape index: {}]   ;;  %s2643_s1 = inlined_call_operand.vmem [shape: bf16[8,64], index: 1, kind: input, shape index: {}]   ;;  %s2644_s2 = inlined_call_operand.vmem [shape: f32[1,64], index: 2, kind: input, shape index: {}]   ;;  %s2645_s3 = inlined_call_operand.vmem [shape: bf16[64,128], index: 3, kind: input, shape index: {}]   ;;  %s2646_s4 = inlined_call_operand.vmem [shape: f32[1,128], index: 4, kind: input, shape index: {}]   ;;  %s2647_s5 = inlined_call_operand.hbm [shape: bf16[128,1024], index: 5, kind: input, shape index: {}]   ;;  %s2648_s6 = inlined_call_operand.vmem [shape: f32[1,1024], index: 6, kind: input, shape index: {}]   ;;  %s2649_s7 = inlined_call_operand.vmem [shape: bf16[2,1,1024], index: 7, kind: output, shape index: {}]  }
   0x1   :  { %s2338_s26 = smov 0  }
   0x2 LB: > { %s2009_s27 = sadd.s32 4294967295, %s2287_s26   ;;  %s30_s28 = sadd.s32 1, %s2283_s25  ;;  %s2287_s26 = sphi %s2338_s26, %s18_s26   ;;  %s2283_s25 = sphi %s2336_s25, %s2665_s25   ;;  %s2279_s24 = sphi %s2334_s24, %s2664_s24  }
   0x3   : > { %p32_p0 = scmp.ge.s32.totalorder %s30_s28, 2  ;;  %p2011_p1 = scmp.ge.s32.totalorder %s2287_s26, 1 }
   0x4   : > { %p215_p2 = scmp.lt.s32.totalorder %s2287_s26, 3  ;;  %p2359_p4 = scmp.eq.s32.totalorder %s2009_s27, 0 }
   0x5   : > { %s2667_s28 = smov (%p32_p0, %s30_s28), 0  ;;  %s2289_s8 = smov [#allocation3]  }
   0x6   : > { %p2355_p3 = pnand %p2011_p1, %p215_p2  ;;  %s239_s9 = sshll.u32 %s2289_s8, 4  ;;  %s240_s9 = int_to_ptr.vmem [resolvable:$true] %s239_s9 }
   0x7   : > { %s2246_s10 = scalar_lea.vmem %s240_s9, 8192  ;;  %p2254_p11 = scmp.lt.s32.totalorder %s240_s9, %s240_s9 }
   0x8   : > { %p2188_p5 = pneg %p2355_p3  ;;  %p2247_p8 = scmp.ne.s32.totalorder %s240_s9, %s2246_s10 }
   0x9   : > { %p2255_p12 = scmp.lt.s32.totalorder %s2246_s10, %s2246_s10 }
   0xa   : > { %p2189_p6 = pnand %p2359_p4, %p2188_p5 }
   0xb   : > { %p2256_p13 = por %p2255_p12, %p2254_p11 }
   0xc   : > { %p2237_p7 = pneg %p2189_p6 }
   0xe   : > { %p2249_p9 = pnand %p2247_p8, %p2237_p7 }
  0x10   : > { %p2250_p10 = pneg %p2249_p9 }
  0x12   : > { %p2257_p0 = pnand %p2256_p13, %p2250_p10 }
  0x14   : > { %2260 = shalt.err (!%p2257_p0)
}
  0x15   : > { %s2290_s11 = smov 512   ;;  %s2291_s12 = smov 32  }
  0x16   : > { %2191 = dma.hbm_to_vmem [thread:$0]  (!%p2189_p6), %s2647_s5, 8192, %s240_s9, [#allocation4], %s2290_s11, %s2290_s11, %s2291_s12  }
  0x17   : > { %271 = sbr.rel (%p2355_p3) target bundleno = 796 (0x31c), region = 48 }
  0x1c   : > { %2274 = dma.done.wait (%p2359_p4), [#allocation4], 8192  }
  0x1d   : > { %2276 = vsyncadd (%p2359_p4), [#allocation4], 4294959104  ;;  %p307_p1 = scmp.lt.s32.totalorder %s2279_s24, 1  ;;  %vm422_vm0 = vcmask 1043456   ;;  %vm397_vm1 = vcmask 64512   ;;  %v2231_v7 = vld [vmem:[%s2645_s3 + $0x18] sm:$0xff]  }
  0x1e   : > { %v333_v0 = vld [vmem:[%s2643_s1] sm:$0xf]  ;;  %2159 = vmatprep.subr.bf16.mxu1 %v2231_v7  ;;  %v2232_v11 = vld [vmem:[%s2645_s3 + $0x10] sm:$0xff]   ;;  %v2233_v12 = vld [vmem:[%s2645_s3 + $0x8] sm:$0xff]   ;;  %vm586_vm2 = vcmask 523264   ;;  %vm1895_vm3 = vcmask 1040384  }
  0x1f   : > { %s2669_s24 = smov (!%p307_p1, %s2279_s24), 1  ;;  %2183 = vmatprep.subr.msk.bf16.mxu0 %vm422_vm0, %v333_v0  ;;  %v424_v1 = vsel %vm422_vm0, %v333_v0, 0  ;;  %2160 = vmatpush3.bf16.msra.mxu1 %v2231_v7  ;;  %v2234_v13 = vld [vmem:[%s2645_s3] sm:$0xff]   ;;  %v2407_v16 = vld [vmem:[#allocation3 + $0x1c8] sm:$0xff]  ;;  %vm1896_vm4 = vsmask.f32 256 }
  0x20   : > { %s2119_s15 = sshll.u32 %s2669_s24, 6  ;;  %2142 = vmatpush3.bf16.msra.mxu0 %v424_v1  ;;  %2161 = vmatprep.subr.bf16.mxu1 %v2232_v11  ;;  %v788_v14 = vld [vmem:[#allocation3 + $0x1c0] sm:$0xff]  ;;  %v2409_v19 = vld [vmem:[#allocation3 + $0x1e8] sm:$0xff]  ;;  %vm1898_vm5 = vcmask 1041409   ;;  %vm1899_vm6 = vsmask.f32 1280  ;;  %vm2575_vm7 = vmand %vm1895_vm3, %vm1896_vm4 }
  0x21   : > { %s314_s18 = scalar_lea.vmem %s2642_s0, %s2119_s15  ;;  %v792_v15 = vld [vmem:[#allocation3 + $0x1e0] sm:$0xff]  ;;  %v2107_v22 = vcombine.low %v2407_v16, %v2409_v19  ;;  %v2108_v23 = vcombine.high %v2407_v16, %v2409_v19  ;;  %v781_v51 = vld [vmem:[#allocation3 + $0x188] sm:$0xff]  ;;  %vm2579_vm8 = vmand %vm1898_vm5, %vm1899_vm6  ;;  %vm1902_vm9 = vcmask 1042434   ;;  %vm1903_vm10 = vsmask.f32 2304  ;;  %s2018_s16 = sshll.u32 %s2669_s24, 3 }
  0x22   : > { %v2223_v2 = vld [vmem:[%s314_s18] sm:$0xff]   ;;  %v2224_v3 = vld [vmem:[%s314_s18 + $0x8] sm:$0xff]   ;;  %v2225_v4 = vld [vmem:[%s314_s18 + $0x10] sm:$0xff]   ;;  %v2105_v17 = vcombine.low %v788_v14, %v792_v15  ;;  %v2106_v18 = vcombine.high %v788_v14, %v792_v15  ;;  %vm1906_vm13 = vcmask 1043459   ;;  %vm1907_vm14 = vsmask.f32 3328  ;;  %s319_s19 = scalar_lea.vmem %s2649_s7, %s2018_s16 }
  0x23   : > { %2143 = vmatprep.mubr.msk.bf16.mxu0 %vm397_vm1, %v2223_v2  ;;  %v2226_v5 = vld [vmem:[%s314_s18 + $0x18] sm:$0xff]   ;;  %v2227_v6 = vld [vmem:[%s314_s18 + $0x20] sm:$0xff]   ;;  %v2228_v8 = vld [vmem:[%s314_s18 + $0x28] sm:$0xff]   ;;  %2162 = vmatpush3.bf16.msra.mxu1 %v2232_v11  ;;  %vm1914_vm5 = vcmask 1045509   ;;  %vm1915_vm6 = vsmask.f32 5376 }
  0x24   : > { %2144 = vmatmul.mubr.msk.bf16.vlgmr.msra.gmra.mxu0 %vm397_vm1, %v2224_v3  ;;  %v2229_v9 = vld [vmem:[%s314_s18 + $0x30] sm:$0xff]   ;;  %v2230_v10 = vld [vmem:[%s314_s18 + $0x38] sm:$0xff]   ;;  %2163 = vmatprep.subr.bf16.mxu1 %v2233_v12  ;;  %v780_v20 = vld [vmem:[#allocation3 + $0x180] sm:$0xff] }
  0x25   : > { %2147 = vmatprep.mubr.msk.bf16.mxu0 %vm397_vm1, %v2225_v4  ;;  %v784_v21 = vld [vmem:[#allocation3 + $0x1a0] sm:$0xff]  ;;  %1116 = vmatprep.subr.bf16.mxu0 %v2106_v18  ;;  %v785_v52 = vld [vmem:[#allocation3 + $0x1a8] sm:$0xff]  ;;  %vm1901_vm11 = vmor %vm2579_vm8, %vm2575_vm7 }
  0x26   : > { %v2098_v24 = vcombine.high %v780_v20, %v784_v21  ;;  %v772_v25 = vld [vmem:[#allocation3 + $0x140] sm:$0xff]  ;;  %1117 = vmatpush1.bf16.msra.mxu0 %v2105_v17  ;;  %v2097_v27 = vcombine.low %v780_v20, %v784_v21  ;;  %v2100_v60 = vcombine.high %v781_v51, %v785_v52  ;;  %v773_v62 = vld [vmem:[#allocation3 + $0x148] sm:$0xff]  ;;  %vm1904_vm12 = vmand %vm1902_vm9, %vm1903_vm10  ;;  %vm1918_vm9 = vcmask 1046534  }
  0x27   : > { %2164 = vmatpush3.bf16.msra.mxu1 %v2233_v12  ;;  %v776_v26 = vld [vmem:[#allocation3 + $0x160] sm:$0xff]  ;;  %v777_v63 = vld [vmem:[#allocation3 + $0x168] sm:$0xff]  ;;  %vm2596_vm15 = vmor %vm1904_vm12, %vm1901_vm11  ;;  %vm1919_vm10 = vsmask.f32 6400 }
  0x28   : > { %2165 = vmatprep.subr.bf16.mxu1 %v2234_v13  ;;  %1118 = vmatprep.subr.bf16.mxu0 %v2098_v24  ;;  %v2090_v28 = vcombine.high %v772_v25, %v776_v26  ;;  %v764_v29 = vld [vmem:[#allocation3 + $0x100] sm:$0xff]  ;;  %v2089_v31 = vcombine.low %v772_v25, %v776_v26  ;;  %v2092_v7 = vcombine.high %v773_v62, %v777_v63  ;;  %v757_v20 = vld [vmem:[#allocation3 + $0xc8] sm:$0xff]  ;;  %vm2600_vm0 = vmand %vm1906_vm13, %vm1907_vm14  ;;  %vm1922_vm13 = vcmask 1047559  }
  0x29   : > { %v768_v30 = vld [vmem:[#allocation3 + $0x120] sm:$0xff]  ;;  %v2091_v16 = vcombine.low %v773_v62, %v777_v63  ;;  %v761_v21 = vld [vmem:[#allocation3 + $0xe8] sm:$0xff]  ;;  %vm1909_vm3 = vmor %vm2600_vm0, %vm2596_vm15  ;;  %vm1923_vm14 = vsmask.f32 7424 }
  0x2a   : > { %1119 = vmatpush1.bf16.msra.mxu0 %v2097_v27  ;;  %v2082_v32 = vcombine.high %v764_v29, %v768_v30  ;;  %v756_v33 = vld [vmem:[#allocation3 + $0xc0] sm:$0xff]  ;;  %v2081_v35 = vcombine.low %v764_v29, %v768_v30  ;;  %v2076_v29 = vcombine.high %v757_v20, %v761_v21  ;;  %vm2616_vm8 = vmand %vm1914_vm5, %vm1915_vm6 }
  0x2b   : > { %2166 = vmatpush3.bf16.msra.mxu1 %v2234_v13  ;;  %1120 = vmatprep.subr.bf16.mxu0 %v2090_v28  ;;  %v760_v34 = vld [vmem:[#allocation3 + $0xe0] sm:$0xff]  ;;  %vm1920_vm12 = vmand %vm1918_vm9, %vm1919_vm10 }
  0x2c   : > { %2148 = vmatmul.mubr.msk.bf16.gmra.mxu0 %vm397_vm1, %v2226_v5  ;;  %1229 = vmatprep.subr.bf16.mxu1 %v2108_v23  ;;  %v2074_v36 = vcombine.high %v756_v33, %v760_v34  ;;  %v2073_v37 = vcombine.low %v756_v33, %v760_v34  ;;  %v2418_v40 = vld [vmem:[%s2644_s2] ss:$0 sm:$0xff]  ;;  %v2099_v5 = vcombine.low %v781_v51, %v785_v52  ;;  %v753_v52 = vld [vmem:[#allocation3 + $0xa8] sm:$0xff]  ;;  %vm1924_vm0 = vmand %vm1922_vm13, %vm1923_vm14 }
  0x2d   : > { %2151 = vmatprep.mubr.msk.bf16.mxu0 %vm397_vm1, %v2227_v6  ;;  %v732_v63 = vld [vmem:[#allocation3] sm:$0xff] }
  0x2e   : > { %1121 = vmatpush1.bf16.msra.mxu0 %v2089_v31 }
  0x2f   : > { %1122 = vmatprep.subr.bf16.mxu0 %v2082_v32 }
  0x32   : > { %1123 = vmatpush1.bf16.msra.mxu0 %v2081_v35 }
  0x33   : > { %1124 = vmatprep.subr.bf16.mxu0 %v2074_v36  ;;  %v2075_v36 = vcombine.low %v757_v20, %v761_v21 }
  0x34   : > { %2152 = vmatmul.mubr.msk.bf16.gmra.mxu0 %vm397_vm1, %v2228_v8 }
  0x35   : > { %2155 = vmatprep.mubr.msk.bf16.mxu0 %vm397_vm1, %v2229_v9  ;;  %v765_v9 = vld [vmem:[#allocation3 + $0x108] sm:$0xff] }
  0x36   : > { %1125 = vmatpush1.bf16.msra.mxu0 %v2073_v37 }
  0x3c   : > { %2156 = vmatmul.mubr.msk.bf16.gmra.mxu0 %vm397_vm1, %v2230_v10  ;;  %v769_v10 = vld [vmem:[#allocation3 + $0x128] sm:$0xff]  ;;  %vm1910_vm1 = vcmask 1044484  }
  0x3d   : > { %v2084_v18 = vcombine.high %v765_v9, %v769_v10  ;;  %v2083_v27 = vcombine.low %v765_v9, %v769_v10  ;;  %v794_v9 = vld [vmem:[#allocation3 + $0x1f0] sm:$0xff]  ;;  %v791_v10 = vld [vmem:[#allocation3 + $0x1d8] sm:$0xff] }
  0xe4   : > { %v2145_v38 = vpop.f32.mrf.mxu0 }
  0xe5   : > { %v469_v44 = vadd.f32 %v2145_v38, %v2418_v40 }
  0xe6   : > { %v460_v39 = vpop.f32.mrf.mxu0 }
  0xe7   : > { %v461_v42 = vadd.f32 %v2418_v40, %v460_v39  ;;  %v525_v53 = vmax.f32 %v469_v44, 0.0 }
  0xe8   : > { %v2146_v41 = vpop.f32.mrf.mxu0 }
  0xe9   : > { %v472_v43 = vadd.f32 %v2146_v41, %v2418_v40  ;;  %v523_v49 = vmax.f32 %v461_v42, 0.0 }
  0xea   : > { %v463_v45 = vpop.f32.mrf.mxu0 }
  0xeb   : > { %v464_v46 = vadd.f32 %v2418_v40, %v463_v45  ;;  %v526_v47 = vmax.f32 %v472_v43, 0.0 }
  0xec   : > { %v2149_v48 = vpop.f32.mrf.mxu0 }
  0xed   : > { %v524_v50 = vmax.f32 %v464_v46, 0.0  ;;  %v485_v54 = vadd.f32 %v2149_v48, %v2418_v40  ;;  %v540_v58 = vpack.c.bf16 %v526_v47, %v525_v53  ;;  %v748_v48 = vld [vmem:[#allocation3 + $0x80] sm:$0xff] }
  0xee   : > { %v476_v55 = vpop.f32.mrf.mxu0 }
  0xef   : > { %v477_v56 = vadd.f32 %v2418_v40, %v476_v55  ;;  %v539_v57 = vpack.c.bf16 %v524_v50, %v523_v49  ;;  %v529_v0 = vmax.f32 %v485_v54, 0.0  ;;  %v752_v49 = vld [vmem:[#allocation3 + $0xa0] sm:$0xff]  ;;  %v749_v50 = vld [vmem:[#allocation3 + $0x88] sm:$0xff] }
  0xf0   : > { %v2150_v59 = vpop.f32.mrf.mxu0  ;;  %v2066_v51 = vcombine.high %v748_v48, %v752_v49  ;;  %v2065_v53 = vcombine.low %v748_v48, %v752_v49  ;;  %v2067_v54 = vcombine.low %v749_v50, %v753_v52  ;;  %v2068_v55 = vcombine.high %v749_v50, %v753_v52  ;;  %v766_v48 = vld [vmem:[#allocation3 + $0x110] sm:$0xff]  ;;  %v771_v52 = vld [vmem:[#allocation3 + $0x138] sm:$0xff] }
  0xf1   : > { %v488_v61 = vadd.f32 %v2150_v59, %v2418_v40  ;;  %2167 = vmatprep.mubr.msk.bf16.mxu1 %vm586_vm2, %v539_v57  ;;  %v527_v2 = vmax.f32 %v477_v56, 0.0  ;;  %v744_v56 = vld [vmem:[#allocation3 + $0x60] sm:$0xff]  ;;  %v741_v57 = vld [vmem:[#allocation3 + $0x48] sm:$0xff]  ;;  %v770_v50 = vld [vmem:[#allocation3 + $0x130] sm:$0xff] }
  0xf2   : > { %v479_v1 = vpop.f32.mrf.mxu0  ;;  %2168 = vmatmul.mubr.msk.bf16.vlgmr.msra.gmra.mxu1 %vm586_vm2, %v540_v58  ;;  %1126 = vmatprep.subr.bf16.mxu0 %v2066_v51  ;;  %v745_v59 = vld [vmem:[#allocation3 + $0x68] sm:$0xff]  ;;  %v767_v51 = vld [vmem:[#allocation3 + $0x118] sm:$0xff] }
  0xf3   : > { %v530_v3 = vmax.f32 %v488_v61, 0.0  ;;  %v480_v4 = vadd.f32 %v2418_v40, %v479_v1  ;;  %1230 = vmatpush1.bf16.msra.mxu1 %v2107_v22  ;;  %1127 = vmatpush1.bf16.msra.mxu0 %v2065_v53  ;;  %v2059_v61 = vcombine.low %v741_v57, %v745_v59  ;;  %v2060_v62 = vcombine.high %v741_v57, %v745_v59  ;;  %v733_v1 = vld [vmem:[#allocation3 + $0x8] sm:$0xff]  ;;  %v758_v59 = vld [vmem:[#allocation3 + $0xd0] sm:$0xff] }
  0xf4   : > { %v2153_v6 = vpop.f32.mrf.mxu0  ;;  %1231 = vmatprep.subr.bf16.mxu1 %v2100_v60  ;;  %v2086_v57 = vcombine.high %v766_v48, %v770_v50 }
  0xf5   : > { %v528_v8 = vmax.f32 %v480_v4, 0.0  ;;  %v542_v11 = vpack.c.bf16 %v530_v3, %v529_v0  ;;  %v501_v12 = vadd.f32 %v2153_v6, %v2418_v40  ;;  %v736_v0 = vld [vmem:[#allocation3 + $0x20] sm:$0xff]  ;;  %v737_v3 = vld [vmem:[#allocation3 + $0x28] sm:$0xff] }
  0xf6   : > { %v492_v13 = vpop.f32.mrf.mxu0  ;;  %v2049_v4 = vcombine.low %v732_v63, %v736_v0  ;;  %v2052_v6 = vcombine.high %v733_v1, %v737_v3 }
  0xf7   : > { %v541_v14 = vpack.c.bf16 %v528_v8, %v527_v2  ;;  %v493_v15 = vadd.f32 %v2418_v40, %v492_v13  ;;  %1232 = vmatpush1.bf16.msra.mxu1 %v2099_v5  ;;  %v533_v22 = vmax.f32 %v501_v12, 0.0  ;;  %v2050_v2 = vcombine.high %v732_v63, %v736_v0  ;;  %v790_v8 = vld [vmem:[#allocation3 + $0x1d0] sm:$0xff]  ;;  %v795_v13 = vld [vmem:[#allocation3 + $0x1f8] sm:$0xff] }
  0xf8   : > { %v2154_v17 = vpop.f32.mrf.mxu0  ;;  %1233 = vmatprep.subr.bf16.mxu1 %v2092_v7  ;;  %v2051_v5 = vcombine.low %v733_v1, %v737_v3  ;;  %v2292_v7 = vmov 0   ;;  %v2110_v12 = vcombine.high %v790_v8, %v794_v9  ;;  %v763_v63 = vld [vmem:[#allocation3 + $0xf8] sm:$0xff]  ;;  %v2085_v1 = vcombine.low %v766_v48, %v770_v50 }
  0xf9   : > { %2171 = vmatprep.mubr.msk.bf16.mxu1 %vm586_vm2, %v541_v14  ;;  %v504_v19 = vadd.f32 %v2154_v17, %v2418_v40  ;;  %v531_v24 = vmax.f32 %v493_v15, 0.0  ;;  %1148 = vmatprep.mubr.bf16.mxu0 %v2292_v7  ;;  %v2111_v14 = vcombine.low %v791_v10, %v795_v13  ;;  %v2112_v15 = vcombine.high %v791_v10, %v795_v13  ;;  %v751_v10 = vld [vmem:[#allocation3 + $0x98] sm:$0xff] }
  0xfa   : > { %2172 = vmatmul.mubr.msk.bf16.gmra.mxu1 %vm586_vm2, %v542_v11  ;;  %v495_v23 = vpop.f32.mrf.mxu0  ;;  %v2109_v11 = vcombine.low %v790_v8, %v794_v9  ;;  %v754_v9 = vld [vmem:[#allocation3 + $0xb0] sm:$0xff] }
  0xfb   : > { %v534_v25 = vmax.f32 %v504_v19, 0.0  ;;  %v496_v26 = vadd.f32 %v2418_v40, %v495_v23  ;;  %1234 = vmatpush1.bf16.msra.mxu1 %v2091_v16 }
  0xfc   : > { %v2157_v28 = vpop.f32.mrf.mxu0  ;;  %1235 = vmatprep.subr.bf16.mxu1 %v2084_v18  ;;  %v2449_v18 = vld [vmem:[%s2646_s4] ss:$0 sm:$0xff] }
  0xfd   : > { %v532_v30 = vmax.f32 %v496_v26, 0.0  ;;  %v544_v31 = vpack.c.bf16 %v534_v25, %v533_v22  ;;  %v517_v32 = vadd.f32 %v2157_v28, %v2418_v40  ;;  %v783_v28 = vld [vmem:[#allocation3 + $0x198] sm:$0xff] }
  0xfe   : > { %v508_v33 = vpop.f32.mrf.mxu0 }
  0xff   : > { %v543_v34 = vpack.c.bf16 %v532_v30, %v531_v24  ;;  %v509_v35 = vadd.f32 %v2418_v40, %v508_v33  ;;  %1236 = vmatpush1.bf16.msra.mxu1 %v2083_v27  ;;  %v537_v39 = vmax.f32 %v517_v32, 0.0  ;;  %v782_v24 = vld [vmem:[#allocation3 + $0x190] sm:$0xff] }
 0x100   : > { %v2158_v37 = vpop.f32.mrf.mxu0  ;;  %1237 = vmatprep.subr.bf16.mxu1 %v2076_v29  ;;  %v786_v27 = vld [vmem:[#allocation3 + $0x1b0] sm:$0xff]  ;;  %v787_v29 = vld [vmem:[#allocation3 + $0x1b8] sm:$0xff] }
 0x101   : > { %2175 = vmatprep.mubr.msk.bf16.mxu1 %vm586_vm2, %v543_v34  ;;  %v520_v38 = vadd.f32 %v2158_v37, %v2418_v40  ;;  %v535_v42 = vmax.f32 %v509_v35, 0.0  ;;  %v774_v33 = vld [vmem:[#allocation3 + $0x150] sm:$0xff]  ;;  %v2102_v35 = vcombine.high %v782_v24, %v786_v27 }
 0x102   : > { %2176 = vmatmul.mubr.msk.bf16.gmra.mxu1 %vm586_vm2, %v544_v31  ;;  %v511_v41 = vpop.f32.mrf.mxu0  ;;  %v778_v37 = vld [vmem:[#allocation3 + $0x170] sm:$0xff] }
 0x103   : > { %v538_v43 = vmax.f32 %v520_v38, 0.0  ;;  %v512_v44 = vadd.f32 %v2418_v40, %v511_v41  ;;  %1238 = vmatpush1.bf16.msra.mxu1 %v2075_v36  ;;  %v740_v40 = vld [vmem:[#allocation3 + $0x40] sm:$0xff]  ;;  %v2104_v36 = vcombine.high %v783_v28, %v787_v29  ;;  %v775_v38 = vld [vmem:[#allocation3 + $0x158] sm:$0xff]  ;;  %v2093_v53 = vcombine.low %v774_v33, %v778_v37 }
 0x104   : > { %1239 = vmatprep.subr.bf16.mxu1 %v2068_v55  ;;  %v2058_v58 = vcombine.high %v740_v40, %v744_v56  ;;  %v2057_v60 = vcombine.low %v740_v40, %v744_v56 }
 0x105   : > { %v536_v45 = vmax.f32 %v512_v44, 0.0  ;;  %v546_v46 = vpack.c.bf16 %v538_v43, %v537_v39  ;;  %v779_v39 = vld [vmem:[#allocation3 + $0x178] sm:$0xff]  ;;  %v2103_v43 = vcombine.low %v783_v28, %v787_v29 }
 0x106   : > { %1128 = vmatprep.subr.bf16.mxu0 %v2058_v58  ;;  %v2095_v40 = vcombine.low %v775_v38, %v779_v39  ;;  %v2088_v58 = vcombine.high %v767_v51, %v771_v52 }
 0x107   : > { %v545_v47 = vpack.c.bf16 %v536_v45, %v535_v42  ;;  %1240 = vmatpush1.bf16.msra.mxu1 %v2067_v54  ;;  %1129 = vmatpush1.bf16.msra.mxu0 %v2057_v60  ;;  %v2101_v42 = vcombine.low %v782_v24, %v786_v27  ;;  %v2094_v45 = vcombine.high %v774_v33, %v778_v37  ;;  %v743_v24 = vld [vmem:[#allocation3 + $0x58] sm:$0xff] }
 0x108   : > { %1241 = vmatprep.subr.bf16.mxu1 %v2060_v62  ;;  %1130 = vmatprep.subr.bf16.mxu0 %v2050_v2  ;;  %v759_v62 = vld [vmem:[#allocation3 + $0xd8] sm:$0xff]  ;;  %v2087_v2 = vcombine.low %v767_v51, %v771_v52 }
 0x109   : > { %2179 = vmatprep.mubr.msk.bf16.mxu1 %vm586_vm2, %v545_v47 }
 0x10a   : > { %2180 = vmatmul.mubr.msk.bf16.gmra.mxu1 %vm586_vm2, %v546_v46  ;;  %v2096_v46 = vcombine.high %v775_v38, %v779_v39  ;;  %vm1911_vm2 = vsmask.f32 4352 }
 0x10b   : > { %1242 = vmatpush1.bf16.msra.mxu1 %v2059_v61  ;;  %1131 = vmatpush1.bf16.msra.mxu0 %v2049_v4  ;;  %v762_v61 = vld [vmem:[#allocation3 + $0xf0] sm:$0xff]  ;;  %vm1912_vm4 = vmand %vm1910_vm1, %vm1911_vm2 }
 0x10c   : > { %1243 = vmatprep.subr.bf16.mxu1 %v2052_v6  ;;  %1261 = vmatprep.mubr.bf16.mxu1 %v2292_v7  ;;  %v2078_v4 = vcombine.high %v758_v59, %v762_v61  ;;  %v750_v6 = vld [vmem:[#allocation3 + $0x90] sm:$0xff]  ;;  %vm2612_vm7 = vmor %vm1912_vm4, %vm1909_vm3 }
 0x10d   : > { %1342 = vmatprep.subr.bf16.mxu0 %v2110_v12  ;;  %v2077_v12 = vcombine.low %v758_v59, %v762_v61  ;;  %v2069_v27 = vcombine.low %v750_v6, %v754_v9  ;;  %vm1917_vm11 = vmor %vm2616_vm8, %vm2612_vm7 }
 0x10e   : > { %vm1921_vm15 = vmor %vm1920_vm12, %vm1917_vm11 }
 0x10f   : > { %1244 = vmatpush1.bf16.msra.mxu1 %v2051_v5  ;;  %v2080_v5 = vcombine.high %v759_v62, %v763_v63  ;;  %vm1925_vm1 = vmor %vm1924_vm0, %vm1921_vm15 }
 0x110   : > { %1455 = vmatprep.subr.bf16.mxu1 %v2112_v15  ;;  %v2079_v15 = vcombine.low %v759_v62, %v763_v63 }
 0x1b2   : > { %v2169_v16 = vpop.f32.mrf.mxu1 }
 0x1b3   : > { %v654_v41 = vadd.f32 %v2169_v16, %v2449_v18 }
 0x1b4   : > { %v645_v17 = vpop.f32.mrf.mxu1 }
 0x1b5   : > { %v646_v20 = vadd.f32 %v2449_v18, %v645_v17  ;;  %v710_v49 = vmax.f32 %v654_v41, 0.0  ;;  %v2070_v17 = vcombine.high %v750_v6, %v754_v9 }
 0x1b6   : > { %v2170_v19 = vpop.f32.mrf.mxu1 }
 0x1b7   : > { %v708_v25 = vmax.f32 %v646_v20, 0.0  ;;  %v657_v31 = vadd.f32 %v2170_v19, %v2449_v18  ;;  %v742_v20 = vld [vmem:[#allocation3 + $0x50] sm:$0xff] }
 0x1b8   : > { %v648_v21 = vpop.f32.mrf.mxu1 }
 0x1b9   : > { %v649_v22 = vadd.f32 %v2449_v18, %v648_v21  ;;  %v711_v44 = vmax.f32 %v657_v31, 0.0  ;;  %v734_v31 = vld [vmem:[#allocation3 + $0x10] sm:$0xff] }
 0x1ba   : > { %v2453_v23 = vpop.f32.mrf.mxu1 }
 0x1bb   : > { %v709_v26 = vmax.f32 %v649_v22, 0.0  ;;  %v2463_v54 = vpack.c.bf16 %v711_v44, %v710_v49  ;;  %v670_v21 = vadd.f32 %v2453_v23, %v2449_v18  ;;  %v746_v22 = vld [vmem:[#allocation3 + $0x70] sm:$0xff] }
 0x1bc   : > { %v661_v30 = vpop.f32.mrf.mxu1  ;;  %v2062_v23 = vcombine.high %v742_v20, %v746_v22  ;;  %v2061_v37 = vcombine.low %v742_v20, %v746_v22 }
 0x1bd   : > { %v2456_v32 = vpack.c.bf16 %v709_v26, %v708_v25  ;;  %v662_v60 = vadd.f32 %v2449_v18, %v661_v30  ;;  %v747_v25 = vld [vmem:[#allocation3 + $0x78] sm:$0xff]  ;;  %v714_v33 = vmax.f32 %v670_v21, 0.0 }
 0x1be   : > { %v2174_v34 = vpop.f32.mrf.mxu1  ;;  %v2064_v30 = vcombine.high %v743_v24, %v747_v25  ;;  %v2063_v38 = vcombine.low %v743_v24, %v747_v25 }
 0x1bf   : > { %1149 = vmatmul.mubr.bf16.vlgmr.msra.gmra.mxu0 %v2456_v32  ;;  %1262 = vmatmul.mubr.bf16.vlgmr.msra.gmra.mxu1 %v2456_v32  ;;  %v712_v8 = vmax.f32 %v662_v60, 0.0  ;;  %v673_v13 = vadd.f32 %v2174_v34, %v2449_v18  ;;  %v738_v34 = vld [vmem:[#allocation3 + $0x30] sm:$0xff] }
 0x1c0   : > { %1343 = vmatpush1.bf16.msra.mxu0 %v2109_v11  ;;  %1456 = vmatpush1.bf16.msra.mxu1 %v2111_v14  ;;  %v664_v47 = vpop.f32.mrf.mxu1  ;;  %v755_v11 = vld [vmem:[#allocation3 + $0xb8] sm:$0xff]  ;;  %v2054_v44 = vcombine.high %v734_v31, %v738_v34  ;;  %v2053_v48 = vcombine.low %v734_v31, %v738_v34 }
 0x1c1   : > { %1158 = vmatprep.mubr.bf16.mxu0 %v2292_v7  ;;  %1271 = vmatprep.mubr.bf16.mxu1 %v2292_v7  ;;  %v665_v55 = vadd.f32 %v2449_v18, %v664_v47  ;;  %v2072_v19 = vcombine.high %v751_v10, %v755_v11  ;;  %v715_v26 = vmax.f32 %v673_v13, 0.0  ;;  %v2071_v28 = vcombine.low %v751_v10, %v755_v11 }
 0x1c2   : > { %1344 = vmatprep.subr.bf16.mxu0 %v2102_v35  ;;  %1457 = vmatprep.subr.bf16.mxu1 %v2104_v36  ;;  %v2466_v56 = vpop.f32.mrf.mxu1  ;;  %v735_v35 = vld [vmem:[#allocation3 + $0x18] sm:$0xff] }
 0x1c3   : > { %v713_v0 = vmax.f32 %v665_v55, 0.0  ;;  %v739_v36 = vld [vmem:[#allocation3 + $0x38] sm:$0xff]  ;;  %v2482_v39 = vpack.c.bf16 %v715_v26, %v714_v33  ;;  %v686_v51 = vadd.f32 %v2466_v56, %v2449_v18 }
 0x1c4   : > { %1345 = vmatpush1.bf16.msra.mxu0 %v2101_v42  ;;  %1458 = vmatpush1.bf16.msra.mxu1 %v2103_v43  ;;  %v677_v3 = vpop.f32.mrf.mxu1  ;;  %v2055_v49 = vcombine.low %v735_v35, %v739_v36 }
 0x1c5   : > { %1346 = vmatprep.subr.bf16.mxu0 %v2094_v45  ;;  %1459 = vmatprep.subr.bf16.mxu1 %v2096_v46  ;;  %v2474_v14 = vpack.c.bf16 %v713_v0, %v712_v8  ;;  %v678_v41 = vadd.f32 %v2449_v18, %v677_v3  ;;  %v2056_v45 = vcombine.high %v735_v35, %v739_v36 }
 0x1c6   : > { %v2178_v16 = vpop.f32.mrf.mxu1 }
 0x1c7   : > { %1159 = vmatmul.mubr.bf16.gmra.mxu0 %v2463_v54  ;;  %1272 = vmatmul.mubr.bf16.gmra.mxu1 %v2463_v54  ;;  %v716_v46 = vmax.f32 %v678_v41, 0.0  ;;  %v689_v52 = vadd.f32 %v2178_v16, %v2449_v18 }
 0x1c8   : > { %1168 = vmatprep.mubr.bf16.mxu0 %v2292_v7  ;;  %1281 = vmatprep.mubr.bf16.mxu1 %v2292_v7  ;;  %v680_v29 = vpop.f32.mrf.mxu1 }
 0x1c9   : > { %1347 = vmatpush1.bf16.msra.mxu0 %v2093_v53  ;;  %1460 = vmatpush1.bf16.msra.mxu1 %v2095_v40  ;;  %v681_v42 = vadd.f32 %v2449_v18, %v680_v29  ;;  %v718_v40 = vmax.f32 %v686_v51, 0.0 }
 0x1ca   : > { %1348 = vmatprep.subr.bf16.mxu0 %v2086_v57  ;;  %1461 = vmatprep.subr.bf16.mxu1 %v2088_v58  ;;  %v2181_v43 = vpop.f32.mrf.mxu1  ;;  %v719_v57 = vmax.f32 %v689_v52, 0.0 }
 0x1cb   : > { %v717_v47 = vmax.f32 %v681_v42, 0.0  ;;  %v702_v63 = vadd.f32 %v2181_v43, %v2449_v18 }
 0x1cc   : > { %v693_v50 = vpop.f32.mrf.mxu1  ;;  %v729_v59 = vpack.c.bf16 %v719_v57, %v718_v40 }
 0x1cd   : > { %1349 = vmatpush1.bf16.msra.mxu0 %v2085_v1  ;;  %1462 = vmatpush1.bf16.msra.mxu1 %v2087_v2  ;;  %v728_v53 = vpack.c.bf16 %v717_v47, %v716_v46  ;;  %v694_v60 = vadd.f32 %v2449_v18, %v693_v50  ;;  %v722_v2 = vmax.f32 %v702_v63, 0.0 }
 0x1ce   : > { %1350 = vmatprep.subr.bf16.mxu0 %v2078_v4  ;;  %1463 = vmatprep.subr.bf16.mxu1 %v2080_v5  ;;  %v2182_v55 = vpop.f32.mrf.mxu1 }
 0x1cf   : > { %1169 = vmatmul.mubr.bf16.gmra.mxu0 %v2474_v14  ;;  %1282 = vmatmul.mubr.bf16.gmra.mxu1 %v2474_v14  ;;  %v720_v61 = vmax.f32 %v694_v60, 0.0  ;;  %v705_v0 = vadd.f32 %v2182_v55, %v2449_v18 }
 0x1d0   : > { %1178 = vmatprep.mubr.bf16.mxu0 %v2292_v7  ;;  %1291 = vmatprep.mubr.bf16.mxu1 %v2292_v7  ;;  %v696_v58 = vpop.f32.mrf.mxu1 }
 0x1d1   : > { %1351 = vmatpush1.bf16.msra.mxu0 %v2077_v12  ;;  %1464 = vmatpush1.bf16.msra.mxu1 %v2079_v15  ;;  %v697_v56 = vadd.f32 %v2449_v18, %v696_v58  ;;  %v723_v3 = vmax.f32 %v705_v0, 0.0 }
 0x1d2   : > { %1352 = vmatprep.subr.bf16.mxu0 %v2070_v17  ;;  %1465 = vmatprep.subr.bf16.mxu1 %v2072_v19 }
 0x1d3   : > { %v721_v62 = vmax.f32 %v697_v56, 0.0  ;;  %v731_v4 = vpack.c.bf16 %v723_v3, %v722_v2 }
 0x1d5   : > { %1353 = vmatpush1.bf16.msra.mxu0 %v2069_v27  ;;  %1466 = vmatpush1.bf16.msra.mxu1 %v2071_v28  ;;  %v730_v1 = vpack.c.bf16 %v721_v62, %v720_v61 }
 0x1d6   : > { %1354 = vmatprep.subr.bf16.mxu0 %v2062_v23  ;;  %1467 = vmatprep.subr.bf16.mxu1 %v2064_v30 }
 0x1d7   : > { %1179 = vmatmul.mubr.bf16.gmra.mxu0 %v2482_v39  ;;  %1292 = vmatmul.mubr.bf16.gmra.mxu1 %v2482_v39 }
 0x1d8   : > { %1188 = vmatprep.mubr.bf16.mxu0 %v2292_v7  ;;  %1301 = vmatprep.mubr.bf16.mxu1 %v2292_v7 }
 0x1d9   : > { %1355 = vmatpush1.bf16.msra.mxu0 %v2061_v37  ;;  %1468 = vmatpush1.bf16.msra.mxu1 %v2063_v38 }
 0x1da   : > { %1356 = vmatprep.subr.bf16.mxu0 %v2054_v44  ;;  %1469 = vmatprep.subr.bf16.mxu1 %v2056_v45 }
 0x1dd   : > { %1357 = vmatpush1.bf16.msra.mxu0 %v2053_v48  ;;  %1470 = vmatpush1.bf16.msra.mxu1 %v2055_v49 }
 0x1df   : > { %1189 = vmatmul.mubr.bf16.gmra.mxu0 %v728_v53  ;;  %1302 = vmatmul.mubr.bf16.gmra.mxu1 %v728_v53 }
 0x1e0   : > { %1198 = vmatprep.mubr.bf16.mxu0 %v2292_v7  ;;  %1311 = vmatprep.mubr.bf16.mxu1 %v2292_v7 }
 0x1e7   : > { %1199 = vmatmul.mubr.bf16.gmra.mxu0 %v729_v59  ;;  %1312 = vmatmul.mubr.bf16.gmra.mxu1 %v729_v59 }
 0x1e8   : > { %1208 = vmatprep.mubr.bf16.mxu0 %v2292_v7  ;;  %1321 = vmatprep.mubr.bf16.mxu1 %v2292_v7 }
 0x1ef   : > { %1209 = vmatmul.mubr.bf16.gmra.mxu0 %v730_v1  ;;  %1322 = vmatmul.mubr.bf16.gmra.mxu1 %v730_v1 }
 0x1f0   : > { %1218 = vmatprep.mubr.bf16.mxu0 %v2292_v7  ;;  %1331 = vmatprep.mubr.bf16.mxu1 %v2292_v7 }
 0x1f7   : > { %1219 = vmatmul.mubr.bf16.gmra.mxu0 %v731_v4  ;;  %1332 = vmatmul.mubr.bf16.gmra.mxu1 %v731_v4 }
 0x1f8   : > { %1374 = vmatprep.mubr.bf16.mxu0 %v2292_v7  ;;  %1487 = vmatprep.mubr.bf16.mxu1 %v2292_v7 }
 0x1ff   : > { %1375 = vmatmul.mubr.bf16.vlgmr.msra.gmra.mxu0 %v2456_v32  ;;  %1488 = vmatmul.mubr.bf16.vlgmr.msra.gmra.mxu1 %v2456_v32 }
 0x200   : > { %1384 = vmatprep.mubr.bf16.mxu0 %v2292_v7  ;;  %1497 = vmatprep.mubr.bf16.mxu1 %v2292_v7 }
 0x207   : > { %1385 = vmatmul.mubr.bf16.gmra.mxu0 %v2463_v54  ;;  %1498 = vmatmul.mubr.bf16.gmra.mxu1 %v2463_v54 }
 0x208   : > { %1394 = vmatprep.mubr.bf16.mxu0 %v2292_v7  ;;  %1507 = vmatprep.mubr.bf16.mxu1 %v2292_v7 }
 0x20f   : > { %1395 = vmatmul.mubr.bf16.gmra.mxu0 %v2474_v14  ;;  %1508 = vmatmul.mubr.bf16.gmra.mxu1 %v2474_v14 }
 0x210   : > { %1404 = vmatprep.mubr.bf16.mxu0 %v2292_v7  ;;  %1517 = vmatprep.mubr.bf16.mxu1 %v2292_v7 }
 0x217   : > { %1405 = vmatmul.mubr.bf16.gmra.mxu0 %v2482_v39  ;;  %1518 = vmatmul.mubr.bf16.gmra.mxu1 %v2482_v39 }
 0x218   : > { %1414 = vmatprep.mubr.bf16.mxu0 %v2292_v7  ;;  %1527 = vmatprep.mubr.bf16.mxu1 %v2292_v7 }
 0x21f   : > { %1415 = vmatmul.mubr.bf16.gmra.mxu0 %v728_v53  ;;  %1528 = vmatmul.mubr.bf16.gmra.mxu1 %v728_v53 }
 0x220   : > { %1424 = vmatprep.mubr.bf16.mxu0 %v2292_v7  ;;  %1537 = vmatprep.mubr.bf16.mxu1 %v2292_v7 }
 0x227   : > { %1425 = vmatmul.mubr.bf16.gmra.mxu0 %v729_v59  ;;  %1538 = vmatmul.mubr.bf16.gmra.mxu1 %v729_v59 }
 0x228   : > { %1434 = vmatprep.mubr.bf16.mxu0 %v2292_v7  ;;  %1547 = vmatprep.mubr.bf16.mxu1 %v2292_v7 }
 0x22f   : > { %1435 = vmatmul.mubr.bf16.gmra.mxu0 %v730_v1  ;;  %1548 = vmatmul.mubr.bf16.gmra.mxu1 %v730_v1 }
 0x230   : > { %1444 = vmatprep.mubr.bf16.mxu0 %v2292_v7  ;;  %1557 = vmatprep.mubr.bf16.mxu1 %v2292_v7 }
 0x237   : > { %1445 = vmatmul.mubr.bf16.gmra.mxu0 %v731_v4  ;;  %1558 = vmatmul.mubr.bf16.gmra.mxu1 %v731_v4 }
 0x27f   : > { %v1150_v18 = vpop.f32.mrf.mxu0  ;;  %v1263_v32 = vpop.f32.mrf.mxu1 }
 0x281   : > { %v1152_v54 = vpop.f32.mrf.mxu0  ;;  %v1265_v5 = vpop.f32.mrf.mxu1 }
 0x283   : > { %v1154_v6 = vpop.f32.mrf.mxu0  ;;  %v1267_v8 = vpop.f32.mrf.mxu1 }
 0x284   : > { %v1568_v9 = vmax.f32 %v1150_v18, %v1154_v6  ;;  %v1598_v10 = vmax.f32 %v1263_v32, %v1267_v8 }
 0x285   : > { %v1156_v11 = vpop.f32.mrf.mxu0  ;;  %v1269_v12 = vpop.f32.mrf.mxu1 }
 0x286   : > { %v1583_v13 = vmax.f32 %v1152_v54, %v1156_v11  ;;  %v1613_v14 = vmax.f32 %v1265_v5, %v1269_v12 }
 0x287   : > { %v1160_v15 = vpop.f32.mrf.mxu0  ;;  %v1273_v16 = vpop.f32.mrf.mxu1 }
 0x288   : > { %v1569_v17 = vmax.f32 %v1568_v9, %v1160_v15  ;;  %v1599_v19 = vmax.f32 %v1598_v10, %v1273_v16 }
 0x289   : > { %v1162_v20 = vpop.f32.mrf.mxu0  ;;  %v1275_v7 = vpop.f32.mrf.mxu1 }
 0x28a   : > { %v1584_v21 = vmax.f32 %v1583_v13, %v1162_v20  ;;  %v1614_v22 = vmax.f32 %v1613_v14, %v1275_v7 }
 0x28b   : > { %v1164_v24 = vpop.f32.mrf.mxu0  ;;  %v1277_v25 = vpop.f32.mrf.mxu1 }
 0x28c   : > { %v1570_v26 = vmax.f32 %v1569_v17, %v1164_v24  ;;  %v1600_v27 = vmax.f32 %v1599_v19, %v1277_v25 }
 0x28d   : > { %v1166_v28 = vpop.f32.mrf.mxu0  ;;  %v1279_v29 = vpop.f32.mrf.mxu1 }
 0x28e   : > { %v1585_v23 = vmax.f32 %v1584_v21, %v1166_v28  ;;  %v1615_v30 = vmax.f32 %v1614_v22, %v1279_v29 }
 0x28f   : > { %v1170_v31 = vpop.f32.mrf.mxu0  ;;  %v1283_v33 = vpop.f32.mrf.mxu1 }
 0x290   : > { %v1571_v34 = vmax.f32 %v1570_v26, %v1170_v31  ;;  %v1601_v35 = vmax.f32 %v1600_v27, %v1283_v33 }
 0x291   : > { %v1172_v36 = vpop.f32.mrf.mxu0  ;;  %v1285_v37 = vpop.f32.mrf.mxu1 }
 0x292   : > { %v1586_v38 = vmax.f32 %v1585_v23, %v1172_v36  ;;  %v1616_v39 = vmax.f32 %v1615_v30, %v1285_v37 }
 0x293   : > { %v1174_v41 = vpop.f32.mrf.mxu0  ;;  %v1287_v42 = vpop.f32.mrf.mxu1 }
 0x294   : > { %v1572_v43 = vmax.f32 %v1571_v34, %v1174_v41  ;;  %v1602_v44 = vmax.f32 %v1601_v35, %v1287_v42 }
 0x295   : > { %v1176_v45 = vpop.f32.mrf.mxu0  ;;  %v1289_v46 = vpop.f32.mrf.mxu1 }
 0x296   : > { %v1587_v47 = vmax.f32 %v1586_v38, %v1176_v45  ;;  %v1617_v48 = vmax.f32 %v1616_v39, %v1289_v46 }
 0x297   : > { %v1180_v49 = vpop.f32.mrf.mxu0  ;;  %v1293_v50 = vpop.f32.mrf.mxu1 }
 0x298   : > { %v1573_v51 = vmax.f32 %v1572_v43, %v1180_v49  ;;  %v1603_v52 = vmax.f32 %v1602_v44, %v1293_v50 }
 0x299   : > { %v1182_v53 = vpop.f32.mrf.mxu0  ;;  %v1295_v55 = vpop.f32.mrf.mxu1 }
 0x29a   : > { %v1588_v40 = vmax.f32 %v1587_v47, %v1182_v53  ;;  %v1618_v57 = vmax.f32 %v1617_v48, %v1295_v55 }
 0x29b   : > { %v1184_v58 = vpop.f32.mrf.mxu0  ;;  %v1297_v59 = vpop.f32.mrf.mxu1 }
 0x29c   : > { %v1574_v60 = vmax.f32 %v1573_v51, %v1184_v58  ;;  %v1604_v56 = vmax.f32 %v1603_v52, %v1297_v59 }
 0x29d   : > { %v1186_v61 = vpop.f32.mrf.mxu0  ;;  %v1299_v62 = vpop.f32.mrf.mxu1 }
 0x29e   : > { %v1589_v63 = vmax.f32 %v1588_v40, %v1186_v61  ;;  %v1619_v0 = vmax.f32 %v1618_v57, %v1299_v62  ;;  %v1773_v40 = vlaneseq }
 0x29f   : > { %v1190_v1 = vpop.f32.mrf.mxu0  ;;  %v1303_v2 = vpop.f32.mrf.mxu1 }
 0x2a0   : > { %v1575_v3 = vmax.f32 %v1574_v60, %v1190_v1  ;;  %v1605_v4 = vmax.f32 %v1604_v56, %v1303_v2  ;;  %v2527_v62 = vshrl.u32 %v1773_v40, 7 }
 0x2a1   : > { %v1192_v18 = vpop.f32.mrf.mxu0  ;;  %v1305_v32 = vpop.f32.mrf.mxu1 }
 0x2a2   : > { %v1590_v54 = vmax.f32 %v1589_v63, %v1192_v18  ;;  %v1620_v5 = vmax.f32 %v1619_v0, %v1305_v32 }
 0x2a3   : > { %v1194_v6 = vpop.f32.mrf.mxu0  ;;  %v1307_v8 = vpop.f32.mrf.mxu1 }
 0x2a4   : > { %v1576_v9 = vmax.f32 %v1575_v3, %v1194_v6  ;;  %v1606_v10 = vmax.f32 %v1605_v4, %v1307_v8 }
 0x2a5   : > { %v1196_v11 = vpop.f32.mrf.mxu0  ;;  %v1309_v12 = vpop.f32.mrf.mxu1 }
 0x2a6   : > { %v1591_v13 = vmax.f32 %v1590_v54, %v1196_v11  ;;  %v1621_v14 = vmax.f32 %v1620_v5, %v1309_v12 }
 0x2a7   : > { %v1200_v15 = vpop.f32.mrf.mxu0  ;;  %v1313_v16 = vpop.f32.mrf.mxu1 }
 0x2a8   : > { %v1577_v17 = vmax.f32 %v1576_v9, %v1200_v15  ;;  %v1607_v19 = vmax.f32 %v1606_v10, %v1313_v16  ;;  %v1775_v9 = vsub.s32 0, %v2527_v62  ;;  %v1783_v10 = vsub.s32 2, %v2527_v62 }
 0x2a9   : > { %v1202_v20 = vpop.f32.mrf.mxu0  ;;  %v1315_v7 = vpop.f32.mrf.mxu1 }
 0x2aa   : > { %v1592_v21 = vmax.f32 %v1591_v13, %v1202_v20  ;;  %v1622_v22 = vmax.f32 %v1621_v14, %v1315_v7  ;;  %v2542_v14 = vld [vmem:[%s2648_s6] sm:$0xff]  ;;  %v1787_v20 = vsub.s32 3, %v2527_v62 }
 0x2ab   : > { %v1204_v24 = vpop.f32.mrf.mxu0  ;;  %v1317_v25 = vpop.f32.mrf.mxu1 }
 0x2ac   : > { %v1578_v26 = vmax.f32 %v1577_v17, %v1204_v24  ;;  %v1608_v27 = vmax.f32 %v1607_v19, %v1317_v25  ;;  %v1779_v19 = vsub.s32 1, %v2527_v62 }
 0x2ad   : > { %v1206_v28 = vpop.f32.mrf.mxu0  ;;  %v1319_v29 = vpop.f32.mrf.mxu1 }
 0x2ae   : > { %v1593_v23 = vmax.f32 %v1592_v21, %v1206_v28  ;;  %v1623_v30 = vmax.f32 %v1622_v22, %v1319_v29  ;;  %v1784_v28 = vrot.slane %v2542_v14, %v1783_v10  ;;  %v2293_v29 = vmov 1966171168  }
 0x2af   : > { %v1210_v31 = vpop.f32.mrf.mxu0  ;;  %v1323_v33 = vpop.f32.mrf.mxu1 }
 0x2b0   : > { %v1579_v34 = vmax.f32 %v1578_v26, %v1210_v31  ;;  %v1609_v35 = vmax.f32 %v1608_v27, %v1323_v33  ;;  %v1776_v27 = vrot.slane %v2542_v14, %v1775_v9 }
 0x2b1   : > { %v1212_v36 = vpop.f32.mrf.mxu0  ;;  %v1325_v37 = vpop.f32.mrf.mxu1 }
 0x2b2   : > { %v1594_v38 = vmax.f32 %v1593_v23, %v1212_v36  ;;  %v1624_v39 = vmax.f32 %v1623_v30, %v1325_v37  ;;  %v1850_v23 = vunpack.c.l.s4 %v2293_v29  ;;  %v1780_v37 = vrot.slane %v2542_v14, %v1779_v19 }
 0x2b3   : > { %v1214_v41 = vpop.f32.mrf.mxu0  ;;  %v1327_v42 = vpop.f32.mrf.mxu1 }
 0x2b4   : > { %v1580_v43 = vmax.f32 %v1579_v34, %v1214_v41  ;;  %v1610_v44 = vmax.f32 %v1609_v35, %v1327_v42 }
 0x2b5   : > { %v1216_v45 = vpop.f32.mrf.mxu0  ;;  %v1329_v46 = vpop.f32.mrf.mxu1 }
 0x2b6   : > { %v1595_v47 = vmax.f32 %v1594_v38, %v1216_v45  ;;  %v1625_v48 = vmax.f32 %v1624_v39, %v1329_v46  ;;  %v1788_v38 = vrot.slane %v2542_v14, %v1787_v20  ;;  %v1851_v46 = vunpack.c.0.s8 %v1850_v23 }
 0x2b7   : > { %v1220_v49 = vpop.f32.mrf.mxu0  ;;  %v1333_v50 = vpop.f32.mrf.mxu1 }
 0x2b8   : > { %v1581_v51 = vmax.f32 %v1580_v43, %v1220_v49  ;;  %v1611_v52 = vmax.f32 %v1610_v44, %v1333_v50 }
 0x2b9   : > { %v1222_v53 = vpop.f32.mrf.mxu0  ;;  %v1335_v55 = vpop.f32.mrf.mxu1 }
 0x2ba   : > { %v1596_v57 = vmax.f32 %v1595_v47, %v1222_v53  ;;  %v1626_v58 = vmax.f32 %v1625_v48, %v1335_v55 }
 0x2bb   : > { %v1224_v59 = vpop.f32.mrf.mxu0  ;;  %v1337_v60 = vpop.f32.mrf.mxu1 }
 0x2bc   : > { %v1582_v56 = vmax.f32 %v1581_v51, %v1224_v59  ;;  %v1612_v61 = vmax.f32 %v1611_v52, %v1337_v60 }
 0x2bd   : > { %v1226_v63 = vpop.f32.mrf.mxu0  ;;  %v1339_v0 = vpop.f32.mrf.mxu1 }
 0x2be   : > { %v1723_v1 = vrot.slane %v1582_v56, 4  ;;  %v1735_v2 = vrot.slane %v1612_v61, 4  ;;  %v1597_v3 = vmax.f32 %v1596_v57, %v1226_v63  ;;  %v1627_v4 = vmax.f32 %v1626_v58, %v1339_v0 }
 0x2bf   : > { %v2529_v18 = vpop.f32.mrf.mxu0  ;;  %v2531_v32 = vpop.f32.mrf.mxu1  ;;  %v2559_v58 = vsub.s32 %v1851_v46, %v2527_v62 }
 0x2c0   : > { %v1724_v54 = vmax.f32 %v1582_v56, %v1723_v1  ;;  %v1736_v5 = vmax.f32 %v1612_v61, %v1735_v2  ;;  %v1729_v6 = vrot.slane %v1597_v3, 4  ;;  %v1741_v8 = vrot.slane %v1627_v4, 4 }
 0x2c1   : > { %v2535_v11 = vpop.f32.mrf.mxu0  ;;  %v2537_v12 = vpop.f32.mrf.mxu1 }
 0x2c2   : > { %v1725_v13 = vrot.slane %v1724_v54, 2  ;;  %v1737_v15 = vrot.slane %v1736_v5, 2  ;;  %v1730_v16 = vmax.f32 %v1597_v3, %v1729_v6  ;;  %v1742_v17 = vmax.f32 %v1627_v4, %v1741_v8 }
 0x2c3   : > { %v2546_v7 = vpop.f32.mrf.mxu0  ;;  %v2548_v21 = vpop.f32.mrf.mxu1 }
 0x2c4   : > { %v1726_v22 = vmax.f32 %v1724_v54, %v1725_v13  ;;  %v1738_v24 = vmax.f32 %v1736_v5, %v1737_v15  ;;  %v1731_v25 = vrot.slane %v1730_v16, 2  ;;  %v1743_v26 = vrot.slane %v1742_v17, 2 }
 0x2c5   : > { %v2552_v30 = vpop.f32.mrf.mxu0  ;;  %v2554_v31 = vpop.f32.mrf.mxu1  ;;  %v1628_v23 = vmax.f32 %v2529_v18, %v2546_v7 }
 0x2c6   : > { %v1727_v33 = vrot.slane %v1726_v22, 1  ;;  %v1739_v34 = vrot.slane %v1738_v24, 1  ;;  %v1732_v35 = vmax.f32 %v1730_v16, %v1731_v25  ;;  %v1744_v36 = vmax.f32 %v1742_v17, %v1743_v26 }
 0x2c7   : > { %v1386_v39 = vpop.f32.mrf.mxu0  ;;  %v1499_v41 = vpop.f32.mrf.mxu1 }
 0x2c8   : > { %v1728_v42 = vmax.f32 %v1726_v22, %v1727_v33  ;;  %v1740_v43 = vmax.f32 %v1738_v24, %v1739_v34  ;;  %v1733_v44 = vrot.slane %v1732_v35, 1  ;;  %v1745_v45 = vrot.slane %v1744_v36, 1 }
 0x2c9   : > { %v1388_v47 = vpop.f32.mrf.mxu0  ;;  %v1501_v48 = vpop.f32.mrf.mxu1  ;;  %v1658_v33 = vmax.f32 %v2531_v32, %v2548_v21 }
 0x2ca   : > { %v1813_v49 = vadd.f32 %v1776_v27, %v1728_v42  ;;  %v1815_v50 = vadd.f32 %v1784_v28, %v1740_v43  ;;  %v1734_v51 = vmax.f32 %v1732_v35, %v1733_v44  ;;  %v1746_v52 = vmax.f32 %v1744_v36, %v1745_v45 }
 0x2cb   : > { %v1390_v53 = vpop.f32.mrf.mxu0  ;;  %v1503_v55 = vpop.f32.mrf.mxu1  ;;  %v1643_v36 = vmax.f32 %v2535_v11, %v2552_v30  ;;  %v1659_v42 = vmax.f32 %v1658_v33, %v1499_v41 }
 0x2cc   : > { %v1814_v40 = vadd.f32 %v1780_v37, %v1734_v51  ;;  %v1816_v57 = vadd.f32 %v1788_v38, %v1746_v52  ;;  %v1821_v56 = vmax.f32 %v1813_v49, 0.0  ;;  %v1823_v61 = vmax.f32 %v1815_v50, 0.0 }
 0x2cd   : > { %v1392_v59 = vpop.f32.mrf.mxu0  ;;  %v1505_v60 = vpop.f32.mrf.mxu1  ;;  %v1673_v37 = vmax.f32 %v2537_v12, %v2554_v31  ;;  %v1629_v38 = vmax.f32 %v1628_v23, %v1386_v39  ;;  %v1644_v45 = vmax.f32 %v1643_v36, %v1388_v47  ;;  %v1660_v50 = vmax.f32 %v1659_v42, %v1503_v55 }
 0x2ce   : > { %v1822_v63 = vmax.f32 %v1814_v40, 0.0  ;;  %v1824_v0 = vmax.f32 %v1816_v57, 0.0 }
 0x2cf   : > { %v1396_v1 = vpop.f32.mrf.mxu0  ;;  %v1509_v2 = vpop.f32.mrf.mxu1  ;;  %v1674_v46 = vmax.f32 %v1673_v37, %v1501_v48  ;;  %v1630_v49 = vmax.f32 %v1629_v38, %v1390_v53  ;;  %v1645_v51 = vmax.f32 %v1644_v45, %v1392_v59 }
 0x2d0   : > { %v2113_v3 = vpack.c.bf16 %v1822_v63, %v1821_v56  ;;  %v2114_v4 = vpack.c.bf16 %v1824_v0, %v1823_v61  ;;  %v1661_v52 = vmax.f32 %v1660_v50, %v1509_v2 }
 0x2d1   : > { %v1398_v54 = vpop.f32.mrf.mxu0  ;;  %v1511_v5 = vpop.f32.mrf.mxu1  ;;  %v1675_v32 = vmax.f32 %v1674_v46, %v1505_v60  ;;  %v1631_v21 = vmax.f32 %v1630_v49, %v1396_v1 }
 0x2d2   : > { %v1855_v6 = vrot.slane %v2113_v3, %v2559_v58  ;;  %v1862_v8 = vrot.slane %v2114_v4, %v2559_v58  ;;  %v1646_v11 = vmax.f32 %v1645_v51, %v1398_v54 }
 0x2d3   : > { %v1400_v9 = vpop.f32.mrf.mxu0  ;;  %v1513_v10 = vpop.f32.mrf.mxu1  ;;  %v1676_v30 = vmax.f32 %v1675_v32, %v1511_v5 }
 0x2d4   : > { %v2563_v13 = vcombine.low %v1855_v6, %v1862_v8  ;;  %v1632_v56 = vmax.f32 %v1631_v21, %v1400_v9  ;;  %v1662_v12 = vmax.f32 %v1661_v52, %v1513_v10 }
 0x2d5   : > { %v1402_v15 = vpop.f32.mrf.mxu0  ;;  %v1515_v16 = vpop.f32.mrf.mxu1 }
 0x2d6   : > { %v1647_v41 = vmax.f32 %v1646_v11, %v1402_v15  ;;  %v1677_v61 = vmax.f32 %v1676_v30, %v1515_v16 }
 0x2d7   : > { %v1406_v17 = vpop.f32.mrf.mxu0  ;;  %v1519_v19 = vpop.f32.mrf.mxu1 }
 0x2d8   : > { %v1633_v47 = vmax.f32 %v1632_v56, %v1406_v17  ;;  %v1663_v48 = vmax.f32 %v1662_v12, %v1519_v19 }
 0x2d9   : > { %v1408_v20 = vpop.f32.mrf.mxu0  ;;  %v1521_v22 = vpop.f32.mrf.mxu1 }
 0x2da   : > { %v1648_v63 = vmax.f32 %v1647_v41, %v1408_v20  ;;  %v1678_v0 = vmax.f32 %v1677_v61, %v1521_v22 }
 0x2db   : > { %v1410_v24 = vpop.f32.mrf.mxu0  ;;  %v1523_v25 = vpop.f32.mrf.mxu1 }
 0x2dc   : > { %v1634_v59 = vmax.f32 %v1633_v47, %v1410_v24  ;;  %v1664_v60 = vmax.f32 %v1663_v48, %v1523_v25 }
 0x2dd   : > { %v1412_v26 = vpop.f32.mrf.mxu0  ;;  %v1525_v27 = vpop.f32.mrf.mxu1 }
 0x2de   : > { %v1649_v3 = vmax.f32 %v1648_v63, %v1412_v26  ;;  %v1679_v4 = vmax.f32 %v1678_v0, %v1525_v27 }
 0x2df   : > { %v1416_v28 = vpop.f32.mrf.mxu0  ;;  %v1529_v29 = vpop.f32.mrf.mxu1 }
 0x2e0   : > { %v1635_v54 = vmax.f32 %v1634_v59, %v1416_v28  ;;  %v1665_v5 = vmax.f32 %v1664_v60, %v1529_v29 }
 0x2e1   : > { %v1418_v34 = vpop.f32.mrf.mxu0  ;;  %v1531_v35 = vpop.f32.mrf.mxu1 }
 0x2e2   : > { %v1650_v9 = vmax.f32 %v1649_v3, %v1418_v34  ;;  %v1680_v10 = vmax.f32 %v1679_v4, %v1531_v35 }
 0x2e3   : > { %v1420_v43 = vpop.f32.mrf.mxu0  ;;  %v1533_v44 = vpop.f32.mrf.mxu1 }
 0x2e4   : > { %v1636_v15 = vmax.f32 %v1635_v54, %v1420_v43  ;;  %v1666_v16 = vmax.f32 %v1665_v5, %v1533_v44 }
 0x2e5   : > { %v1422_v18 = vpop.f32.mrf.mxu0  ;;  %v1535_v7 = vpop.f32.mrf.mxu1 }
 0x2e6   : > { %v1651_v23 = vmax.f32 %v1650_v9, %v1422_v18  ;;  %v1681_v33 = vmax.f32 %v1680_v10, %v1535_v7 }
 0x2e7   : > { %v1426_v40 = vpop.f32.mrf.mxu0  ;;  %v1539_v57 = vpop.f32.mrf.mxu1 }
 0x2e8   : > { %v1637_v20 = vmax.f32 %v1636_v15, %v1426_v40  ;;  %v1667_v22 = vmax.f32 %v1666_v16, %v1539_v57 }
 0x2e9   : > { %v1428_v31 = vpop.f32.mrf.mxu0  ;;  %v1541_v39 = vpop.f32.mrf.mxu1 }
 0x2ea   : > { %v1652_v36 = vmax.f32 %v1651_v23, %v1428_v31  ;;  %v1682_v37 = vmax.f32 %v1681_v33, %v1541_v39 }
 0x2eb   : > { %v1430_v53 = vpop.f32.mrf.mxu0  ;;  %v1543_v55 = vpop.f32.mrf.mxu1 }
 0x2ec   : > { %v1638_v26 = vmax.f32 %v1637_v20, %v1430_v53  ;;  %v1668_v27 = vmax.f32 %v1667_v22, %v1543_v55 }
 0x2ed   : > { %v1432_v1 = vpop.f32.mrf.mxu0  ;;  %v1545_v2 = vpop.f32.mrf.mxu1 }
 0x2ee   : > { %v1653_v38 = vmax.f32 %v1652_v36, %v1432_v1  ;;  %v1683_v42 = vmax.f32 %v1682_v37, %v1545_v2  ;;  %v1791_v1 = vsub.s32 4, %v2527_v62  ;;  %v1799_v2 = vsub.s32 6, %v2527_v62 }
 0x2ef   : > { %v1436_v6 = vpop.f32.mrf.mxu0  ;;  %v1549_v8 = vpop.f32.mrf.mxu1 }
 0x2f0   : > { %v1639_v34 = vmax.f32 %v1638_v26, %v1436_v6  ;;  %v1669_v35 = vmax.f32 %v1668_v27, %v1549_v8  ;;  %v1795_v6 = vsub.s32 5, %v2527_v62  ;;  %v1803_v8 = vsub.s32 7, %v2527_v62 }
 0x2f1   : > { %v1438_v17 = vpop.f32.mrf.mxu0  ;;  %v1551_v19 = vpop.f32.mrf.mxu1  ;;  %v1792_v23 = vrot.slane %v2542_v14, %v1791_v1  ;;  %v1800_v62 = vrot.slane %v2542_v14, %v1799_v2 }
 0x2f2   : > { %v1654_v45 = vmax.f32 %v1653_v38, %v1438_v17  ;;  %v1684_v46 = vmax.f32 %v1683_v42, %v1551_v19  ;;  %v1804_v36 = vrot.slane %v2542_v14, %v1803_v8 }
 0x2f3   : > { %v1440_v24 = vpop.f32.mrf.mxu0  ;;  %v1553_v25 = vpop.f32.mrf.mxu1 }
 0x2f4   : > { %v1640_v49 = vmax.f32 %v1639_v34, %v1440_v24  ;;  %v1670_v50 = vmax.f32 %v1669_v35, %v1553_v25  ;;  %v1796_v25 = vrot.slane %v2542_v14, %v1795_v6 }
 0x2f5   : > { %v1442_v28 = vpop.f32.mrf.mxu0  ;;  %v1555_v29 = vpop.f32.mrf.mxu1 }
 0x2f6   : > { %v1655_v51 = vmax.f32 %v1654_v45, %v1442_v28  ;;  %v1685_v32 = vmax.f32 %v1684_v46, %v1555_v29 }
 0x2f7   : > { %v1446_v43 = vpop.f32.mrf.mxu0  ;;  %v1559_v44 = vpop.f32.mrf.mxu1 }
 0x2f8   : > { %v1641_v21 = vmax.f32 %v1640_v49, %v1446_v43  ;;  %v1671_v52 = vmax.f32 %v1670_v50, %v1559_v44 }
 0x2f9   : > { %v1448_v18 = vpop.f32.mrf.mxu0  ;;  %v1561_v7 = vpop.f32.mrf.mxu1 }
 0x2fa   : > { %v1656_v30 = vmax.f32 %v1655_v51, %v1448_v18  ;;  %v1686_v56 = vmax.f32 %v1685_v32, %v1561_v7 }
 0x2fb   : > { %v1450_v40 = vpop.f32.mrf.mxu0  ;;  %v1563_v57 = vpop.f32.mrf.mxu1 }
 0x2fc   : > { %v1642_v12 = vmax.f32 %v1641_v21, %v1450_v40  ;;  %v1672_v31 = vmax.f32 %v1671_v52, %v1563_v57  ;;  %v1885_v52 = vrot.slane %v2563_v13, %v2559_v58  ;;  %v1926_v57 = vld [vmem:[%s319_s19] sm:$0xff] }
 0x2fd   : > { %v1452_v41 = vpop.f32.mrf.mxu0  ;;  %v1565_v61 = vpop.f32.mrf.mxu1 }
 0x2fe   : > { %v1747_v47 = vrot.slane %v1642_v12, 4  ;;  %v1759_v48 = vrot.slane %v1672_v31, 4  ;;  %v1657_v53 = vmax.f32 %v1656_v30, %v1452_v41  ;;  %v1687_v55 = vmax.f32 %v1686_v56, %v1565_v61 }
 0x300   : > { %v1748_v63 = vmax.f32 %v1642_v12, %v1747_v47  ;;  %v1760_v0 = vmax.f32 %v1672_v31, %v1759_v48  ;;  %v1753_v59 = vrot.slane %v1657_v53, 4  ;;  %v1765_v60 = vrot.slane %v1687_v55, 4 }
 0x302   : > { %v1749_v3 = vrot.slane %v1748_v63, 2  ;;  %v1761_v4 = vrot.slane %v1760_v0, 2  ;;  %v1754_v54 = vmax.f32 %v1657_v53, %v1753_v59  ;;  %v1766_v5 = vmax.f32 %v1687_v55, %v1765_v60 }
 0x304   : > { %v1750_v10 = vmax.f32 %v1748_v63, %v1749_v3  ;;  %v1762_v15 = vmax.f32 %v1760_v0, %v1761_v4  ;;  %v1755_v16 = vrot.slane %v1754_v54, 2  ;;  %v1767_v17 = vrot.slane %v1766_v5, 2 }
 0x306   : > { %v1751_v33 = vrot.slane %v1750_v10, 1  ;;  %v1763_v20 = vrot.slane %v1762_v15, 1  ;;  %v1756_v22 = vmax.f32 %v1754_v54, %v1755_v16  ;;  %v1768_v24 = vmax.f32 %v1766_v5, %v1767_v17 }
 0x308   : > { %v1752_v37 = vmax.f32 %v1750_v10, %v1751_v33  ;;  %v1764_v26 = vmax.f32 %v1762_v15, %v1763_v20  ;;  %v1757_v27 = vrot.slane %v1756_v22, 1  ;;  %v1769_v28 = vrot.slane %v1768_v24, 1 }
 0x30a   : > { %v1817_v29 = vadd.f32 %v1792_v23, %v1752_v37  ;;  %v1819_v38 = vadd.f32 %v1800_v62, %v1764_v26  ;;  %v1758_v42 = vmax.f32 %v1756_v22, %v1757_v27  ;;  %v1770_v34 = vmax.f32 %v1768_v24, %v1769_v28 }
 0x30c   : > { %v1818_v14 = vadd.f32 %v1796_v25, %v1758_v42  ;;  %v1820_v43 = vadd.f32 %v1804_v36, %v1770_v34  ;;  %v1825_v45 = vmax.f32 %v1817_v29, 0.0  ;;  %v1827_v46 = vmax.f32 %v1819_v38, 0.0 }
 0x30e   : > { %v1826_v49 = vmax.f32 %v1818_v14, 0.0  ;;  %v1828_v50 = vmax.f32 %v1820_v43, 0.0 }
 0x310   : > { %v2115_v18 = vpack.c.bf16 %v1826_v49, %v1825_v45  ;;  %v2116_v7 = vpack.c.bf16 %v1828_v50, %v1827_v46 }
 0x312   : > { %v1869_v51 = vrot.slane %v2115_v18, %v2559_v58  ;;  %v1876_v32 = vrot.slane %v2116_v7, %v2559_v58 }
 0x314   : > { %v1878_v21 = vcombine.low %v1869_v51, %v1876_v32 }
 0x316   : > { %v1892_v40 = vrot.slane %v1878_v21, %v2559_v58 }
 0x318   : > { %v1893_v11 = vcombine.low %v1885_v52, %v1892_v40 }
 0x31a   : > { %v1927_v30 = vsel %vm1925_vm1, %v1893_v11, %v1926_v57 }
 0x31b   : > { %1928 = vst [vmem:[%s319_s19] sm:$0xff] %v1927_v30 }
 0x31c PF: > { %s18_s26 = sadd.s32 1, %s2287_s26   ;;  %s2664_s24 = smov %s2283_s25 }
 0x31d   : > { %p15_p2 = scmp.ge.s32.totalorder %s18_s26, 4   ;;  %s2665_s25 = smov %s2667_s28 }
 0x31f   :  { %17 = sbr.rel (!%p15_p2) target bundleno = 2 (0x2), region = 91 }
 0x324   :  { %1948 = vsyncpa [#allocation4], 1 }
 0x325   :  { %1950 = vsyncpa [#allocation4 + $0x1], 1 }

// kernel: _lambda_.7
= control target key start
LH: loop header
LB: loop body
LE: loop exit
PB: predicated region body
PF: predicated region fallthrough
CT: control target
= control target key end

     0   :  { %v287_v36 = vlaneseq  ;;  %v3533_v37 = vmov 1966171168   ;;  %s4671_s0 = inlined_call_operand.vmem [shape: bf16[2,1024], index: 0, kind: input, shape index: {}]   ;;  %s4672_s1 = inlined_call_operand.vmem [shape: bf16[1024,512], index: 1, kind: input, shape index: {}]   ;;  %s4673_s2 = inlined_call_operand.vmem [shape: f32[1,512], index: 2, kind: input, shape index: {}]   ;;  %s4674_s3 = inlined_call_operand.vmem [shape: bf16[512,256], index: 3, kind: input, shape index: {}]   ;;  %s4675_s4 = inlined_call_operand.vmem [shape: f32[1,256], index: 4, kind: input, shape index: {}]   ;;  %s4676_s5 = inlined_call_operand.vmem [shape: bf16[256,128], index: 5, kind: input, shape index: {}]   ;;  %s4677_s6 = inlined_call_operand.vmem [shape: f32[1,128], index: 6, kind: input, shape index: {}]   ;;  %s4678_s7 = inlined_call_operand.hbm [shape: f32[2,128], index: 7, kind: output, shape index: {}]  }
   0x1   :  { %v3014_v0 = vld [vmem:[%s4672_s1 + $0xe4] ss:$16 sps:$4 sm:$0xff]   ;;  %v3018_v2 = vld [vmem:[%s4672_s1 + $0xe0] ss:$16 sps:$4 sm:$0xff]   ;;  %v310_v38 = vunpack.c.l.s4 %v3533_v37 }
   0x2   :  { %v3016_v1 = vld [vmem:[%s4672_s1 + $0x2e4] ss:$16 sps:$4 sm:$0xff]   ;;  %1645 = vmatprep.subr.bf16.mxu0 %v3014_v0  ;;  %v3019_v3 = vld [vmem:[%s4672_s1 + $0x2e0] ss:$16 sps:$4 sm:$0xff]   ;;  %v3692_v42 = vshrl.u32 %v287_v36, 7 }
   0x3   :  { %1686 = vmatprep.subr.bf16.mxu1 %v3016_v1  ;;  %v3020_v4 = vld [vmem:[%s4672_s1 + $0xc4] ss:$16 sps:$4 sm:$0xff]   ;;  %1646 = vmatpush1.bf16.msra.mxu0 %v3018_v2  ;;  %v3024_v6 = vld [vmem:[%s4672_s1 + $0xc0] ss:$16 sps:$4 sm:$0xff]   ;;  %v311_v43 = vunpack.c.0.s8 %v310_v38 }
   0x4   :  { %1687 = vmatpush1.bf16.msra.mxu1 %v3019_v3  ;;  %v3022_v5 = vld [vmem:[%s4672_s1 + $0x2c4] ss:$16 sps:$4 sm:$0xff]   ;;  %1647 = vmatprep.subr.bf16.mxu0 %v3020_v4  ;;  %v3025_v7 = vld [vmem:[%s4672_s1 + $0x2c0] ss:$16 sps:$4 sm:$0xff]  }
   0x5   :  { %1688 = vmatprep.subr.bf16.mxu1 %v3022_v5  ;;  %v3026_v8 = vld [vmem:[%s4672_s1 + $0xa4] ss:$16 sps:$4 sm:$0xff]   ;;  %v3030_v10 = vld [vmem:[%s4672_s1 + $0xa0] ss:$16 sps:$4 sm:$0xff]   ;;  %v314_v49 = vsub.s32 %v311_v43, %v3692_v42 }
   0x6   :  { %v3028_v9 = vld [vmem:[%s4672_s1 + $0x2a4] ss:$16 sps:$4 sm:$0xff]   ;;  %v3031_v11 = vld [vmem:[%s4672_s1 + $0x2a0] ss:$16 sps:$4 sm:$0xff]  }
   0x7   :  { %1648 = vmatpush1.bf16.msra.mxu0 %v3024_v6  ;;  %v3032_v12 = vld [vmem:[%s4672_s1 + $0x84] ss:$16 sps:$4 sm:$0xff]   ;;  %v3036_v14 = vld [vmem:[%s4672_s1 + $0x80] ss:$16 sps:$4 sm:$0xff]  }
   0x8   :  { %1689 = vmatpush1.bf16.msra.mxu1 %v3025_v7  ;;  %1649 = vmatprep.subr.bf16.mxu0 %v3026_v8  ;;  %v3034_v13 = vld [vmem:[%s4672_s1 + $0x284] ss:$16 sps:$4 sm:$0xff]   ;;  %v3037_v15 = vld [vmem:[%s4672_s1 + $0x280] ss:$16 sps:$4 sm:$0xff]  }
   0x9   :  { %1690 = vmatprep.subr.bf16.mxu1 %v3028_v9  ;;  %v3038_v16 = vld [vmem:[%s4672_s1 + $0x64] ss:$16 sps:$4 sm:$0xff]   ;;  %v3042_v18 = vld [vmem:[%s4672_s1 + $0x60] ss:$16 sps:$4 sm:$0xff]  }
   0xa   :  { %v3040_v17 = vld [vmem:[%s4672_s1 + $0x264] ss:$16 sps:$4 sm:$0xff]   ;;  %v3043_v19 = vld [vmem:[%s4672_s1 + $0x260] ss:$16 sps:$4 sm:$0xff]  }
   0xb   :  { %1650 = vmatpush1.bf16.msra.mxu0 %v3030_v10  ;;  %v3044_v20 = vld [vmem:[%s4672_s1 + $0x44] ss:$16 sps:$4 sm:$0xff]   ;;  %v3048_v22 = vld [vmem:[%s4672_s1 + $0x40] ss:$16 sps:$4 sm:$0xff]  }
   0xc   :  { %1691 = vmatpush1.bf16.msra.mxu1 %v3031_v11  ;;  %1651 = vmatprep.subr.bf16.mxu0 %v3032_v12  ;;  %v3046_v21 = vld [vmem:[%s4672_s1 + $0x244] ss:$16 sps:$4 sm:$0xff]   ;;  %v3049_v23 = vld [vmem:[%s4672_s1 + $0x240] ss:$16 sps:$4 sm:$0xff]  }
   0xd   :  { %1692 = vmatprep.subr.bf16.mxu1 %v3034_v13  ;;  %v3050_v24 = vld [vmem:[%s4672_s1 + $0x24] ss:$16 sps:$4 sm:$0xff]   ;;  %v3054_v26 = vld [vmem:[%s4672_s1 + $0x20] ss:$16 sps:$4 sm:$0xff]  }
   0xe   :  { %v3052_v25 = vld [vmem:[%s4672_s1 + $0x224] ss:$16 sps:$4 sm:$0xff]   ;;  %v3055_v27 = vld [vmem:[%s4672_s1 + $0x220] ss:$16 sps:$4 sm:$0xff]  }
   0xf   :  { %1652 = vmatpush1.bf16.msra.mxu0 %v3036_v14  ;;  %v3056_v28 = vld [vmem:[%s4672_s1 + $0x4] ss:$16 sps:$4 sm:$0xff]   ;;  %v3060_v30 = vld [vmem:[%s4672_s1] ss:$16 sps:$4 sm:$0xff]  }
  0x10   :  { %1693 = vmatpush1.bf16.msra.mxu1 %v3037_v15  ;;  %1653 = vmatprep.subr.bf16.mxu0 %v3038_v16  ;;  %v3058_v29 = vld [vmem:[%s4672_s1 + $0x204] ss:$16 sps:$4 sm:$0xff]   ;;  %v3061_v31 = vld [vmem:[%s4672_s1 + $0x200] ss:$16 sps:$4 sm:$0xff]  }
  0x11   :  { %1694 = vmatprep.subr.bf16.mxu1 %v3040_v17  ;;  %v3062_v32 = vld [vmem:[%s4672_s1 + $0x1e4] ss:$16 sps:$4 sm:$0xff]   ;;  %v3066_v34 = vld [vmem:[%s4672_s1 + $0x1e0] ss:$16 sps:$4 sm:$0xff]  }
  0x12   :  { %v3064_v33 = vld [vmem:[%s4672_s1 + $0x3e4] ss:$16 sps:$4 sm:$0xff]   ;;  %v3067_v35 = vld [vmem:[%s4672_s1 + $0x3e0] ss:$16 sps:$4 sm:$0xff]  }
  0x13   :  { %1654 = vmatpush1.bf16.msra.mxu0 %v3042_v18  ;;  %v3068_v39 = vld [vmem:[%s4672_s1 + $0x1c4] ss:$16 sps:$4 sm:$0xff]   ;;  %v3072_v41 = vld [vmem:[%s4672_s1 + $0x1c0] ss:$16 sps:$4 sm:$0xff]  }
  0x14   :  { %1695 = vmatpush1.bf16.msra.mxu1 %v3043_v19  ;;  %1655 = vmatprep.subr.bf16.mxu0 %v3044_v20  ;;  %v3070_v40 = vld [vmem:[%s4672_s1 + $0x3c4] ss:$16 sps:$4 sm:$0xff]   ;;  %v3073_v44 = vld [vmem:[%s4672_s1 + $0x3c0] ss:$16 sps:$4 sm:$0xff]  }
  0x15   :  { %1696 = vmatprep.subr.bf16.mxu1 %v3046_v21  ;;  %v3074_v45 = vld [vmem:[%s4672_s1 + $0x1a4] ss:$16 sps:$4 sm:$0xff]   ;;  %v3078_v47 = vld [vmem:[%s4672_s1 + $0x1a0] ss:$16 sps:$4 sm:$0xff]  }
  0x16   :  { %v3076_v46 = vld [vmem:[%s4672_s1 + $0x3a4] ss:$16 sps:$4 sm:$0xff]   ;;  %v3079_v48 = vld [vmem:[%s4672_s1 + $0x3a0] ss:$16 sps:$4 sm:$0xff]  }
  0x17   :  { %1656 = vmatpush1.bf16.msra.mxu0 %v3048_v22  ;;  %v3080_v50 = vld [vmem:[%s4672_s1 + $0x184] ss:$16 sps:$4 sm:$0xff]   ;;  %v3084_v53 = vld [vmem:[%s4672_s1 + $0x180] ss:$16 sps:$4 sm:$0xff]  }
  0x18   :  { %1697 = vmatpush1.bf16.msra.mxu1 %v3049_v23  ;;  %1657 = vmatprep.subr.bf16.mxu0 %v3050_v24  ;;  %v3082_v51 = vld [vmem:[%s4672_s1 + $0x384] ss:$16 sps:$4 sm:$0xff]   ;;  %v3085_v56 = vld [vmem:[%s4672_s1 + $0x380] ss:$16 sps:$4 sm:$0xff]  }
  0x19   :  { %1698 = vmatprep.subr.bf16.mxu1 %v3052_v25  ;;  %v28_v52 = vld [vmem:[%s4671_s0] sm:$0xff] }
  0x1a   :  { %v315_v54 = vrot.slane %v28_v52, %v314_v49  ;;  %v308_v55 = vcombine.high %v28_v52, %v28_v52  ;;  %v3086_v57 = vld [vmem:[%s4672_s1 + $0x164] ss:$16 sps:$4 sm:$0xff]   ;;  %v3090_v61 = vld [vmem:[%s4672_s1 + $0x160] ss:$16 sps:$4 sm:$0xff]  }
  0x1b   :  { %1658 = vmatpush1.bf16.msra.mxu0 %v3054_v26  ;;  %v3088_v58 = vld [vmem:[%s4672_s1 + $0x364] ss:$16 sps:$4 sm:$0xff]   ;;  %v3091_v0 = vld [vmem:[%s4672_s1 + $0x360] ss:$16 sps:$4 sm:$0xff]  }
  0x1c   :  { %1699 = vmatpush1.bf16.msra.mxu1 %v3055_v27  ;;  %1659 = vmatprep.subr.bf16.mxu0 %v3056_v28  ;;  %v323_v59 = vcombine.high %v315_v54, %v315_v54  ;;  %v322_v60 = vrot.slane %v308_v55, %v314_v49  ;;  %v3092_v1 = vld [vmem:[%s4672_s1 + $0x144] ss:$16 sps:$4 sm:$0xff]   ;;  %v3096_v4 = vld [vmem:[%s4672_s1 + $0x140] ss:$16 sps:$4 sm:$0xff]   ;;  %v3780_v14 = vrot.slane %v315_v54, %v314_v49 }
  0x1d   :  { %1700 = vmatprep.subr.bf16.mxu1 %v3058_v29  ;;  %v3094_v2 = vld [vmem:[%s4672_s1 + $0x344] ss:$16 sps:$4 sm:$0xff]   ;;  %v3097_v5 = vld [vmem:[%s4672_s1 + $0x340] ss:$16 sps:$4 sm:$0xff]  }
  0x1e   :  { %v3734_v62 = vrot.slane %v323_v59, %v314_v49  ;;  %v3736_v63 = vrot.slane %v322_v60, %v314_v49  ;;  %v3098_v6 = vld [vmem:[%s4672_s1 + $0x124] ss:$16 sps:$4 sm:$0xff]   ;;  %v3102_v8 = vld [vmem:[%s4672_s1 + $0x120] ss:$16 sps:$4 sm:$0xff]   ;;  %v324_v12 = vcombine.high %v322_v60, %v322_v60  ;;  %v3795_v19 = vcombine.high %v3780_v14, %v3780_v14 }
  0x1f   :  { %1660 = vmatpush1.bf16.msra.mxu0 %v3060_v30  ;;  %v3100_v7 = vld [vmem:[%s4672_s1 + $0x324] ss:$16 sps:$4 sm:$0xff]   ;;  %v3103_v9 = vld [vmem:[%s4672_s1 + $0x320] ss:$16 sps:$4 sm:$0xff]  }
  0x20   :  { %1701 = vmatpush1.bf16.msra.mxu1 %v3061_v31  ;;  %1661 = vmatprep.subr.bf16.mxu0 %v3062_v32  ;;  %v3749_v3 = vcombine.high %v3734_v62, %v3734_v62  ;;  %v3104_v10 = vld [vmem:[%s4672_s1 + $0x104] ss:$16 sps:$4 sm:$0xff]   ;;  %v3108_v13 = vld [vmem:[%s4672_s1 + $0x100] ss:$16 sps:$4 sm:$0xff]   ;;  %v3791_v18 = vrot.slane %v324_v12, %v314_v49 }
  0x21   :  { %1702 = vmatprep.subr.bf16.mxu1 %v3064_v33  ;;  %1677 = vmatprep.mubr.bf16.mxu0 %v3734_v62  ;;  %v3106_v11 = vld [vmem:[%s4672_s1 + $0x304] ss:$16 sps:$4 sm:$0xff]   ;;  %v3109_v15 = vld [vmem:[%s4672_s1 + $0x300] ss:$16 sps:$4 sm:$0xff]  }
  0x22   :  { %1718 = vmatprep.mubr.bf16.mxu1 %v3749_v3  ;;  %v3112_v16 = vld [vmem:[%s4672_s1 + $0x4e4] ss:$16 sps:$4 sm:$0xff]   ;;  %v3110_v20 = vld [vmem:[%s4672_s1 + $0x4e0] ss:$16 sps:$4 sm:$0xff]   ;;  %v3811_v24 = vcombine.high %v3791_v18, %v3791_v18 }
  0x23   :  { %1662 = vmatpush2.bf16.msra.mxu0 %v3066_v34  ;;  %v3115_v17 = vld [vmem:[%s4672_s1 + $0x6e4] ss:$16 sps:$4 sm:$0xff]   ;;  %v3113_v21 = vld [vmem:[%s4672_s1 + $0x6e0] ss:$16 sps:$4 sm:$0xff]  }
  0x24   :  { %1703 = vmatpush2.bf16.msra.mxu1 %v3067_v35  ;;  %1663 = vmatprep.subr.bf16.mxu0 %v3068_v39  ;;  %v3118_v22 = vld [vmem:[%s4672_s1 + $0x4c4] ss:$16 sps:$4 sm:$0xff]   ;;  %v3116_v25 = vld [vmem:[%s4672_s1 + $0x4c0] ss:$16 sps:$4 sm:$0xff]  }
  0x25   :  { %1704 = vmatprep.subr.bf16.mxu1 %v3070_v40  ;;  %v3121_v23 = vld [vmem:[%s4672_s1 + $0x6c4] ss:$16 sps:$4 sm:$0xff]   ;;  %v3119_v26 = vld [vmem:[%s4672_s1 + $0x6c0] ss:$16 sps:$4 sm:$0xff]  }
  0x26   :  { %v3124_v27 = vld [vmem:[%s4672_s1 + $0x4a4] ss:$16 sps:$4 sm:$0xff]   ;;  %v3122_v29 = vld [vmem:[%s4672_s1 + $0x4a0] ss:$16 sps:$4 sm:$0xff]  }
  0x27   :  { %1664 = vmatpush2.bf16.msra.mxu0 %v3072_v41  ;;  %v3127_v28 = vld [vmem:[%s4672_s1 + $0x6a4] ss:$16 sps:$4 sm:$0xff]   ;;  %v3125_v30 = vld [vmem:[%s4672_s1 + $0x6a0] ss:$16 sps:$4 sm:$0xff]  }
  0x28   :  { %1705 = vmatpush2.bf16.msra.mxu1 %v3073_v44  ;;  %1665 = vmatprep.subr.bf16.mxu0 %v3074_v45  ;;  %v3130_v31 = vld [vmem:[%s4672_s1 + $0x484] ss:$16 sps:$4 sm:$0xff]   ;;  %v3128_v33 = vld [vmem:[%s4672_s1 + $0x480] ss:$16 sps:$4 sm:$0xff]  }
  0x29   :  { %1706 = vmatprep.subr.bf16.mxu1 %v3076_v46  ;;  %v3133_v32 = vld [vmem:[%s4672_s1 + $0x684] ss:$16 sps:$4 sm:$0xff]   ;;  %v3131_v34 = vld [vmem:[%s4672_s1 + $0x680] ss:$16 sps:$4 sm:$0xff]  }
  0x2a   :  { %v3136_v35 = vld [vmem:[%s4672_s1 + $0x464] ss:$16 sps:$4 sm:$0xff]   ;;  %v3134_v37 = vld [vmem:[%s4672_s1 + $0x460] ss:$16 sps:$4 sm:$0xff]  }
  0x2b   :  { %1666 = vmatpush2.bf16.msra.mxu0 %v3078_v47  ;;  %v3139_v36 = vld [vmem:[%s4672_s1 + $0x664] ss:$16 sps:$4 sm:$0xff]   ;;  %v3137_v38 = vld [vmem:[%s4672_s1 + $0x660] ss:$16 sps:$4 sm:$0xff]  }
  0x2c   :  { %1707 = vmatpush2.bf16.msra.mxu1 %v3079_v48  ;;  %1667 = vmatprep.subr.bf16.mxu0 %v3080_v50  ;;  %v3142_v39 = vld [vmem:[%s4672_s1 + $0x444] ss:$16 sps:$4 sm:$0xff]   ;;  %v3140_v41 = vld [vmem:[%s4672_s1 + $0x440] ss:$16 sps:$4 sm:$0xff]  }
  0x2d   :  { %1708 = vmatprep.subr.bf16.mxu1 %v3082_v51  ;;  %v3145_v40 = vld [vmem:[%s4672_s1 + $0x644] ss:$16 sps:$4 sm:$0xff]   ;;  %v3143_v43 = vld [vmem:[%s4672_s1 + $0x640] ss:$16 sps:$4 sm:$0xff]  }
  0x2e   :  { %v3148_v44 = vld [vmem:[%s4672_s1 + $0x424] ss:$16 sps:$4 sm:$0xff]   ;;  %v3146_v46 = vld [vmem:[%s4672_s1 + $0x420] ss:$16 sps:$4 sm:$0xff]  }
  0x2f   :  { %1668 = vmatpush2.bf16.msra.mxu0 %v3084_v53  ;;  %v3151_v45 = vld [vmem:[%s4672_s1 + $0x624] ss:$16 sps:$4 sm:$0xff]   ;;  %v3149_v47 = vld [vmem:[%s4672_s1 + $0x620] ss:$16 sps:$4 sm:$0xff]  }
  0x30   :  { %1709 = vmatpush2.bf16.msra.mxu1 %v3085_v56  ;;  %1669 = vmatprep.subr.bf16.mxu0 %v3086_v57  ;;  %v3154_v48 = vld [vmem:[%s4672_s1 + $0x404] ss:$16 sps:$4 sm:$0xff]   ;;  %v3152_v50 = vld [vmem:[%s4672_s1 + $0x400] ss:$16 sps:$4 sm:$0xff]  }
  0x31   :  { %1710 = vmatprep.subr.bf16.mxu1 %v3088_v58  ;;  %v3157_v49 = vld [vmem:[%s4672_s1 + $0x604] ss:$16 sps:$4 sm:$0xff]   ;;  %v3155_v51 = vld [vmem:[%s4672_s1 + $0x600] ss:$16 sps:$4 sm:$0xff]  }
  0x32   :  { %v3160_v52 = vld [vmem:[%s4672_s1 + $0x5e4] ss:$16 sps:$4 sm:$0xff]   ;;  %v3158_v54 = vld [vmem:[%s4672_s1 + $0x5e0] ss:$16 sps:$4 sm:$0xff]  }
  0x33   :  { %1670 = vmatpush2.bf16.msra.mxu0 %v3090_v61  ;;  %v3163_v53 = vld [vmem:[%s4672_s1 + $0x7e4] ss:$16 sps:$4 sm:$0xff]   ;;  %v3161_v55 = vld [vmem:[%s4672_s1 + $0x7e0] ss:$16 sps:$4 sm:$0xff]  }
  0x34   :  { %1711 = vmatpush2.bf16.msra.mxu1 %v3091_v0  ;;  %1671 = vmatprep.subr.bf16.mxu0 %v3092_v1  ;;  %v3166_v56 = vld [vmem:[%s4672_s1 + $0x5c4] ss:$16 sps:$4 sm:$0xff]   ;;  %v3164_v58 = vld [vmem:[%s4672_s1 + $0x5c0] ss:$16 sps:$4 sm:$0xff]  }
  0x35   :  { %1712 = vmatprep.subr.bf16.mxu1 %v3094_v2  ;;  %v3169_v57 = vld [vmem:[%s4672_s1 + $0x7c4] ss:$16 sps:$4 sm:$0xff]   ;;  %v3167_v59 = vld [vmem:[%s4672_s1 + $0x7c0] ss:$16 sps:$4 sm:$0xff]  }
  0x36   :  { %v3172_v60 = vld [vmem:[%s4672_s1 + $0x5a4] ss:$16 sps:$4 sm:$0xff]   ;;  %v3170_v0 = vld [vmem:[%s4672_s1 + $0x5a0] ss:$16 sps:$4 sm:$0xff]  }
  0x37   :  { %1672 = vmatpush2.bf16.msra.mxu0 %v3096_v4  ;;  %v3175_v61 = vld [vmem:[%s4672_s1 + $0x7a4] ss:$16 sps:$4 sm:$0xff]   ;;  %v3173_v1 = vld [vmem:[%s4672_s1 + $0x7a0] ss:$16 sps:$4 sm:$0xff]  }
  0x38   :  { %1713 = vmatpush2.bf16.msra.mxu1 %v3097_v5  ;;  %1673 = vmatprep.subr.bf16.mxu0 %v3098_v6  ;;  %v3178_v2 = vld [vmem:[%s4672_s1 + $0x584] ss:$16 sps:$4 sm:$0xff]   ;;  %v3176_v5 = vld [vmem:[%s4672_s1 + $0x580] ss:$16 sps:$4 sm:$0xff]  }
  0x39   :  { %1714 = vmatprep.subr.bf16.mxu1 %v3100_v7  ;;  %v3181_v4 = vld [vmem:[%s4672_s1 + $0x784] ss:$16 sps:$4 sm:$0xff]   ;;  %v3179_v6 = vld [vmem:[%s4672_s1 + $0x780] ss:$16 sps:$4 sm:$0xff]  }
  0x3a   :  { %v3184_v7 = vld [vmem:[%s4672_s1 + $0x564] ss:$16 sps:$4 sm:$0xff]  }
  0x3b   :  { %1674 = vmatpush2.bf16.msra.mxu0 %v3102_v8  ;;  %v3187_v8 = vld [vmem:[%s4672_s1 + $0x764] ss:$16 sps:$4 sm:$0xff]  }
  0x3c   :  { %1715 = vmatpush2.bf16.msra.mxu1 %v3103_v9  ;;  %1675 = vmatprep.subr.bf16.mxu0 %v3104_v10  ;;  %v3182_v9 = vld [vmem:[%s4672_s1 + $0x560] ss:$16 sps:$4 sm:$0xff]   ;;  %v3193_v12 = vld [vmem:[%s4672_s1 + $0x744] ss:$16 sps:$4 sm:$0xff]  }
  0x3d   :  { %1716 = vmatprep.subr.bf16.mxu1 %v3106_v11  ;;  %v3185_v10 = vld [vmem:[%s4672_s1 + $0x760] ss:$16 sps:$4 sm:$0xff]   ;;  %v3190_v11 = vld [vmem:[%s4672_s1 + $0x544] ss:$16 sps:$4 sm:$0xff]  }
  0x3f   :  { %1676 = vmatpush2.bf16.msra.mxu0 %v3108_v13  ;;  %v3188_v13 = vld [vmem:[%s4672_s1 + $0x540] ss:$16 sps:$4 sm:$0xff]  }
  0x40   :  { %1717 = vmatpush2.bf16.msra.mxu1 %v3109_v15  ;;  %1727 = vmatprep.subr.bf16.mxu0 %v3112_v16  ;;  %v3191_v15 = vld [vmem:[%s4672_s1 + $0x740] ss:$16 sps:$4 sm:$0xff]   ;;  %v3196_v16 = vld [vmem:[%s4672_s1 + $0x524] ss:$16 sps:$4 sm:$0xff]  }
  0x41   :  { %1768 = vmatprep.subr.bf16.mxu1 %v3115_v17  ;;  %v3199_v17 = vld [vmem:[%s4672_s1 + $0x724] ss:$16 sps:$4 sm:$0xff]  }
  0x42   :  { %1678 = vmatmul.mubr.bf16.vlgmr.msra.gmra.mxu0 %v3780_v14 }
  0x43   :  { %1719 = vmatmul.mubr.bf16.vlgmr.msra.gmra.mxu1 %v3795_v19  ;;  %1728 = vmatpush1.bf16.msra.mxu0 %v3110_v20  ;;  %v3194_v20 = vld [vmem:[%s4672_s1 + $0x520] ss:$16 sps:$4 sm:$0xff]  }
  0x44   :  { %1769 = vmatpush1.bf16.msra.mxu1 %v3113_v21  ;;  %1729 = vmatprep.subr.bf16.mxu0 %v3118_v22  ;;  %v3197_v21 = vld [vmem:[%s4672_s1 + $0x720] ss:$16 sps:$4 sm:$0xff]   ;;  %v3202_v22 = vld [vmem:[%s4672_s1 + $0x504] ss:$16 sps:$4 sm:$0xff]  }
  0x45   :  { %1770 = vmatprep.subr.bf16.mxu1 %v3121_v23  ;;  %1759 = vmatprep.mubr.bf16.mxu0 %v3791_v18  ;;  %v3205_v23 = vld [vmem:[%s4672_s1 + $0x704] ss:$16 sps:$4 sm:$0xff]  }
  0x46   :  { %1800 = vmatprep.mubr.bf16.mxu1 %v3811_v24 }
  0x47   :  { %1730 = vmatpush1.bf16.msra.mxu0 %v3116_v25  ;;  %v3200_v25 = vld [vmem:[%s4672_s1 + $0x500] ss:$16 sps:$4 sm:$0xff]  }
  0x48   :  { %1771 = vmatpush1.bf16.msra.mxu1 %v3119_v26  ;;  %1731 = vmatprep.subr.bf16.mxu0 %v3124_v27  ;;  %v3203_v26 = vld [vmem:[%s4672_s1 + $0x700] ss:$16 sps:$4 sm:$0xff]   ;;  %v3209_v27 = vld [vmem:[%s4672_s1 + $0xec] ss:$16 sps:$4 sm:$0xff]  }
  0x49   :  { %1772 = vmatprep.subr.bf16.mxu1 %v3127_v28  ;;  %v3212_v28 = vld [vmem:[%s4672_s1 + $0x2ec] ss:$16 sps:$4 sm:$0xff]  }
  0x4b   :  { %1732 = vmatpush1.bf16.msra.mxu0 %v3122_v29  ;;  %v3999_v29 = vcombine.high %v3736_v63, %v3736_v63 }
  0x4c   :  { %1773 = vmatpush1.bf16.msra.mxu1 %v3125_v30  ;;  %1733 = vmatprep.subr.bf16.mxu0 %v3130_v31  ;;  %v3207_v30 = vld [vmem:[%s4672_s1 + $0xe8] ss:$16 sps:$4 sm:$0xff]  }
  0x4d   :  { %1774 = vmatprep.subr.bf16.mxu1 %v3133_v32  ;;  %v3210_v31 = vld [vmem:[%s4672_s1 + $0x2e8] ss:$16 sps:$4 sm:$0xff]   ;;  %v3215_v32 = vld [vmem:[%s4672_s1 + $0xcc] ss:$16 sps:$4 sm:$0xff]  }
  0x4f   :  { %1734 = vmatpush1.bf16.msra.mxu0 %v3128_v33  ;;  %v3218_v33 = vld [vmem:[%s4672_s1 + $0x2cc] ss:$16 sps:$4 sm:$0xff]  }
  0x50   :  { %1775 = vmatpush1.bf16.msra.mxu1 %v3131_v34  ;;  %1735 = vmatprep.subr.bf16.mxu0 %v3136_v35  ;;  %v3213_v34 = vld [vmem:[%s4672_s1 + $0xc8] ss:$16 sps:$4 sm:$0xff]  }
  0x51   :  { %1776 = vmatprep.subr.bf16.mxu1 %v3139_v36  ;;  %v3216_v35 = vld [vmem:[%s4672_s1 + $0x2c8] ss:$16 sps:$4 sm:$0xff]   ;;  %v3221_v36 = vld [vmem:[%s4672_s1 + $0xac] ss:$16 sps:$4 sm:$0xff]  }
  0x53   :  { %1736 = vmatpush1.bf16.msra.mxu0 %v3134_v37  ;;  %v3224_v37 = vld [vmem:[%s4672_s1 + $0x2ac] ss:$16 sps:$4 sm:$0xff]  }
  0x54   :  { %1777 = vmatpush1.bf16.msra.mxu1 %v3137_v38  ;;  %1737 = vmatprep.subr.bf16.mxu0 %v3142_v39  ;;  %v3219_v38 = vld [vmem:[%s4672_s1 + $0xa8] ss:$16 sps:$4 sm:$0xff]  }
  0x55   :  { %1778 = vmatprep.subr.bf16.mxu1 %v3145_v40  ;;  %v3222_v39 = vld [vmem:[%s4672_s1 + $0x2a8] ss:$16 sps:$4 sm:$0xff]   ;;  %v3227_v40 = vld [vmem:[%s4672_s1 + $0x8c] ss:$16 sps:$4 sm:$0xff]  }
  0x57   :  { %1738 = vmatpush1.bf16.msra.mxu0 %v3140_v41  ;;  %v3228_v41 = vld [vmem:[%s4672_s1 + $0x288] ss:$16 sps:$4 sm:$0xff]  }
  0x58   :  { %1779 = vmatpush1.bf16.msra.mxu1 %v3143_v43  ;;  %1739 = vmatprep.subr.bf16.mxu0 %v3148_v44  ;;  %v3233_v43 = vld [vmem:[%s4672_s1 + $0x6c] ss:$16 sps:$4 sm:$0xff]  }
  0x59   :  { %1780 = vmatprep.subr.bf16.mxu1 %v3151_v45  ;;  %v3236_v44 = vld [vmem:[%s4672_s1 + $0x26c] ss:$16 sps:$4 sm:$0xff]   ;;  %v3231_v45 = vld [vmem:[%s4672_s1 + $0x68] ss:$16 sps:$4 sm:$0xff]  }
  0x5b   :  { %1740 = vmatpush1.bf16.msra.mxu0 %v3146_v46  ;;  %v3234_v46 = vld [vmem:[%s4672_s1 + $0x268] ss:$16 sps:$4 sm:$0xff]  }
  0x5c   :  { %1781 = vmatpush1.bf16.msra.mxu1 %v3149_v47  ;;  %1741 = vmatprep.subr.bf16.mxu0 %v3154_v48  ;;  %v3239_v47 = vld [vmem:[%s4672_s1 + $0x4c] ss:$16 sps:$4 sm:$0xff]  }
  0x5d   :  { %1782 = vmatprep.subr.bf16.mxu1 %v3157_v49  ;;  %v3242_v48 = vld [vmem:[%s4672_s1 + $0x24c] ss:$16 sps:$4 sm:$0xff]   ;;  %v3237_v49 = vld [vmem:[%s4672_s1 + $0x48] ss:$16 sps:$4 sm:$0xff]  }
  0x5f   :  { %1742 = vmatpush1.bf16.msra.mxu0 %v3152_v50  ;;  %v3240_v50 = vld [vmem:[%s4672_s1 + $0x248] ss:$16 sps:$4 sm:$0xff]  }
  0x60   :  { %1783 = vmatpush1.bf16.msra.mxu1 %v3155_v51  ;;  %1743 = vmatprep.subr.bf16.mxu0 %v3160_v52  ;;  %v3245_v51 = vld [vmem:[%s4672_s1 + $0x2c] ss:$16 sps:$4 sm:$0xff]  }
  0x61   :  { %1784 = vmatprep.subr.bf16.mxu1 %v3163_v53  ;;  %v3248_v52 = vld [vmem:[%s4672_s1 + $0x22c] ss:$16 sps:$4 sm:$0xff]   ;;  %v3243_v53 = vld [vmem:[%s4672_s1 + $0x28] ss:$16 sps:$4 sm:$0xff]  }
  0x63   :  { %1744 = vmatpush2.bf16.msra.mxu0 %v3158_v54  ;;  %v3246_v54 = vld [vmem:[%s4672_s1 + $0x228] ss:$16 sps:$4 sm:$0xff]  }
  0x64   :  { %1785 = vmatpush2.bf16.msra.mxu1 %v3161_v55  ;;  %1745 = vmatprep.subr.bf16.mxu0 %v3166_v56  ;;  %v3251_v55 = vld [vmem:[%s4672_s1 + $0xc] ss:$16 sps:$4 sm:$0xff]  }
  0x65   :  { %1786 = vmatprep.subr.bf16.mxu1 %v3169_v57  ;;  %v3254_v56 = vld [vmem:[%s4672_s1 + $0x20c] ss:$16 sps:$4 sm:$0xff]   ;;  %v3249_v57 = vld [vmem:[%s4672_s1 + $0x8] ss:$16 sps:$4 sm:$0xff]  }
  0x67   :  { %1746 = vmatpush2.bf16.msra.mxu0 %v3164_v58  ;;  %v3252_v58 = vld [vmem:[%s4672_s1 + $0x208] ss:$16 sps:$4 sm:$0xff]  }
  0x68   :  { %1787 = vmatpush2.bf16.msra.mxu1 %v3167_v59  ;;  %1747 = vmatprep.subr.bf16.mxu0 %v3172_v60  ;;  %v3257_v59 = vld [vmem:[%s4672_s1 + $0x1ec] ss:$16 sps:$4 sm:$0xff]  }
  0x69   :  { %1788 = vmatprep.subr.bf16.mxu1 %v3175_v61  ;;  %v3260_v60 = vld [vmem:[%s4672_s1 + $0x3ec] ss:$16 sps:$4 sm:$0xff]   ;;  %v3255_v61 = vld [vmem:[%s4672_s1 + $0x1e8] ss:$16 sps:$4 sm:$0xff]  }
  0x6b   :  { %1748 = vmatpush2.bf16.msra.mxu0 %v3170_v0  ;;  %v3258_v0 = vld [vmem:[%s4672_s1 + $0x3e8] ss:$16 sps:$4 sm:$0xff]  }
  0x6c   :  { %1789 = vmatpush2.bf16.msra.mxu1 %v3173_v1  ;;  %1749 = vmatprep.subr.bf16.mxu0 %v3178_v2  ;;  %v3263_v1 = vld [vmem:[%s4672_s1 + $0x1cc] ss:$16 sps:$4 sm:$0xff]  }
  0x6d   :  { %1790 = vmatprep.subr.bf16.mxu1 %v3181_v4  ;;  %v3266_v2 = vld [vmem:[%s4672_s1 + $0x3cc] ss:$16 sps:$4 sm:$0xff]   ;;  %v3261_v4 = vld [vmem:[%s4672_s1 + $0x1c8] ss:$16 sps:$4 sm:$0xff]  }
  0x6f   :  { %1750 = vmatpush2.bf16.msra.mxu0 %v3176_v5  ;;  %v3264_v5 = vld [vmem:[%s4672_s1 + $0x3c8] ss:$16 sps:$4 sm:$0xff]  }
  0x70   :  { %1791 = vmatpush2.bf16.msra.mxu1 %v3179_v6  ;;  %1751 = vmatprep.subr.bf16.mxu0 %v3184_v7  ;;  %v3269_v6 = vld [vmem:[%s4672_s1 + $0x1ac] ss:$16 sps:$4 sm:$0xff]  }
  0x71   :  { %1792 = vmatprep.subr.bf16.mxu1 %v3187_v8  ;;  %v3272_v7 = vld [vmem:[%s4672_s1 + $0x3ac] ss:$16 sps:$4 sm:$0xff]   ;;  %v3267_v8 = vld [vmem:[%s4672_s1 + $0x1a8] ss:$16 sps:$4 sm:$0xff]  }
  0x73   :  { %1752 = vmatpush2.bf16.msra.mxu0 %v3182_v9  ;;  %v3270_v9 = vld [vmem:[%s4672_s1 + $0x3a8] ss:$16 sps:$4 sm:$0xff]  }
  0x74   :  { %1793 = vmatpush2.bf16.msra.mxu1 %v3185_v10  ;;  %1753 = vmatprep.subr.bf16.mxu0 %v3190_v11  ;;  %v3275_v10 = vld [vmem:[%s4672_s1 + $0x18c] ss:$16 sps:$4 sm:$0xff]  }
  0x75   :  { %1794 = vmatprep.subr.bf16.mxu1 %v3193_v12  ;;  %v3278_v11 = vld [vmem:[%s4672_s1 + $0x38c] ss:$16 sps:$4 sm:$0xff]   ;;  %v3273_v12 = vld [vmem:[%s4672_s1 + $0x188] ss:$16 sps:$4 sm:$0xff]  }
  0x77   :  { %1754 = vmatpush2.bf16.msra.mxu0 %v3188_v13  ;;  %v3276_v13 = vld [vmem:[%s4672_s1 + $0x388] ss:$16 sps:$4 sm:$0xff]  }
  0x78   :  { %1795 = vmatpush2.bf16.msra.mxu1 %v3191_v15  ;;  %1755 = vmatprep.subr.bf16.mxu0 %v3196_v16  ;;  %v3281_v15 = vld [vmem:[%s4672_s1 + $0x16c] ss:$16 sps:$4 sm:$0xff]  }
  0x79   :  { %1796 = vmatprep.subr.bf16.mxu1 %v3199_v17  ;;  %v3284_v16 = vld [vmem:[%s4672_s1 + $0x36c] ss:$16 sps:$4 sm:$0xff]   ;;  %v3279_v17 = vld [vmem:[%s4672_s1 + $0x168] ss:$16 sps:$4 sm:$0xff]  }
  0x7b   :  { %1756 = vmatpush2.bf16.msra.mxu0 %v3194_v20  ;;  %v3282_v20 = vld [vmem:[%s4672_s1 + $0x368] ss:$16 sps:$4 sm:$0xff]  }
  0x7c   :  { %1797 = vmatpush2.bf16.msra.mxu1 %v3197_v21  ;;  %1757 = vmatprep.subr.bf16.mxu0 %v3202_v22  ;;  %v3287_v21 = vld [vmem:[%s4672_s1 + $0x14c] ss:$16 sps:$4 sm:$0xff]  }
  0x7d   :  { %1798 = vmatprep.subr.bf16.mxu1 %v3205_v23  ;;  %v3290_v22 = vld [vmem:[%s4672_s1 + $0x34c] ss:$16 sps:$4 sm:$0xff]   ;;  %v3285_v23 = vld [vmem:[%s4672_s1 + $0x148] ss:$16 sps:$4 sm:$0xff]  }
  0x7f   :  { %1758 = vmatpush2.bf16.msra.mxu0 %v3200_v25  ;;  %v3288_v25 = vld [vmem:[%s4672_s1 + $0x348] ss:$16 sps:$4 sm:$0xff]  }
  0x80   :  { %1799 = vmatpush2.bf16.msra.mxu1 %v3203_v26  ;;  %1809 = vmatprep.subr.bf16.mxu0 %v3209_v27  ;;  %v3293_v26 = vld [vmem:[%s4672_s1 + $0x12c] ss:$16 sps:$4 sm:$0xff]  }
  0x81   :  { %1850 = vmatprep.subr.bf16.mxu1 %v3212_v28  ;;  %v3296_v27 = vld [vmem:[%s4672_s1 + $0x32c] ss:$16 sps:$4 sm:$0xff]   ;;  %v3291_v28 = vld [vmem:[%s4672_s1 + $0x128] ss:$16 sps:$4 sm:$0xff]  }
  0x82   :  { %1760 = vmatmul.mubr.bf16.vlgmr.msra.gmra.mxu0 %v3736_v63 }
  0x83   :  { %1801 = vmatmul.mubr.bf16.vlgmr.msra.gmra.mxu1 %v3999_v29  ;;  %1810 = vmatpush1.bf16.msra.mxu0 %v3207_v30  ;;  %v3294_v30 = vld [vmem:[%s4672_s1 + $0x328] ss:$16 sps:$4 sm:$0xff]  }
  0x84   :  { %1851 = vmatpush1.bf16.msra.mxu1 %v3210_v31  ;;  %1811 = vmatprep.subr.bf16.mxu0 %v3215_v32  ;;  %v3299_v31 = vld [vmem:[%s4672_s1 + $0x10c] ss:$16 sps:$4 sm:$0xff]  }
  0x85   :  { %1852 = vmatprep.subr.bf16.mxu1 %v3218_v33  ;;  %1841 = vmatprep.mubr.bf16.mxu0 %v3734_v62  ;;  %v3230_v62 = vld [vmem:[%s4672_s1 + $0x28c] ss:$16 sps:$4 sm:$0xff]   ;;  %v3297_v33 = vld [vmem:[%s4672_s1 + $0x108] ss:$16 sps:$4 sm:$0xff]  }
  0x86   :  { %1882 = vmatprep.mubr.bf16.mxu1 %v3749_v3  ;;  %v3225_v3 = vld [vmem:[%s4672_s1 + $0x88] ss:$16 sps:$4 sm:$0xff]   ;;  %v3302_v32 = vld [vmem:[%s4672_s1 + $0x30c] ss:$16 sps:$4 sm:$0xff]  }
  0x87   :  { %1812 = vmatpush1.bf16.msra.mxu0 %v3213_v34  ;;  %v3300_v34 = vld [vmem:[%s4672_s1 + $0x308] ss:$16 sps:$4 sm:$0xff]  }
  0x88   :  { %1853 = vmatpush1.bf16.msra.mxu1 %v3216_v35  ;;  %1813 = vmatprep.subr.bf16.mxu0 %v3221_v36  ;;  %v3305_v35 = vld [vmem:[%s4672_s1 + $0x4ec] ss:$16 sps:$4 sm:$0xff]  }
  0x89   :  { %1854 = vmatprep.subr.bf16.mxu1 %v3224_v37  ;;  %v3308_v36 = vld [vmem:[%s4672_s1 + $0x6ec] ss:$16 sps:$4 sm:$0xff]   ;;  %v3303_v37 = vld [vmem:[%s4672_s1 + $0x4e8] ss:$16 sps:$4 sm:$0xff]  }
  0x8b   :  { %1814 = vmatpush1.bf16.msra.mxu0 %v3219_v38  ;;  %v3306_v38 = vld [vmem:[%s4672_s1 + $0x6e8] ss:$16 sps:$4 sm:$0xff]  }
  0x8c   :  { %1855 = vmatpush1.bf16.msra.mxu1 %v3222_v39  ;;  %1815 = vmatprep.subr.bf16.mxu0 %v3227_v40  ;;  %v3311_v39 = vld [vmem:[%s4672_s1 + $0x4cc] ss:$16 sps:$4 sm:$0xff]  }
  0x8d   :  { %1856 = vmatprep.subr.bf16.mxu1 %v3230_v62  ;;  %v3314_v40 = vld [vmem:[%s4672_s1 + $0x6cc] ss:$16 sps:$4 sm:$0xff]   ;;  %v3309_v62 = vld [vmem:[%s4672_s1 + $0x4c8] ss:$16 sps:$4 sm:$0xff]  }
  0x8f   :  { %1816 = vmatpush1.bf16.msra.mxu0 %v3225_v3  ;;  %v3312_v3 = vld [vmem:[%s4672_s1 + $0x6c8] ss:$16 sps:$4 sm:$0xff]  }
  0x90   :  { %1857 = vmatpush1.bf16.msra.mxu1 %v3228_v41  ;;  %1817 = vmatprep.subr.bf16.mxu0 %v3233_v43  ;;  %v3317_v41 = vld [vmem:[%s4672_s1 + $0x4ac] ss:$16 sps:$4 sm:$0xff]  }
  0x91   :  { %1858 = vmatprep.subr.bf16.mxu1 %v3236_v44  ;;  %v3320_v43 = vld [vmem:[%s4672_s1 + $0x6ac] ss:$16 sps:$4 sm:$0xff]   ;;  %v3315_v44 = vld [vmem:[%s4672_s1 + $0x4a8] ss:$16 sps:$4 sm:$0xff]  }
  0x93   :  { %1818 = vmatpush1.bf16.msra.mxu0 %v3231_v45  ;;  %v3326_v45 = vld [vmem:[%s4672_s1 + $0x68c] ss:$16 sps:$4 sm:$0xff]  }
  0x94   :  { %1859 = vmatpush1.bf16.msra.mxu1 %v3234_v46  ;;  %1819 = vmatprep.subr.bf16.mxu0 %v3239_v47  ;;  %v3321_v46 = vld [vmem:[%s4672_s1 + $0x488] ss:$16 sps:$4 sm:$0xff]   ;;  %v3332_v47 = vld [vmem:[%s4672_s1 + $0x66c] ss:$16 sps:$4 sm:$0xff]  }
  0x95   :  { %1860 = vmatprep.subr.bf16.mxu1 %v3242_v48  ;;  %v3327_v48 = vld [vmem:[%s4672_s1 + $0x468] ss:$16 sps:$4 sm:$0xff]  }
  0x97   :  { %1820 = vmatpush1.bf16.msra.mxu0 %v3237_v49  ;;  %v3330_v49 = vld [vmem:[%s4672_s1 + $0x668] ss:$16 sps:$4 sm:$0xff]  }
  0x98   :  { %1861 = vmatpush1.bf16.msra.mxu1 %v3240_v50  ;;  %1821 = vmatprep.subr.bf16.mxu0 %v3245_v51  ;;  %v3335_v50 = vld [vmem:[%s4672_s1 + $0x44c] ss:$16 sps:$4 sm:$0xff]  }
  0x99   :  { %1862 = vmatprep.subr.bf16.mxu1 %v3248_v52  ;;  %v3338_v51 = vld [vmem:[%s4672_s1 + $0x64c] ss:$16 sps:$4 sm:$0xff]   ;;  %v3333_v52 = vld [vmem:[%s4672_s1 + $0x448] ss:$16 sps:$4 sm:$0xff]  }
  0x9b   :  { %1822 = vmatpush1.bf16.msra.mxu0 %v3243_v53  ;;  %v3336_v53 = vld [vmem:[%s4672_s1 + $0x648] ss:$16 sps:$4 sm:$0xff]  }
  0x9c   :  { %1863 = vmatpush1.bf16.msra.mxu1 %v3246_v54  ;;  %1823 = vmatprep.subr.bf16.mxu0 %v3251_v55  ;;  %v3341_v54 = vld [vmem:[%s4672_s1 + $0x42c] ss:$16 sps:$4 sm:$0xff]  }
  0x9d   :  { %1864 = vmatprep.subr.bf16.mxu1 %v3254_v56  ;;  %v3344_v55 = vld [vmem:[%s4672_s1 + $0x62c] ss:$16 sps:$4 sm:$0xff]  }
  0x9f   :  { %1824 = vmatpush1.bf16.msra.mxu0 %v3249_v57 }
  0xa0   :  { %1865 = vmatpush1.bf16.msra.mxu1 %v3252_v58  ;;  %1825 = vmatprep.subr.bf16.mxu0 %v3257_v59 }
  0xa1   :  { %1866 = vmatprep.subr.bf16.mxu1 %v3260_v60 }
  0xa3   :  { %1826 = vmatpush2.bf16.msra.mxu0 %v3255_v61 }
  0xa4   :  { %1867 = vmatpush2.bf16.msra.mxu1 %v3258_v0  ;;  %1827 = vmatprep.subr.bf16.mxu0 %v3263_v1 }
  0xa5   :  { %1868 = vmatprep.subr.bf16.mxu1 %v3266_v2 }
  0xa7   :  { %1828 = vmatpush2.bf16.msra.mxu0 %v3261_v4 }
  0xa8   :  { %1869 = vmatpush2.bf16.msra.mxu1 %v3264_v5  ;;  %1829 = vmatprep.subr.bf16.mxu0 %v3269_v6 }
  0xa9   :  { %1870 = vmatprep.subr.bf16.mxu1 %v3272_v7 }
  0xab   :  { %1830 = vmatpush2.bf16.msra.mxu0 %v3267_v8 }
  0xac   :  { %1871 = vmatpush2.bf16.msra.mxu1 %v3270_v9  ;;  %1831 = vmatprep.subr.bf16.mxu0 %v3275_v10 }
  0xad   :  { %1872 = vmatprep.subr.bf16.mxu1 %v3278_v11 }
  0xaf   :  { %1832 = vmatpush2.bf16.msra.mxu0 %v3273_v12 }
  0xb0   :  { %1873 = vmatpush2.bf16.msra.mxu1 %v3276_v13  ;;  %1833 = vmatprep.subr.bf16.mxu0 %v3281_v15 }
  0xb1   :  { %1874 = vmatprep.subr.bf16.mxu1 %v3284_v16 }
  0xb3   :  { %1834 = vmatpush2.bf16.msra.mxu0 %v3279_v17 }
  0xb4   :  { %1875 = vmatpush2.bf16.msra.mxu1 %v3282_v20  ;;  %1835 = vmatprep.subr.bf16.mxu0 %v3287_v21 }
  0xb5   :  { %1876 = vmatprep.subr.bf16.mxu1 %v3290_v22 }
  0xb7   :  { %1836 = vmatpush2.bf16.msra.mxu0 %v3285_v23 }
  0xb8   :  { %1877 = vmatpush2.bf16.msra.mxu1 %v3288_v25  ;;  %1837 = vmatprep.subr.bf16.mxu0 %v3293_v26 }
  0xb9   :  { %1878 = vmatprep.subr.bf16.mxu1 %v3296_v27 }
  0xbb   :  { %1838 = vmatpush2.bf16.msra.mxu0 %v3291_v28 }
  0xbc   :  { %1879 = vmatpush2.bf16.msra.mxu1 %v3294_v30  ;;  %1839 = vmatprep.subr.bf16.mxu0 %v3299_v31 }
  0xbd   :  { %1880 = vmatprep.subr.bf16.mxu1 %v3302_v32 }
  0xbf   :  { %1840 = vmatpush2.bf16.msra.mxu0 %v3297_v33 }
  0xc0   :  { %1881 = vmatpush2.bf16.msra.mxu1 %v3300_v34  ;;  %1891 = vmatprep.subr.bf16.mxu0 %v3305_v35 }
  0xc1   :  { %1932 = vmatprep.subr.bf16.mxu1 %v3308_v36 }
  0xc2   :  { %1842 = vmatmul.mubr.bf16.vlgmr.msra.gmra.mxu0 %v3780_v14  ;;  %v3318_v14 = vld [vmem:[%s4672_s1 + $0x6a8] ss:$16 sps:$4 sm:$0xff]  }
  0xc3   :  { %1883 = vmatmul.mubr.bf16.vlgmr.msra.gmra.mxu1 %v3795_v19  ;;  %1892 = vmatpush1.bf16.msra.mxu0 %v3303_v37  ;;  %v3323_v19 = vld [vmem:[%s4672_s1 + $0x48c] ss:$16 sps:$4 sm:$0xff]  }
  0xc4   :  { %1933 = vmatpush1.bf16.msra.mxu1 %v3306_v38  ;;  %1893 = vmatprep.subr.bf16.mxu0 %v3311_v39 }
  0xc5   :  { %1934 = vmatprep.subr.bf16.mxu1 %v3314_v40  ;;  %1923 = vmatprep.mubr.bf16.mxu0 %v3791_v18  ;;  %v3324_v18 = vld [vmem:[%s4672_s1 + $0x688] ss:$16 sps:$4 sm:$0xff]  }
  0xc6   :  { %1964 = vmatprep.mubr.bf16.mxu1 %v3811_v24  ;;  %v3329_v24 = vld [vmem:[%s4672_s1 + $0x46c] ss:$16 sps:$4 sm:$0xff]  }
  0xc7   :  { %1894 = vmatpush1.bf16.msra.mxu0 %v3309_v62 }
  0xc8   :  { %1935 = vmatpush1.bf16.msra.mxu1 %v3312_v3  ;;  %1895 = vmatprep.subr.bf16.mxu0 %v3317_v41 }
  0xc9   :  { %1936 = vmatprep.subr.bf16.mxu1 %v3320_v43 }
  0xcb   :  { %1896 = vmatpush1.bf16.msra.mxu0 %v3315_v44 }
  0xcc   :  { %1937 = vmatpush1.bf16.msra.mxu1 %v3318_v14  ;;  %1897 = vmatprep.subr.bf16.mxu0 %v3323_v19 }
  0xcd   :  { %1938 = vmatprep.subr.bf16.mxu1 %v3326_v45 }
  0xcf   :  { %1898 = vmatpush1.bf16.msra.mxu0 %v3321_v46 }
  0xd0   :  { %1939 = vmatpush1.bf16.msra.mxu1 %v3324_v18  ;;  %1899 = vmatprep.subr.bf16.mxu0 %v3329_v24 }
  0xd1   :  { %1940 = vmatprep.subr.bf16.mxu1 %v3332_v47 }
  0xd3   :  { %1900 = vmatpush1.bf16.msra.mxu0 %v3327_v48 }
  0xd4   :  { %1941 = vmatpush1.bf16.msra.mxu1 %v3330_v49  ;;  %1901 = vmatprep.subr.bf16.mxu0 %v3335_v50 }
  0xd5   :  { %1942 = vmatprep.subr.bf16.mxu1 %v3338_v51 }
  0xd6   :  { %12 = vsyncpa [#allocation3], 0  ;;  %v3339_v56 = vld [vmem:[%s4672_s1 + $0x428] ss:$16 sps:$4 sm:$0xff]   ;;  %v3347_v58 = vld [vmem:[%s4672_s1 + $0x40c] ss:$16 sps:$4 sm:$0xff]  }
  0xd7   :  { %1902 = vmatpush1.bf16.msra.mxu0 %v3333_v52  ;;  %v3342_v57 = vld [vmem:[%s4672_s1 + $0x628] ss:$16 sps:$4 sm:$0xff]   ;;  %v3350_v59 = vld [vmem:[%s4672_s1 + $0x60c] ss:$16 sps:$4 sm:$0xff]   ;;  %s3534_s23 = smov [#allocation2]  }
  0xd8   :  { %1943 = vmatpush1.bf16.msra.mxu1 %v3336_v53  ;;  %1903 = vmatprep.subr.bf16.mxu0 %v3341_v54  ;;  %v3345_v60 = vld [vmem:[%s4672_s1 + $0x408] ss:$16 sps:$4 sm:$0xff]   ;;  %v3353_v0 = vld [vmem:[%s4672_s1 + $0x5ec] ss:$16 sps:$4 sm:$0xff]   ;;  %s2645_s24 = sshll.u32 %s3534_s23, 4  ;;  %s2646_s24 = int_to_ptr.vmem [resolvable:$true] %s2645_s24 }
  0xd9   :  { %1944 = vmatprep.subr.bf16.mxu1 %v3344_v55  ;;  %v3348_v61 = vld [vmem:[%s4672_s1 + $0x608] ss:$16 sps:$4 sm:$0xff]   ;;  %v3356_v1 = vld [vmem:[%s4672_s1 + $0x7ec] ss:$16 sps:$4 sm:$0xff]   ;;  %s3511_s25 = scalar_lea.vmem %s2646_s24, 32  ;;  %p3516_p1 = scmp.lt.s32.totalorder %s2646_s24, %s2646_s24 }
  0xda   :  { %v3351_v2 = vld [vmem:[%s4672_s1 + $0x5e8] ss:$16 sps:$4 sm:$0xff]   ;;  %v3359_v5 = vld [vmem:[%s4672_s1 + $0x5cc] ss:$16 sps:$4 sm:$0xff]   ;;  %p3512_p0 = scmp.ne.s32.totalorder %s2646_s24, %s3511_s25  ;;  %p3517_p2 = scmp.lt.s32.totalorder %s3511_s25, %s3511_s25 }
  0xdb   :  { %1904 = vmatpush1.bf16.msra.mxu0 %v3339_v56  ;;  %v3354_v4 = vld [vmem:[%s4672_s1 + $0x7e8] ss:$16 sps:$4 sm:$0xff]   ;;  %v3362_v6 = vld [vmem:[%s4672_s1 + $0x7cc] ss:$16 sps:$4 sm:$0xff]  }
  0xdc   :  { %1945 = vmatpush1.bf16.msra.mxu1 %v3342_v57  ;;  %1905 = vmatprep.subr.bf16.mxu0 %v3347_v58  ;;  %v3357_v7 = vld [vmem:[%s4672_s1 + $0x5c8] ss:$16 sps:$4 sm:$0xff]   ;;  %v3365_v9 = vld [vmem:[%s4672_s1 + $0x5ac] ss:$16 sps:$4 sm:$0xff]   ;;  %p3518_p3 = por %p3517_p2, %p3516_p1 }
  0xdd   :  { %1946 = vmatprep.subr.bf16.mxu1 %v3350_v59  ;;  %v3360_v8 = vld [vmem:[%s4672_s1 + $0x7c8] ss:$16 sps:$4 sm:$0xff]   ;;  %v3368_v10 = vld [vmem:[%s4672_s1 + $0x7ac] ss:$16 sps:$4 sm:$0xff]  }
  0xde   :  { %v3363_v11 = vld [vmem:[%s4672_s1 + $0x5a8] ss:$16 sps:$4 sm:$0xff]   ;;  %v3371_v13 = vld [vmem:[%s4672_s1 + $0x58c] ss:$16 sps:$4 sm:$0xff]   ;;  %p3519_p4 = pnand %p3518_p3, %p3512_p0 }
  0xdf   :  { %1906 = vmatpush1.bf16.msra.mxu0 %v3345_v60  ;;  %v3366_v12 = vld [vmem:[%s4672_s1 + $0x7a8] ss:$16 sps:$4 sm:$0xff]   ;;  %v3374_v15 = vld [vmem:[%s4672_s1 + $0x78c] ss:$16 sps:$4 sm:$0xff]  }
  0xe0   :  { %1947 = vmatpush1.bf16.msra.mxu1 %v3348_v61  ;;  %1907 = vmatprep.subr.bf16.mxu0 %v3353_v0  ;;  %v3369_v16 = vld [vmem:[%s4672_s1 + $0x588] ss:$16 sps:$4 sm:$0xff]   ;;  %v3377_v20 = vld [vmem:[%s4672_s1 + $0x56c] ss:$16 sps:$4 sm:$0xff]  }
  0xe1   :  { %1948 = vmatprep.subr.bf16.mxu1 %v3356_v1  ;;  %v3372_v17 = vld [vmem:[%s4672_s1 + $0x788] ss:$16 sps:$4 sm:$0xff]   ;;  %v3380_v21 = vld [vmem:[%s4672_s1 + $0x76c] ss:$16 sps:$4 sm:$0xff]  }
  0xe2   :  { %v3375_v22 = vld [vmem:[%s4672_s1 + $0x568] ss:$16 sps:$4 sm:$0xff]   ;;  %v3383_v25 = vld [vmem:[%s4672_s1 + $0x54c] ss:$16 sps:$4 sm:$0xff]  }
  0xe3   :  { %1908 = vmatpush2.bf16.msra.mxu0 %v3351_v2  ;;  %v3378_v23 = vld [vmem:[%s4672_s1 + $0x768] ss:$16 sps:$4 sm:$0xff]   ;;  %v3386_v26 = vld [vmem:[%s4672_s1 + $0x74c] ss:$16 sps:$4 sm:$0xff]  }
  0xe4   :  { %1949 = vmatpush2.bf16.msra.mxu1 %v3354_v4  ;;  %1909 = vmatprep.subr.bf16.mxu0 %v3359_v5  ;;  %v3381_v27 = vld [vmem:[%s4672_s1 + $0x548] ss:$16 sps:$4 sm:$0xff]   ;;  %v3389_v30 = vld [vmem:[%s4672_s1 + $0x52c] ss:$16 sps:$4 sm:$0xff]  }
  0xe5   :  { %1950 = vmatprep.subr.bf16.mxu1 %v3362_v6  ;;  %v3384_v28 = vld [vmem:[%s4672_s1 + $0x748] ss:$16 sps:$4 sm:$0xff]   ;;  %v3392_v31 = vld [vmem:[%s4672_s1 + $0x72c] ss:$16 sps:$4 sm:$0xff]  }
  0xe6   :  { %v3387_v32 = vld [vmem:[%s4672_s1 + $0x528] ss:$16 sps:$4 sm:$0xff]   ;;  %v3395_v34 = vld [vmem:[%s4672_s1 + $0x50c] ss:$16 sps:$4 sm:$0xff]  }
  0xe7   :  { %1910 = vmatpush2.bf16.msra.mxu0 %v3357_v7  ;;  %v3390_v33 = vld [vmem:[%s4672_s1 + $0x728] ss:$16 sps:$4 sm:$0xff]   ;;  %v3398_v35 = vld [vmem:[%s4672_s1 + $0x70c] ss:$16 sps:$4 sm:$0xff]  }
  0xe8   :  { %1951 = vmatpush2.bf16.msra.mxu1 %v3360_v8  ;;  %1911 = vmatprep.subr.bf16.mxu0 %v3365_v9  ;;  %v3393_v36 = vld [vmem:[%s4672_s1 + $0x508] ss:$16 sps:$4 sm:$0xff]   ;;  %v3401_v38 = vld [vmem:[%s4674_s3 + $0x74] ss:$8 sps:$4 sm:$0xff]   ;;  %v3404_v40 = vld [vmem:[%s4674_s3 + $0x64] ss:$8 sps:$4 sm:$0xff]  }
  0xe9   :  { %1952 = vmatprep.subr.bf16.mxu1 %v3368_v10  ;;  %v3396_v37 = vld [vmem:[%s4672_s1 + $0x708] ss:$16 sps:$4 sm:$0xff]   ;;  %v3407_v14 = vld [vmem:[%s4674_s3 + $0x54] ss:$8 sps:$4 sm:$0xff]   ;;  %v3410_v18 = vld [vmem:[%s4674_s3 + $0x44] ss:$8 sps:$4 sm:$0xff]  }
  0xea   :  { %v3399_v39 = vld [vmem:[%s4674_s3 + $0x70] ss:$8 sps:$4 sm:$0xff]   ;;  %v3402_v41 = vld [vmem:[%s4674_s3 + $0x60] ss:$8 sps:$4 sm:$0xff]   ;;  %v3449_v47 = vld [vmem:[%s4674_s3 + $0x174] ss:$8 sps:$4 sm:$0xff]  }
  0xeb   :  { %1912 = vmatpush2.bf16.msra.mxu0 %v3363_v11  ;;  %v3447_v24 = vld [vmem:[%s4674_s3 + $0x170] ss:$8 sps:$4 sm:$0xff]   ;;  %v3452_v48 = vld [vmem:[%s4674_s3 + $0x164] ss:$8 sps:$4 sm:$0xff]   ;;  %v3408_v49 = vld [vmem:[%s4674_s3 + $0x40] ss:$8 sps:$4 sm:$0xff]  }
  0xec   :  { %1953 = vmatpush2.bf16.msra.mxu1 %v3366_v12  ;;  %1913 = vmatprep.subr.bf16.mxu0 %v3371_v13  ;;  %v3450_v50 = vld [vmem:[%s4674_s3 + $0x160] ss:$8 sps:$4 sm:$0xff]   ;;  %v3413_v51 = vld [vmem:[%s4674_s3 + $0x34] ss:$8 sps:$4 sm:$0xff]   ;;  %v3411_v53 = vld [vmem:[%s4674_s3 + $0x30] ss:$8 sps:$4 sm:$0xff]  }
  0xed   :  { %1954 = vmatprep.subr.bf16.mxu1 %v3374_v15  ;;  %v3455_v52 = vld [vmem:[%s4674_s3 + $0x154] ss:$8 sps:$4 sm:$0xff]   ;;  %v3453_v54 = vld [vmem:[%s4674_s3 + $0x150] ss:$8 sps:$4 sm:$0xff]   ;;  %v3416_v55 = vld [vmem:[%s4674_s3 + $0x24] ss:$8 sps:$4 sm:$0xff]  }
  0xee   :  { %v3458_v56 = vld [vmem:[%s4674_s3 + $0x144] ss:$8 sps:$4 sm:$0xff]   ;;  %v3414_v57 = vld [vmem:[%s4674_s3 + $0x20] ss:$8 sps:$4 sm:$0xff]   ;;  %v3419_v59 = vld [vmem:[%s4674_s3 + $0x14] ss:$8 sps:$4 sm:$0xff]  }
  0xef   :  { %1914 = vmatpush2.bf16.msra.mxu0 %v3369_v16  ;;  %v3456_v58 = vld [vmem:[%s4674_s3 + $0x140] ss:$8 sps:$4 sm:$0xff]   ;;  %v3461_v60 = vld [vmem:[%s4674_s3 + $0x134] ss:$8 sps:$4 sm:$0xff]   ;;  %v3417_v61 = vld [vmem:[%s4674_s3 + $0x10] ss:$8 sps:$4 sm:$0xff]  }
  0xf0   :  { %1955 = vmatpush2.bf16.msra.mxu1 %v3372_v17  ;;  %1915 = vmatprep.subr.bf16.mxu0 %v3377_v20  ;;  %v3459_v0 = vld [vmem:[%s4674_s3 + $0x130] ss:$8 sps:$4 sm:$0xff]   ;;  %v3422_v1 = vld [vmem:[%s4674_s3 + $0x4] ss:$8 sps:$4 sm:$0xff]   ;;  %v3420_v4 = vld [vmem:[%s4674_s3] ss:$8 sps:$4 sm:$0xff]  }
  0xf1   :  { %1956 = vmatprep.subr.bf16.mxu1 %v3380_v21  ;;  %v3464_v2 = vld [vmem:[%s4674_s3 + $0x124] ss:$8 sps:$4 sm:$0xff]   ;;  %v3462_v5 = vld [vmem:[%s4674_s3 + $0x120] ss:$8 sps:$4 sm:$0xff]   ;;  %v3425_v6 = vld [vmem:[%s4674_s3 + $0xf4] ss:$8 sps:$4 sm:$0xff]  }
  0xf2   :  { %v3467_v7 = vld [vmem:[%s4674_s3 + $0x114] ss:$8 sps:$4 sm:$0xff]   ;;  %v3423_v8 = vld [vmem:[%s4674_s3 + $0xf0] ss:$8 sps:$4 sm:$0xff]   ;;  %v3428_v10 = vld [vmem:[%s4674_s3 + $0xe4] ss:$8 sps:$4 sm:$0xff]  }
  0xf3   :  { %1916 = vmatpush2.bf16.msra.mxu0 %v3375_v22  ;;  %v3465_v9 = vld [vmem:[%s4674_s3 + $0x110] ss:$8 sps:$4 sm:$0xff]   ;;  %v3470_v11 = vld [vmem:[%s4674_s3 + $0x104] ss:$8 sps:$4 sm:$0xff]   ;;  %v3426_v12 = vld [vmem:[%s4674_s3 + $0xe0] ss:$8 sps:$4 sm:$0xff]  }
  0xf4   :  { %1957 = vmatpush2.bf16.msra.mxu1 %v3378_v23  ;;  %1917 = vmatprep.subr.bf16.mxu0 %v3383_v25  ;;  %v3468_v13 = vld [vmem:[%s4674_s3 + $0x100] ss:$8 sps:$4 sm:$0xff]   ;;  %v3431_v15 = vld [vmem:[%s4674_s3 + $0xd4] ss:$8 sps:$4 sm:$0xff]   ;;  %v3429_v17 = vld [vmem:[%s4674_s3 + $0xd0] ss:$8 sps:$4 sm:$0xff]  }
  0xf5   :  { %1958 = vmatprep.subr.bf16.mxu1 %v3386_v26  ;;  %v3473_v16 = vld [vmem:[%s4674_s3 + $0x1f4] ss:$8 sps:$4 sm:$0xff]   ;;  %v3471_v20 = vld [vmem:[%s4674_s3 + $0x1f0] ss:$8 sps:$4 sm:$0xff]   ;;  %v3434_v21 = vld [vmem:[%s4674_s3 + $0xc4] ss:$8 sps:$4 sm:$0xff]  }
  0xf6   :  { %v3476_v22 = vld [vmem:[%s4674_s3 + $0x1e4] ss:$8 sps:$4 sm:$0xff]   ;;  %v3432_v23 = vld [vmem:[%s4674_s3 + $0xc0] ss:$8 sps:$4 sm:$0xff]   ;;  %v3437_v26 = vld [vmem:[%s4674_s3 + $0xb4] ss:$8 sps:$4 sm:$0xff]  }
  0xf7   :  { %1918 = vmatpush2.bf16.msra.mxu0 %v3381_v27  ;;  %v3474_v25 = vld [vmem:[%s4674_s3 + $0x1e0] ss:$8 sps:$4 sm:$0xff]   ;;  %v3479_v27 = vld [vmem:[%s4674_s3 + $0x1d4] ss:$8 sps:$4 sm:$0xff]  }
  0xf8   :  { %1959 = vmatpush2.bf16.msra.mxu1 %v3384_v28  ;;  %1919 = vmatprep.subr.bf16.mxu0 %v3389_v30  ;;  %v3435_v28 = vld [vmem:[%s4674_s3 + $0xb0] ss:$8 sps:$4 sm:$0xff]  }
  0xf9   :  { %1960 = vmatprep.subr.bf16.mxu1 %v3392_v31  ;;  %v3477_v30 = vld [vmem:[%s4674_s3 + $0x1d0] ss:$8 sps:$4 sm:$0xff]   ;;  %v3440_v31 = vld [vmem:[%s4674_s3 + $0xa4] ss:$8 sps:$4 sm:$0xff]  }
  0xfb   :  { %1920 = vmatpush2.bf16.msra.mxu0 %v3387_v32  ;;  %v3482_v32 = vld [vmem:[%s4674_s3 + $0x1c4] ss:$8 sps:$4 sm:$0xff]  }
  0xfc   :  { %1961 = vmatpush2.bf16.msra.mxu1 %v3390_v33  ;;  %1921 = vmatprep.subr.bf16.mxu0 %v3395_v34  ;;  %v3438_v33 = vld [vmem:[%s4674_s3 + $0xa0] ss:$8 sps:$4 sm:$0xff]  }
  0xfd   :  { %1962 = vmatprep.subr.bf16.mxu1 %v3398_v35  ;;  %v3480_v34 = vld [vmem:[%s4674_s3 + $0x1c0] ss:$8 sps:$4 sm:$0xff]   ;;  %v3443_v35 = vld [vmem:[%s4674_s3 + $0x94] ss:$8 sps:$4 sm:$0xff]  }
  0xff   :  { %1922 = vmatpush2.bf16.msra.mxu0 %v3393_v36  ;;  %v3485_v36 = vld [vmem:[%s4674_s3 + $0x1b4] ss:$8 sps:$4 sm:$0xff]  }
 0x100   :  { %1963 = vmatpush2.bf16.msra.mxu1 %v3396_v37  ;;  %2377 = vmatprep.subr.bf16.mxu0 %v3401_v38  ;;  %v289_v37 = vsub.s32 0, %v3692_v42  ;;  %v4563_v38 = vld [vmem:[%s4673_s2] sm:$0xf] }
 0x101   :  { %2418 = vmatprep.subr.bf16.mxu1 %v3449_v47  ;;  %v3486_v47 = vld [vmem:[%s4674_s3 + $0x1a0] ss:$8 sps:$4 sm:$0xff]  }
 0x102   :  { %v4396_v62 = vpop.f32.mrf.mxu0  ;;  %1924 = vmatmul.mubr.bf16.vlgmr.msra.gmra.mxu0 %v3736_v63  ;;  %v3405_v63 = vld [vmem:[%s4674_s3 + $0x50] ss:$8 sps:$4 sm:$0xff]  }
 0x103   :  { %v4398_v3 = vpop.f32.mrf.mxu1  ;;  %1965 = vmatmul.mubr.bf16.vlgmr.msra.gmra.mxu1 %v3999_v29  ;;  %2378 = vmatpush1.bf16.msra.mxu0 %v3399_v39  ;;  %v293_v39 = vsub.s32 1, %v3692_v42 }
 0x104   :  { %v4405_v43 = vpop.f32.mrf.mxu0  ;;  %2379 = vmatprep.subr.bf16.mxu0 %v3404_v40  ;;  %2419 = vmatpush1.bf16.msra.mxu1 %v3447_v24  ;;  %v3441_v40 = vld [vmem:[%s4674_s3 + $0x90] ss:$8 sps:$4 sm:$0xff]  }
 0x105   :  { %v4407_v44 = vpop.f32.mrf.mxu1  ;;  %2420 = vmatprep.subr.bf16.mxu1 %v3452_v48 }
 0x106   :  { %v1683_v19 = vpop.f32.mrf.mxu0 }
 0x107   :  { %v1724_v45 = vpop.f32.mrf.mxu1  ;;  %2380 = vmatpush1.bf16.msra.mxu0 %v3402_v41  ;;  %v3483_v41 = vld [vmem:[%s4674_s3 + $0x1b0] ss:$8 sps:$4 sm:$0xff]   ;;  %v290_v19 = vrot.slane %v4563_v38, %v289_v37 }
 0x108   :  { %v1684_v29 = vpop.f32.mrf.mxu0  ;;  %2381 = vmatprep.subr.bf16.mxu0 %v3407_v14  ;;  %2421 = vmatpush1.bf16.msra.mxu1 %v3450_v50  ;;  %v3446_v14 = vld [vmem:[%s4674_s3 + $0x84] ss:$8 sps:$4 sm:$0xff]   ;;  %v294_v45 = vrot.slane %v4563_v38, %v293_v39 }
 0x109   :  { %v1725_v46 = vpop.f32.mrf.mxu1  ;;  %2422 = vmatprep.subr.bf16.mxu1 %v3455_v52  ;;  %v1680_v29 = vadd.f32 %v4396_v62, %v290_v19  ;;  %v3491_v52 = vld [vmem:[%s4674_s3 + $0x194] ss:$8 sps:$4 sm:$0xff]  }
 0x10a   :  { %v1682_v46 = vadd.f32 %v4405_v43, %v294_v45 }
 0x10b   :  { %2382 = vmatpush1.bf16.msra.mxu0 %v3405_v63  ;;  %v3444_v63 = vld [vmem:[%s4674_s3 + $0x80] ss:$8 sps:$4 sm:$0xff]   ;;  %v1721_v24 = vadd.f32 %v4398_v3, %v1680_v29  ;;  %v3489_v3 = vld [vmem:[%s4674_s3 + $0x190] ss:$8 sps:$4 sm:$0xff]  }
 0x10c   :  { %2383 = vmatprep.subr.bf16.mxu0 %v3410_v18  ;;  %2423 = vmatpush1.bf16.msra.mxu1 %v3453_v54  ;;  %v3488_v18 = vld [vmem:[%s4674_s3 + $0x1a4] ss:$8 sps:$4 sm:$0xff]   ;;  %v1723_v50 = vadd.f32 %v4407_v44, %v1682_v46 }
 0x10d   :  { %2424 = vmatprep.subr.bf16.mxu1 %v3458_v56 }
 0x10f   :  { %2384 = vmatpush1.bf16.msra.mxu0 %v3408_v49 }
 0x110   :  { %2385 = vmatprep.subr.bf16.mxu0 %v3413_v51  ;;  %2425 = vmatpush1.bf16.msra.mxu1 %v3456_v58 }
 0x111   :  { %2426 = vmatprep.subr.bf16.mxu1 %v3461_v60  ;;  %v3494_v60 = vld [vmem:[%s4674_s3 + $0x184] ss:$8 sps:$4 sm:$0xff]  }
 0x113   :  { %2386 = vmatpush1.bf16.msra.mxu0 %v3411_v53 }
 0x114   :  { %2387 = vmatprep.subr.bf16.mxu0 %v3416_v55  ;;  %2427 = vmatpush1.bf16.msra.mxu1 %v3459_v0  ;;  %v3492_v0 = vld [vmem:[%s4674_s3 + $0x180] ss:$8 sps:$4 sm:$0xff]  }
 0x115   :  { %2428 = vmatprep.subr.bf16.mxu1 %v3464_v2 }
 0x117   :  { %2388 = vmatpush1.bf16.msra.mxu0 %v3414_v57 }
 0x118   :  { %2389 = vmatprep.subr.bf16.mxu0 %v3419_v59  ;;  %2429 = vmatpush1.bf16.msra.mxu1 %v3462_v5 }
 0x119   :  { %2430 = vmatprep.subr.bf16.mxu1 %v3467_v7 }
 0x11b   :  { %2390 = vmatpush1.bf16.msra.mxu0 %v3417_v61 }
 0x11c   :  { %2391 = vmatprep.subr.bf16.mxu0 %v3422_v1  ;;  %2431 = vmatpush1.bf16.msra.mxu1 %v3465_v9 }
 0x11d   :  { %2432 = vmatprep.subr.bf16.mxu1 %v3470_v11 }
 0x11f   :  { %2392 = vmatpush1.bf16.msra.mxu0 %v3420_v4 }
 0x120   :  { %2393 = vmatprep.subr.bf16.mxu0 %v3425_v6  ;;  %2433 = vmatpush1.bf16.msra.mxu1 %v3468_v13  ;;  %v3496_v13 = vld [vmem:[%s4676_s5 + $0x38] sm:$0xff]  }
 0x121   :  { %2434 = vmatprep.subr.bf16.mxu1 %v3473_v16  ;;  %v3498_v16 = vld [vmem:[%s4676_s5 + $0x30] sm:$0xff]  }
 0x123   :  { %2394 = vmatpush2.bf16.msra.mxu0 %v3423_v8 }
 0x124   :  { %2395 = vmatprep.subr.bf16.mxu0 %v3428_v10  ;;  %2435 = vmatpush2.bf16.msra.mxu1 %v3471_v20  ;;  %v3500_v20 = vld [vmem:[%s4676_s5 + $0x28] sm:$0xff]  }
 0x125   :  { %2436 = vmatprep.subr.bf16.mxu1 %v3476_v22  ;;  %v3502_v22 = vld [vmem:[%s4676_s5 + $0x20] sm:$0xff]  }
 0x127   :  { %2396 = vmatpush2.bf16.msra.mxu0 %v3426_v12  ;;  %v3495_v12 = vld [vmem:[%s4676_s5 + $0x78] sm:$0xff]  }
 0x128   :  { %2397 = vmatprep.subr.bf16.mxu0 %v3431_v15  ;;  %2437 = vmatpush2.bf16.msra.mxu1 %v3474_v25  ;;  %v3497_v15 = vld [vmem:[%s4676_s5 + $0x70] sm:$0xff]   ;;  %v3504_v25 = vld [vmem:[%s4676_s5 + $0x18] sm:$0xff]  }
 0x129   :  { %2438 = vmatprep.subr.bf16.mxu1 %v3479_v27  ;;  %v3506_v27 = vld [vmem:[%s4676_s5 + $0x10] sm:$0xff]  }
 0x12b   :  { %2398 = vmatpush2.bf16.msra.mxu0 %v3429_v17  ;;  %v3499_v17 = vld [vmem:[%s4676_s5 + $0x68] sm:$0xff]  }
 0x12c   :  { %2399 = vmatprep.subr.bf16.mxu0 %v3434_v21  ;;  %2439 = vmatpush2.bf16.msra.mxu1 %v3477_v30  ;;  %v3501_v21 = vld [vmem:[%s4676_s5 + $0x60] sm:$0xff]   ;;  %v301_v30 = vsub.s32 3, %v3692_v42 }
 0x12d   :  { %2440 = vmatprep.subr.bf16.mxu1 %v3482_v32 }
 0x12e   :  { %v302_v32 = vrot.slane %v4563_v38, %v301_v30 }
 0x12f   :  { %2400 = vmatpush2.bf16.msra.mxu0 %v3432_v23  ;;  %v3503_v23 = vld [vmem:[%s4676_s5 + $0x58] sm:$0xff]  }
 0x130   :  { %2401 = vmatprep.subr.bf16.mxu0 %v3437_v26  ;;  %2441 = vmatpush2.bf16.msra.mxu1 %v3480_v34  ;;  %v3505_v26 = vld [vmem:[%s4676_s5 + $0x50] sm:$0xff]  }
 0x131   :  { %2442 = vmatprep.subr.bf16.mxu1 %v3485_v36 }
 0x133   :  { %2402 = vmatpush2.bf16.msra.mxu0 %v3435_v28  ;;  %v297_v28 = vsub.s32 2, %v3692_v42  ;;  %v2973_v42 = vld [vmem:[%s4677_s6] ss:$0 sm:$0xff] }
 0x134   :  { %2403 = vmatprep.subr.bf16.mxu0 %v3440_v31  ;;  %2443 = vmatpush2.bf16.msra.mxu1 %v3483_v41 }
 0x135   :  { %2444 = vmatprep.subr.bf16.mxu1 %v3488_v18  ;;  %v298_v31 = vrot.slane %v4563_v38, %v297_v28 }
 0x137   :  { %2404 = vmatpush2.bf16.msra.mxu0 %v3438_v33 }
 0x138   :  { %2405 = vmatprep.subr.bf16.mxu0 %v3443_v35  ;;  %2445 = vmatpush2.bf16.msra.mxu1 %v3486_v47 }
 0x139   :  { %2446 = vmatprep.subr.bf16.mxu1 %v3491_v52  ;;  %v3508_v52 = vld [vmem:[%s4676_s5 + $0x8] sm:$0xff]  }
 0x13b   :  { %2406 = vmatpush2.bf16.msra.mxu0 %v3441_v40 }
 0x13c   :  { %2407 = vmatprep.subr.bf16.mxu0 %v3446_v14  ;;  %2447 = vmatpush2.bf16.msra.mxu1 %v3489_v3  ;;  %v3509_v3 = vld [vmem:[%s4676_s5 + $0x40] sm:$0xff]  }
 0x13d   :  { %2448 = vmatprep.subr.bf16.mxu1 %v3494_v60 }
 0x13f   :  { %2408 = vmatpush2.bf16.msra.mxu0 %v3444_v63 }
 0x140   :  { %2449 = vmatpush2.bf16.msra.mxu1 %v3492_v0  ;;  %2990 = vmatprep.subr.bf16.mxu0 %v3495_v12 }
 0x142   :  { %v1761_v48 = vpop.f32.mrf.mxu0 }
 0x143   :  { %v1802_v49 = vpop.f32.mrf.mxu1  ;;  %v1762_v51 = vadd.f32 %v1761_v48, %v1721_v24 }
 0x144   :  { %v1763_v62 = vpop.f32.mrf.mxu0 }
 0x145   :  { %v1804_v43 = vpop.f32.mrf.mxu1  ;;  %v1803_v53 = vadd.f32 %v1802_v49, %v1762_v51  ;;  %v1764_v54 = vadd.f32 %v1763_v62, %v1723_v50 }
 0x146   :  { %v1765_v55 = vpop.f32.mrf.mxu0 }
 0x147   :  { %v1806_v56 = vpop.f32.mrf.mxu1  ;;  %v1805_v57 = vadd.f32 %v1804_v43, %v1764_v54  ;;  %v1973_v44 = vmax.f32 %v1803_v53, 0.0  ;;  %v3507_v43 = vld [vmem:[%s4676_s5 + $0x48] sm:$0xff]   ;;  %v3510_v55 = vld [vmem:[%s4676_s5] sm:$0xff]  }
 0x148   :  { %v1766_v58 = vpop.f32.mrf.mxu0 }
 0x149   :  { %v1807_v59 = vpop.f32.mrf.mxu1  ;;  %v1974_v61 = vmax.f32 %v1805_v57, 0.0  ;;  %v1977_v2 = vpack.c.bf16 %v1973_v44, %v1973_v44  ;;  %v2045_v57 = vld [vmem:[%s4675_s4] sm:$0x3] }
 0x14a   :  { %v2050_v44 = vrot.slane %v2045_v57, %v289_v37  ;;  %v2054_v58 = vrot.slane %v2045_v57, %v293_v39 }
 0x14b   :  { %v1978_v1 = vpack.c.bf16 %v1974_v61, %v1974_v61 }
 0x14d   :  { %2409 = vmatprep.mubr.bf16.mxu0 %v1978_v1 }
 0x14e   :  { %2410 = vmatmul.mubr.bf16.vlgmr.msra.gmra.mxu0 %v1977_v2 }
 0x14f   :  { %2991 = vmatpush3.bf16.msra.mxu0 %v3496_v13 }
 0x150   :  { %2992 = vmatprep.subr.bf16.mxu0 %v3497_v15 }
 0x153   :  { %2993 = vmatpush3.bf16.msra.mxu0 %v3498_v16 }
 0x154   :  { %2994 = vmatprep.subr.bf16.mxu0 %v3499_v17 }
 0x157   :  { %2995 = vmatpush3.bf16.msra.mxu0 %v3500_v20 }
 0x158   :  { %2996 = vmatprep.subr.bf16.mxu0 %v3501_v21 }
 0x15b   :  { %2997 = vmatpush3.bf16.msra.mxu0 %v3502_v22 }
 0x15c   :  { %2998 = vmatprep.subr.bf16.mxu0 %v3503_v23 }
 0x15f   :  { %2999 = vmatpush3.bf16.msra.mxu0 %v3504_v25 }
 0x160   :  { %3000 = vmatprep.subr.bf16.mxu0 %v3505_v26 }
 0x163   :  { %3001 = vmatpush3.bf16.msra.mxu0 %v3506_v27 }
 0x164   :  { %3002 = vmatprep.subr.bf16.mxu0 %v3507_v43 }
 0x167   :  { %3003 = vmatpush3.bf16.msra.mxu0 %v3508_v52 }
 0x168   :  { %3004 = vmatprep.subr.bf16.mxu0 %v3509_v3 }
 0x16b   :  { %3005 = vmatpush3.bf16.msra.mxu0 %v3510_v55 }
 0x182   :  { %v1843_v4 = vpop.f32.mrf.mxu0 }
 0x183   :  { %v1884_v5 = vpop.f32.mrf.mxu1  ;;  %v1844_v33 = vadd.f32 %v1843_v4, %v298_v31 }
 0x184   :  { %v1845_v6 = vpop.f32.mrf.mxu0 }
 0x185   :  { %v1886_v7 = vpop.f32.mrf.mxu1  ;;  %v1846_v34 = vadd.f32 %v1845_v6, %v302_v32  ;;  %v1885_v35 = vadd.f32 %v1884_v5, %v1844_v33 }
 0x186   :  { %v1847_v8 = vpop.f32.mrf.mxu0 }
 0x187   :  { %v1888_v9 = vpop.f32.mrf.mxu1  ;;  %v1887_v41 = vadd.f32 %v1886_v7, %v1846_v34 }
 0x188   :  { %v1848_v10 = vpop.f32.mrf.mxu0 }
 0x189   :  { %v1889_v11 = vpop.f32.mrf.mxu1 }
 0x1c2   :  { %v1925_v36 = vpop.f32.mrf.mxu0 }
 0x1c3   :  { %v1966_v40 = vpop.f32.mrf.mxu1  ;;  %v1926_v14 = vadd.f32 %v1925_v36, %v1885_v35 }
 0x1c4   :  { %v1927_v19 = vpop.f32.mrf.mxu0 }
 0x1c5   :  { %v1968_v45 = vpop.f32.mrf.mxu1  ;;  %v1967_v63 = vadd.f32 %v1966_v40, %v1926_v14  ;;  %v1928_v29 = vadd.f32 %v1927_v19, %v1887_v41 }
 0x1c6   :  { %v1929_v46 = vpop.f32.mrf.mxu0 }
 0x1c7   :  { %v1970_v18 = vpop.f32.mrf.mxu1  ;;  %v1969_v24 = vadd.f32 %v1968_v45, %v1928_v29  ;;  %v1975_v47 = vmax.f32 %v1967_v63, 0.0 }
 0x1c8   :  { %v1930_v48 = vpop.f32.mrf.mxu0 }
 0x1c9   :  { %v1971_v49 = vpop.f32.mrf.mxu1  ;;  %v1976_v50 = vmax.f32 %v1969_v24, 0.0  ;;  %v1979_v38 = vpack.c.bf16 %v1975_v47, %v1975_v47 }
 0x1cb   :  { %v1980_v51 = vpack.c.bf16 %v1976_v50, %v1976_v50 }
 0x1cd   :  { %2450 = vmatprep.mubr.bf16.mxu1 %v1980_v51 }
 0x1ce   :  { %2451 = vmatmul.mubr.bf16.vlgmr.msra.gmra.mxu1 %v1979_v38 }
 0x20e   :  { %v2411_v62 = vpop.f32.mrf.mxu0 }
 0x20f   :  { %v2412_v59 = vadd.f32 %v2411_v62, %v2050_v44 }
 0x210   :  { %v2413_v53 = vpop.f32.mrf.mxu0 }
 0x211   :  { %v2414_v61 = vadd.f32 %v2413_v53, %v2054_v58 }
 0x212   :  { %v2415_v54 = vpop.f32.mrf.mxu0 }
 0x214   :  { %v2416_v56 = vpop.f32.mrf.mxu0 }
 0x28e   :  { %v2452_v60 = vpop.f32.mrf.mxu1 }
 0x28f   :  { %v2453_v0 = vadd.f32 %v2452_v60, %v2412_v59 }
 0x290   :  { %v2454_v1 = vpop.f32.mrf.mxu1 }
 0x291   :  { %v2455_v2 = vadd.f32 %v2454_v1, %v2414_v61  ;;  %v2459_v4 = vmax.f32 %v2453_v0, 0.0 }
 0x292   :  { %v2456_v5 = vpop.f32.mrf.mxu1 }
 0x293   :  { %v2460_v6 = vmax.f32 %v2455_v2, 0.0  ;;  %v2461_v9 = vpack.c.bf16 %v2459_v4, %v2459_v4 }
 0x294   :  { %v2457_v7 = vpop.f32.mrf.mxu1 }
 0x295   :  { %v2462_v8 = vpack.c.bf16 %v2460_v6, %v2460_v6 }
 0x297   :  { %2630 = vmatprep.mubr.bf16.mxu0 %v2462_v8 }
 0x298   :  { %2631 = vmatmul.mubr.bf16.vlgmr.msra.gmra.mxu0 %v2461_v9 }
 0x358   :  { %v3006_v10 = vpop.f32.mrf.mxu0 }
 0x35a   :  { %v3007_v11 = vpop.f32.mrf.mxu0 }
 0x35b   :  { %v3008_v37 = vadd.f32 %v3007_v11, %v3006_v10 }
 0x35c   :  { %v3009_v39 = vpop.f32.mrf.mxu0 }
 0x35d   :  { %v2633_v12 = vadd.f32 %v3008_v37, %v2973_v42 }
 0x35e   :  { %v3010_v13 = vpop.f32.mrf.mxu0 }
 0x35f   :  { %2638 = vst [vmem:[#allocation2] sm:$0x3] %v2633_v12 }
 0x360   :  { %3522 = shalt.err (!%p3519_p4)
}
 0x361   :  { %2648 = dma.vmem_to_hbm [thread:$0]  %s2646_s24, 32, %s4678_s7, [#allocation3]  }
 0x362   :  { %3531 = dma.done.wait [#allocation3], 32  }
 0x363   :  { %3532 = vsyncadd [#allocation3], 4294967264 }
 0x364   :  { %2652 = vsyncpa [#allocation3], 1 }

// kernel: _lambda_.5
= control target key start
LH: loop header
LB: loop body
LE: loop exit
PB: predicated region body
PF: predicated region fallthrough
CT: control target
= control target key end

     0   :  { %12 = vsyncpa [#allocation3], 0  ;;  %s3539_s24 = smov [#allocation2]   ;;  %s3914_s0 = inlined_call_operand.vmem [shape: bf16[2,1024], index: 0, kind: input, shape index: {}]   ;;  %s3915_s1 = inlined_call_operand.hbm [shape: bf16[1024,512], index: 1, kind: input, shape index: {}]   ;;  %s3916_s2 = inlined_call_operand.vmem [shape: f32[1,512], index: 2, kind: input, shape index: {}]   ;;  %s3917_s3 = inlined_call_operand.vmem [shape: bf16[512,256], index: 3, kind: input, shape index: {}]   ;;  %s3918_s4 = inlined_call_operand.vmem [shape: f32[1,256], index: 4, kind: input, shape index: {}]   ;;  %s3919_s5 = inlined_call_operand.vmem [shape: bf16[256,128], index: 5, kind: input, shape index: {}]   ;;  %s3920_s6 = inlined_call_operand.vmem [shape: f32[1,128], index: 6, kind: input, shape index: {}]   ;;  %s3921_s7 = inlined_call_operand.vmem [shape: f32[2,128], index: 7, kind: output, shape index: {}]  }
   0x1   :  { %s20_s25 = sshll.u32 %s3539_s24, 4  ;;  %s21_s25 = int_to_ptr.vmem [resolvable:$true] %s20_s25 }
   0x2   :  { %s3525_s26 = scalar_lea.vmem %s21_s25, 32768  ;;  %p3530_p1 = scmp.lt.s32.totalorder %s21_s25, %s21_s25 }
   0x3   :  { %p3526_p0 = scmp.ne.s32.totalorder %s21_s25, %s3525_s26  ;;  %p3531_p2 = scmp.lt.s32.totalorder %s3525_s26, %s3525_s26 }
   0x5   :  { %p3532_p3 = por %p3531_p2, %p3530_p1 }
   0x7   :  { %p3533_p4 = pnand %p3532_p3, %p3526_p0 }
   0x9   :  { %3536 = shalt.err (!%p3533_p4)
}
   0xa   :  { %s3540_s27 = smov 256   ;;  %s3541_s28 = smov 16  }
   0xb   :  { %26 = dma.hbm_to_vmem [thread:$0]  %s3915_s1, 32768, %s21_s25, [#allocation3], %s3540_s27, %s3540_s27, %s3541_s28  }
   0xc   :  { %3537 = dma.done.wait [#allocation3], 32768  }
   0xd   :  { %3538 = vsyncadd [#allocation3], 4294934528  ;;  %v3020_v0 = vld [vmem:[#allocation2 + $0xe4] ss:$16 sps:$4 sm:$0xff]   ;;  %v3024_v2 = vld [vmem:[#allocation2 + $0xe0] ss:$16 sps:$4 sm:$0xff]   ;;  %v300_v36 = vlaneseq }
   0xe   :  { %v3022_v1 = vld [vmem:[#allocation2 + $0x2e4] ss:$16 sps:$4 sm:$0xff]   ;;  %1658 = vmatprep.subr.bf16.mxu0 %v3020_v0  ;;  %v3025_v3 = vld [vmem:[#allocation2 + $0x2e0] ss:$16 sps:$4 sm:$0xff]   ;;  %v3542_v37 = vmov 1966171168  }
   0xf   :  { %1699 = vmatprep.subr.bf16.mxu1 %v3022_v1  ;;  %v3026_v4 = vld [vmem:[#allocation2 + $0xc4] ss:$16 sps:$4 sm:$0xff]   ;;  %1659 = vmatpush1.bf16.msra.mxu0 %v3024_v2  ;;  %v3030_v6 = vld [vmem:[#allocation2 + $0xc0] ss:$16 sps:$4 sm:$0xff]   ;;  %v323_v38 = vunpack.c.l.s4 %v3542_v37  ;;  %v3586_v42 = vshrl.u32 %v300_v36, 7 }
  0x10   :  { %1700 = vmatpush1.bf16.msra.mxu1 %v3025_v3  ;;  %v3028_v5 = vld [vmem:[#allocation2 + $0x2c4] ss:$16 sps:$4 sm:$0xff]   ;;  %1660 = vmatprep.subr.bf16.mxu0 %v3026_v4  ;;  %v3031_v7 = vld [vmem:[#allocation2 + $0x2c0] ss:$16 sps:$4 sm:$0xff]  }
  0x11   :  { %1701 = vmatprep.subr.bf16.mxu1 %v3028_v5  ;;  %v3032_v8 = vld [vmem:[#allocation2 + $0xa4] ss:$16 sps:$4 sm:$0xff]   ;;  %v3036_v10 = vld [vmem:[#allocation2 + $0xa0] ss:$16 sps:$4 sm:$0xff]   ;;  %v324_v43 = vunpack.c.0.s8 %v323_v38 }
  0x12   :  { %v3034_v9 = vld [vmem:[#allocation2 + $0x2a4] ss:$16 sps:$4 sm:$0xff]   ;;  %v3037_v11 = vld [vmem:[#allocation2 + $0x2a0] ss:$16 sps:$4 sm:$0xff]  }
  0x13   :  { %1661 = vmatpush1.bf16.msra.mxu0 %v3030_v6  ;;  %v3038_v12 = vld [vmem:[#allocation2 + $0x84] ss:$16 sps:$4 sm:$0xff]   ;;  %v3042_v14 = vld [vmem:[#allocation2 + $0x80] ss:$16 sps:$4 sm:$0xff]   ;;  %v327_v49 = vsub.s32 %v324_v43, %v3586_v42 }
  0x14   :  { %1702 = vmatpush1.bf16.msra.mxu1 %v3031_v7  ;;  %1662 = vmatprep.subr.bf16.mxu0 %v3032_v8  ;;  %v3040_v13 = vld [vmem:[#allocation2 + $0x284] ss:$16 sps:$4 sm:$0xff]   ;;  %v3043_v15 = vld [vmem:[#allocation2 + $0x280] ss:$16 sps:$4 sm:$0xff]  }
  0x15   :  { %1703 = vmatprep.subr.bf16.mxu1 %v3034_v9  ;;  %v3044_v16 = vld [vmem:[#allocation2 + $0x64] ss:$16 sps:$4 sm:$0xff]   ;;  %v3048_v18 = vld [vmem:[#allocation2 + $0x60] ss:$16 sps:$4 sm:$0xff]  }
  0x16   :  { %v3046_v17 = vld [vmem:[#allocation2 + $0x264] ss:$16 sps:$4 sm:$0xff]   ;;  %v3049_v19 = vld [vmem:[#allocation2 + $0x260] ss:$16 sps:$4 sm:$0xff]  }
  0x17   :  { %1663 = vmatpush1.bf16.msra.mxu0 %v3036_v10  ;;  %v3050_v20 = vld [vmem:[#allocation2 + $0x44] ss:$16 sps:$4 sm:$0xff]   ;;  %v3054_v22 = vld [vmem:[#allocation2 + $0x40] ss:$16 sps:$4 sm:$0xff]  }
  0x18   :  { %1704 = vmatpush1.bf16.msra.mxu1 %v3037_v11  ;;  %1664 = vmatprep.subr.bf16.mxu0 %v3038_v12  ;;  %v3052_v21 = vld [vmem:[#allocation2 + $0x244] ss:$16 sps:$4 sm:$0xff]   ;;  %v3055_v23 = vld [vmem:[#allocation2 + $0x240] ss:$16 sps:$4 sm:$0xff]  }
  0x19   :  { %1705 = vmatprep.subr.bf16.mxu1 %v3040_v13  ;;  %v3056_v24 = vld [vmem:[#allocation2 + $0x24] ss:$16 sps:$4 sm:$0xff]   ;;  %v3060_v26 = vld [vmem:[#allocation2 + $0x20] ss:$16 sps:$4 sm:$0xff]  }
  0x1a   :  { %v3058_v25 = vld [vmem:[#allocation2 + $0x224] ss:$16 sps:$4 sm:$0xff]   ;;  %v3061_v27 = vld [vmem:[#allocation2 + $0x220] ss:$16 sps:$4 sm:$0xff]  }
  0x1b   :  { %1665 = vmatpush1.bf16.msra.mxu0 %v3042_v14  ;;  %v3062_v28 = vld [vmem:[#allocation2 + $0x4] ss:$16 sps:$4 sm:$0xff]   ;;  %v3066_v30 = vld [vmem:[#allocation2] ss:$16 sps:$4 sm:$0xff]  }
  0x1c   :  { %1706 = vmatpush1.bf16.msra.mxu1 %v3043_v15  ;;  %1666 = vmatprep.subr.bf16.mxu0 %v3044_v16  ;;  %v3064_v29 = vld [vmem:[#allocation2 + $0x204] ss:$16 sps:$4 sm:$0xff]   ;;  %v3067_v31 = vld [vmem:[#allocation2 + $0x200] ss:$16 sps:$4 sm:$0xff]  }
  0x1d   :  { %1707 = vmatprep.subr.bf16.mxu1 %v3046_v17  ;;  %v3068_v32 = vld [vmem:[#allocation2 + $0x1e4] ss:$16 sps:$4 sm:$0xff]   ;;  %v3072_v34 = vld [vmem:[#allocation2 + $0x1e0] ss:$16 sps:$4 sm:$0xff]  }
  0x1e   :  { %v3070_v33 = vld [vmem:[#allocation2 + $0x3e4] ss:$16 sps:$4 sm:$0xff]   ;;  %v3073_v35 = vld [vmem:[#allocation2 + $0x3e0] ss:$16 sps:$4 sm:$0xff]  }
  0x1f   :  { %1667 = vmatpush1.bf16.msra.mxu0 %v3048_v18  ;;  %v3074_v39 = vld [vmem:[#allocation2 + $0x1c4] ss:$16 sps:$4 sm:$0xff]   ;;  %v3078_v41 = vld [vmem:[#allocation2 + $0x1c0] ss:$16 sps:$4 sm:$0xff]  }
  0x20   :  { %1708 = vmatpush1.bf16.msra.mxu1 %v3049_v19  ;;  %1668 = vmatprep.subr.bf16.mxu0 %v3050_v20  ;;  %v3076_v40 = vld [vmem:[#allocation2 + $0x3c4] ss:$16 sps:$4 sm:$0xff]   ;;  %v3079_v44 = vld [vmem:[#allocation2 + $0x3c0] ss:$16 sps:$4 sm:$0xff]  }
  0x21   :  { %1709 = vmatprep.subr.bf16.mxu1 %v3052_v21  ;;  %v3080_v45 = vld [vmem:[#allocation2 + $0x1a4] ss:$16 sps:$4 sm:$0xff]   ;;  %v3084_v47 = vld [vmem:[#allocation2 + $0x1a0] ss:$16 sps:$4 sm:$0xff]  }
  0x22   :  { %v3082_v46 = vld [vmem:[#allocation2 + $0x3a4] ss:$16 sps:$4 sm:$0xff]   ;;  %v3085_v48 = vld [vmem:[#allocation2 + $0x3a0] ss:$16 sps:$4 sm:$0xff]  }
  0x23   :  { %1669 = vmatpush1.bf16.msra.mxu0 %v3054_v22  ;;  %v3086_v50 = vld [vmem:[#allocation2 + $0x184] ss:$16 sps:$4 sm:$0xff]   ;;  %v3090_v53 = vld [vmem:[#allocation2 + $0x180] ss:$16 sps:$4 sm:$0xff]  }
  0x24   :  { %1710 = vmatpush1.bf16.msra.mxu1 %v3055_v23  ;;  %1670 = vmatprep.subr.bf16.mxu0 %v3056_v24  ;;  %v3088_v51 = vld [vmem:[#allocation2 + $0x384] ss:$16 sps:$4 sm:$0xff]   ;;  %v3091_v56 = vld [vmem:[#allocation2 + $0x380] ss:$16 sps:$4 sm:$0xff]  }
  0x25   :  { %1711 = vmatprep.subr.bf16.mxu1 %v3058_v25  ;;  %v41_v52 = vld [vmem:[%s3914_s0] sm:$0xff] }
  0x26   :  { %v328_v54 = vrot.slane %v41_v52, %v327_v49  ;;  %v321_v55 = vcombine.high %v41_v52, %v41_v52  ;;  %v3092_v57 = vld [vmem:[#allocation2 + $0x164] ss:$16 sps:$4 sm:$0xff]   ;;  %v3096_v61 = vld [vmem:[#allocation2 + $0x160] ss:$16 sps:$4 sm:$0xff]  }
  0x27   :  { %1671 = vmatpush1.bf16.msra.mxu0 %v3060_v26  ;;  %v3094_v58 = vld [vmem:[#allocation2 + $0x364] ss:$16 sps:$4 sm:$0xff]   ;;  %v3097_v0 = vld [vmem:[#allocation2 + $0x360] ss:$16 sps:$4 sm:$0xff]  }
  0x28   :  { %1712 = vmatpush1.bf16.msra.mxu1 %v3061_v27  ;;  %1672 = vmatprep.subr.bf16.mxu0 %v3062_v28  ;;  %v336_v59 = vcombine.high %v328_v54, %v328_v54  ;;  %v335_v60 = vrot.slane %v321_v55, %v327_v49  ;;  %v3098_v1 = vld [vmem:[#allocation2 + $0x144] ss:$16 sps:$4 sm:$0xff]   ;;  %v3102_v4 = vld [vmem:[#allocation2 + $0x140] ss:$16 sps:$4 sm:$0xff]   ;;  %v3602_v14 = vrot.slane %v328_v54, %v327_v49 }
  0x29   :  { %1713 = vmatprep.subr.bf16.mxu1 %v3064_v29  ;;  %v3100_v2 = vld [vmem:[#allocation2 + $0x344] ss:$16 sps:$4 sm:$0xff]   ;;  %v3103_v5 = vld [vmem:[#allocation2 + $0x340] ss:$16 sps:$4 sm:$0xff]  }
  0x2a   :  { %v3592_v62 = vrot.slane %v336_v59, %v327_v49  ;;  %v3594_v63 = vrot.slane %v335_v60, %v327_v49  ;;  %v3104_v6 = vld [vmem:[#allocation2 + $0x124] ss:$16 sps:$4 sm:$0xff]   ;;  %v3108_v8 = vld [vmem:[#allocation2 + $0x120] ss:$16 sps:$4 sm:$0xff]   ;;  %v337_v12 = vcombine.high %v335_v60, %v335_v60  ;;  %v3608_v19 = vcombine.high %v3602_v14, %v3602_v14 }
  0x2b   :  { %1673 = vmatpush1.bf16.msra.mxu0 %v3066_v30  ;;  %v3106_v7 = vld [vmem:[#allocation2 + $0x324] ss:$16 sps:$4 sm:$0xff]   ;;  %v3109_v9 = vld [vmem:[#allocation2 + $0x320] ss:$16 sps:$4 sm:$0xff]  }
  0x2c   :  { %1714 = vmatpush1.bf16.msra.mxu1 %v3067_v31  ;;  %1674 = vmatprep.subr.bf16.mxu0 %v3068_v32  ;;  %v3598_v3 = vcombine.high %v3592_v62, %v3592_v62  ;;  %v3110_v10 = vld [vmem:[#allocation2 + $0x104] ss:$16 sps:$4 sm:$0xff]   ;;  %v3114_v13 = vld [vmem:[#allocation2 + $0x100] ss:$16 sps:$4 sm:$0xff]   ;;  %v3604_v18 = vrot.slane %v337_v12, %v327_v49 }
  0x2d   :  { %1715 = vmatprep.subr.bf16.mxu1 %v3070_v33  ;;  %1690 = vmatprep.mubr.bf16.mxu0 %v3592_v62  ;;  %v3112_v11 = vld [vmem:[#allocation2 + $0x304] ss:$16 sps:$4 sm:$0xff]   ;;  %v3115_v15 = vld [vmem:[#allocation2 + $0x300] ss:$16 sps:$4 sm:$0xff]  }
  0x2e   :  { %1731 = vmatprep.mubr.bf16.mxu1 %v3598_v3  ;;  %v3118_v16 = vld [vmem:[#allocation2 + $0x4e4] ss:$16 sps:$4 sm:$0xff]   ;;  %v3116_v20 = vld [vmem:[#allocation2 + $0x4e0] ss:$16 sps:$4 sm:$0xff]   ;;  %v3612_v24 = vcombine.high %v3604_v18, %v3604_v18 }
  0x2f   :  { %1675 = vmatpush2.bf16.msra.mxu0 %v3072_v34  ;;  %v3121_v17 = vld [vmem:[#allocation2 + $0x6e4] ss:$16 sps:$4 sm:$0xff]   ;;  %v3119_v21 = vld [vmem:[#allocation2 + $0x6e0] ss:$16 sps:$4 sm:$0xff]  }
  0x30   :  { %1716 = vmatpush2.bf16.msra.mxu1 %v3073_v35  ;;  %1676 = vmatprep.subr.bf16.mxu0 %v3074_v39  ;;  %v3124_v22 = vld [vmem:[#allocation2 + $0x4c4] ss:$16 sps:$4 sm:$0xff]   ;;  %v3122_v25 = vld [vmem:[#allocation2 + $0x4c0] ss:$16 sps:$4 sm:$0xff]  }
  0x31   :  { %1717 = vmatprep.subr.bf16.mxu1 %v3076_v40  ;;  %v3127_v23 = vld [vmem:[#allocation2 + $0x6c4] ss:$16 sps:$4 sm:$0xff]   ;;  %v3125_v26 = vld [vmem:[#allocation2 + $0x6c0] ss:$16 sps:$4 sm:$0xff]  }
  0x32   :  { %v3130_v27 = vld [vmem:[#allocation2 + $0x4a4] ss:$16 sps:$4 sm:$0xff]   ;;  %v3128_v29 = vld [vmem:[#allocation2 + $0x4a0] ss:$16 sps:$4 sm:$0xff]  }
  0x33   :  { %1677 = vmatpush2.bf16.msra.mxu0 %v3078_v41  ;;  %v3133_v28 = vld [vmem:[#allocation2 + $0x6a4] ss:$16 sps:$4 sm:$0xff]   ;;  %v3131_v30 = vld [vmem:[#allocation2 + $0x6a0] ss:$16 sps:$4 sm:$0xff]  }
  0x34   :  { %1718 = vmatpush2.bf16.msra.mxu1 %v3079_v44  ;;  %1678 = vmatprep.subr.bf16.mxu0 %v3080_v45  ;;  %v3136_v31 = vld [vmem:[#allocation2 + $0x484] ss:$16 sps:$4 sm:$0xff]   ;;  %v3134_v33 = vld [vmem:[#allocation2 + $0x480] ss:$16 sps:$4 sm:$0xff]  }
  0x35   :  { %1719 = vmatprep.subr.bf16.mxu1 %v3082_v46  ;;  %v3139_v32 = vld [vmem:[#allocation2 + $0x684] ss:$16 sps:$4 sm:$0xff]   ;;  %v3137_v34 = vld [vmem:[#allocation2 + $0x680] ss:$16 sps:$4 sm:$0xff]  }
  0x36   :  { %v3142_v35 = vld [vmem:[#allocation2 + $0x464] ss:$16 sps:$4 sm:$0xff]   ;;  %v3140_v37 = vld [vmem:[#allocation2 + $0x460] ss:$16 sps:$4 sm:$0xff]  }
  0x37   :  { %1679 = vmatpush2.bf16.msra.mxu0 %v3084_v47  ;;  %v3145_v36 = vld [vmem:[#allocation2 + $0x664] ss:$16 sps:$4 sm:$0xff]   ;;  %v3143_v38 = vld [vmem:[#allocation2 + $0x660] ss:$16 sps:$4 sm:$0xff]  }
  0x38   :  { %1720 = vmatpush2.bf16.msra.mxu1 %v3085_v48  ;;  %1680 = vmatprep.subr.bf16.mxu0 %v3086_v50  ;;  %v3148_v39 = vld [vmem:[#allocation2 + $0x444] ss:$16 sps:$4 sm:$0xff]   ;;  %v3146_v41 = vld [vmem:[#allocation2 + $0x440] ss:$16 sps:$4 sm:$0xff]  }
  0x39   :  { %1721 = vmatprep.subr.bf16.mxu1 %v3088_v51  ;;  %v3151_v40 = vld [vmem:[#allocation2 + $0x644] ss:$16 sps:$4 sm:$0xff]   ;;  %v3149_v43 = vld [vmem:[#allocation2 + $0x640] ss:$16 sps:$4 sm:$0xff]  }
  0x3a   :  { %v3154_v44 = vld [vmem:[#allocation2 + $0x424] ss:$16 sps:$4 sm:$0xff]   ;;  %v3152_v46 = vld [vmem:[#allocation2 + $0x420] ss:$16 sps:$4 sm:$0xff]  }
  0x3b   :  { %1681 = vmatpush2.bf16.msra.mxu0 %v3090_v53  ;;  %v3157_v45 = vld [vmem:[#allocation2 + $0x624] ss:$16 sps:$4 sm:$0xff]   ;;  %v3155_v47 = vld [vmem:[#allocation2 + $0x620] ss:$16 sps:$4 sm:$0xff]  }
  0x3c   :  { %1722 = vmatpush2.bf16.msra.mxu1 %v3091_v56  ;;  %1682 = vmatprep.subr.bf16.mxu0 %v3092_v57  ;;  %v3160_v48 = vld [vmem:[#allocation2 + $0x404] ss:$16 sps:$4 sm:$0xff]   ;;  %v3158_v50 = vld [vmem:[#allocation2 + $0x400] ss:$16 sps:$4 sm:$0xff]  }
  0x3d   :  { %1723 = vmatprep.subr.bf16.mxu1 %v3094_v58  ;;  %v3163_v49 = vld [vmem:[#allocation2 + $0x604] ss:$16 sps:$4 sm:$0xff]   ;;  %v3161_v51 = vld [vmem:[#allocation2 + $0x600] ss:$16 sps:$4 sm:$0xff]  }
  0x3e   :  { %v3166_v52 = vld [vmem:[#allocation2 + $0x5e4] ss:$16 sps:$4 sm:$0xff]   ;;  %v3164_v54 = vld [vmem:[#allocation2 + $0x5e0] ss:$16 sps:$4 sm:$0xff]  }
  0x3f   :  { %1683 = vmatpush2.bf16.msra.mxu0 %v3096_v61  ;;  %v3169_v53 = vld [vmem:[#allocation2 + $0x7e4] ss:$16 sps:$4 sm:$0xff]   ;;  %v3167_v55 = vld [vmem:[#allocation2 + $0x7e0] ss:$16 sps:$4 sm:$0xff]  }
  0x40   :  { %1724 = vmatpush2.bf16.msra.mxu1 %v3097_v0  ;;  %1684 = vmatprep.subr.bf16.mxu0 %v3098_v1  ;;  %v3172_v56 = vld [vmem:[#allocation2 + $0x5c4] ss:$16 sps:$4 sm:$0xff]   ;;  %v3170_v58 = vld [vmem:[#allocation2 + $0x5c0] ss:$16 sps:$4 sm:$0xff]  }
  0x41   :  { %1725 = vmatprep.subr.bf16.mxu1 %v3100_v2  ;;  %v3175_v57 = vld [vmem:[#allocation2 + $0x7c4] ss:$16 sps:$4 sm:$0xff]   ;;  %v3173_v59 = vld [vmem:[#allocation2 + $0x7c0] ss:$16 sps:$4 sm:$0xff]  }
  0x42   :  { %v3178_v60 = vld [vmem:[#allocation2 + $0x5a4] ss:$16 sps:$4 sm:$0xff]   ;;  %v3176_v0 = vld [vmem:[#allocation2 + $0x5a0] ss:$16 sps:$4 sm:$0xff]  }
  0x43   :  { %1685 = vmatpush2.bf16.msra.mxu0 %v3102_v4  ;;  %v3181_v61 = vld [vmem:[#allocation2 + $0x7a4] ss:$16 sps:$4 sm:$0xff]   ;;  %v3179_v1 = vld [vmem:[#allocation2 + $0x7a0] ss:$16 sps:$4 sm:$0xff]  }
  0x44   :  { %1726 = vmatpush2.bf16.msra.mxu1 %v3103_v5  ;;  %1686 = vmatprep.subr.bf16.mxu0 %v3104_v6  ;;  %v3184_v2 = vld [vmem:[#allocation2 + $0x584] ss:$16 sps:$4 sm:$0xff]   ;;  %v3182_v5 = vld [vmem:[#allocation2 + $0x580] ss:$16 sps:$4 sm:$0xff]  }
  0x45   :  { %1727 = vmatprep.subr.bf16.mxu1 %v3106_v7  ;;  %v3187_v4 = vld [vmem:[#allocation2 + $0x784] ss:$16 sps:$4 sm:$0xff]   ;;  %v3185_v6 = vld [vmem:[#allocation2 + $0x780] ss:$16 sps:$4 sm:$0xff]  }
  0x46   :  { %v3190_v7 = vld [vmem:[#allocation2 + $0x564] ss:$16 sps:$4 sm:$0xff]  }
  0x47   :  { %1687 = vmatpush2.bf16.msra.mxu0 %v3108_v8  ;;  %v3193_v8 = vld [vmem:[#allocation2 + $0x764] ss:$16 sps:$4 sm:$0xff]  }
  0x48   :  { %1728 = vmatpush2.bf16.msra.mxu1 %v3109_v9  ;;  %1688 = vmatprep.subr.bf16.mxu0 %v3110_v10  ;;  %v3188_v9 = vld [vmem:[#allocation2 + $0x560] ss:$16 sps:$4 sm:$0xff]   ;;  %v3199_v12 = vld [vmem:[#allocation2 + $0x744] ss:$16 sps:$4 sm:$0xff]  }
  0x49   :  { %1729 = vmatprep.subr.bf16.mxu1 %v3112_v11  ;;  %v3191_v10 = vld [vmem:[#allocation2 + $0x760] ss:$16 sps:$4 sm:$0xff]   ;;  %v3196_v11 = vld [vmem:[#allocation2 + $0x544] ss:$16 sps:$4 sm:$0xff]  }
  0x4b   :  { %1689 = vmatpush2.bf16.msra.mxu0 %v3114_v13  ;;  %v3194_v13 = vld [vmem:[#allocation2 + $0x540] ss:$16 sps:$4 sm:$0xff]  }
  0x4c   :  { %1730 = vmatpush2.bf16.msra.mxu1 %v3115_v15  ;;  %1740 = vmatprep.subr.bf16.mxu0 %v3118_v16  ;;  %v3197_v15 = vld [vmem:[#allocation2 + $0x740] ss:$16 sps:$4 sm:$0xff]   ;;  %v3202_v16 = vld [vmem:[#allocation2 + $0x524] ss:$16 sps:$4 sm:$0xff]  }
  0x4d   :  { %1781 = vmatprep.subr.bf16.mxu1 %v3121_v17  ;;  %v3205_v17 = vld [vmem:[#allocation2 + $0x724] ss:$16 sps:$4 sm:$0xff]  }
  0x4e   :  { %1691 = vmatmul.mubr.bf16.vlgmr.msra.gmra.mxu0 %v3602_v14 }
  0x4f   :  { %1732 = vmatmul.mubr.bf16.vlgmr.msra.gmra.mxu1 %v3608_v19  ;;  %1741 = vmatpush1.bf16.msra.mxu0 %v3116_v20  ;;  %v3200_v20 = vld [vmem:[#allocation2 + $0x520] ss:$16 sps:$4 sm:$0xff]  }
  0x50   :  { %1782 = vmatpush1.bf16.msra.mxu1 %v3119_v21  ;;  %1742 = vmatprep.subr.bf16.mxu0 %v3124_v22  ;;  %v3203_v21 = vld [vmem:[#allocation2 + $0x720] ss:$16 sps:$4 sm:$0xff]   ;;  %v3208_v22 = vld [vmem:[#allocation2 + $0x504] ss:$16 sps:$4 sm:$0xff]  }
  0x51   :  { %1783 = vmatprep.subr.bf16.mxu1 %v3127_v23  ;;  %1772 = vmatprep.mubr.bf16.mxu0 %v3604_v18  ;;  %v3211_v23 = vld [vmem:[#allocation2 + $0x704] ss:$16 sps:$4 sm:$0xff]  }
  0x52   :  { %1813 = vmatprep.mubr.bf16.mxu1 %v3612_v24 }
  0x53   :  { %1743 = vmatpush1.bf16.msra.mxu0 %v3122_v25  ;;  %v3206_v25 = vld [vmem:[#allocation2 + $0x500] ss:$16 sps:$4 sm:$0xff]  }
  0x54   :  { %1784 = vmatpush1.bf16.msra.mxu1 %v3125_v26  ;;  %1744 = vmatprep.subr.bf16.mxu0 %v3130_v27  ;;  %v3209_v26 = vld [vmem:[#allocation2 + $0x700] ss:$16 sps:$4 sm:$0xff]   ;;  %v3215_v27 = vld [vmem:[#allocation2 + $0xec] ss:$16 sps:$4 sm:$0xff]  }
  0x55   :  { %1785 = vmatprep.subr.bf16.mxu1 %v3133_v28  ;;  %v3218_v28 = vld [vmem:[#allocation2 + $0x2ec] ss:$16 sps:$4 sm:$0xff]  }
  0x57   :  { %1745 = vmatpush1.bf16.msra.mxu0 %v3128_v29  ;;  %v3620_v29 = vcombine.high %v3594_v63, %v3594_v63 }
  0x58   :  { %1786 = vmatpush1.bf16.msra.mxu1 %v3131_v30  ;;  %1746 = vmatprep.subr.bf16.mxu0 %v3136_v31  ;;  %v3213_v30 = vld [vmem:[#allocation2 + $0xe8] ss:$16 sps:$4 sm:$0xff]  }
  0x59   :  { %1787 = vmatprep.subr.bf16.mxu1 %v3139_v32  ;;  %v3216_v31 = vld [vmem:[#allocation2 + $0x2e8] ss:$16 sps:$4 sm:$0xff]   ;;  %v3221_v32 = vld [vmem:[#allocation2 + $0xcc] ss:$16 sps:$4 sm:$0xff]  }
  0x5b   :  { %1747 = vmatpush1.bf16.msra.mxu0 %v3134_v33  ;;  %v3224_v33 = vld [vmem:[#allocation2 + $0x2cc] ss:$16 sps:$4 sm:$0xff]  }
  0x5c   :  { %1788 = vmatpush1.bf16.msra.mxu1 %v3137_v34  ;;  %1748 = vmatprep.subr.bf16.mxu0 %v3142_v35  ;;  %v3219_v34 = vld [vmem:[#allocation2 + $0xc8] ss:$16 sps:$4 sm:$0xff]  }
  0x5d   :  { %1789 = vmatprep.subr.bf16.mxu1 %v3145_v36  ;;  %v3222_v35 = vld [vmem:[#allocation2 + $0x2c8] ss:$16 sps:$4 sm:$0xff]   ;;  %v3227_v36 = vld [vmem:[#allocation2 + $0xac] ss:$16 sps:$4 sm:$0xff]  }
  0x5f   :  { %1749 = vmatpush1.bf16.msra.mxu0 %v3140_v37  ;;  %v3230_v37 = vld [vmem:[#allocation2 + $0x2ac] ss:$16 sps:$4 sm:$0xff]  }
  0x60   :  { %1790 = vmatpush1.bf16.msra.mxu1 %v3143_v38  ;;  %1750 = vmatprep.subr.bf16.mxu0 %v3148_v39  ;;  %v3225_v38 = vld [vmem:[#allocation2 + $0xa8] ss:$16 sps:$4 sm:$0xff]  }
  0x61   :  { %1791 = vmatprep.subr.bf16.mxu1 %v3151_v40  ;;  %v3228_v39 = vld [vmem:[#allocation2 + $0x2a8] ss:$16 sps:$4 sm:$0xff]   ;;  %v3233_v40 = vld [vmem:[#allocation2 + $0x8c] ss:$16 sps:$4 sm:$0xff]  }
  0x63   :  { %1751 = vmatpush1.bf16.msra.mxu0 %v3146_v41  ;;  %v3236_v41 = vld [vmem:[#allocation2 + $0x28c] ss:$16 sps:$4 sm:$0xff]  }
  0x64   :  { %1792 = vmatpush1.bf16.msra.mxu1 %v3149_v43  ;;  %1752 = vmatprep.subr.bf16.mxu0 %v3154_v44  ;;  %v3231_v43 = vld [vmem:[#allocation2 + $0x88] ss:$16 sps:$4 sm:$0xff]  }
  0x65   :  { %1793 = vmatprep.subr.bf16.mxu1 %v3157_v45  ;;  %v3234_v44 = vld [vmem:[#allocation2 + $0x288] ss:$16 sps:$4 sm:$0xff]   ;;  %v3239_v45 = vld [vmem:[#allocation2 + $0x6c] ss:$16 sps:$4 sm:$0xff]  }
  0x67   :  { %1753 = vmatpush1.bf16.msra.mxu0 %v3152_v46  ;;  %v3242_v46 = vld [vmem:[#allocation2 + $0x26c] ss:$16 sps:$4 sm:$0xff]  }
  0x68   :  { %1794 = vmatpush1.bf16.msra.mxu1 %v3155_v47  ;;  %1754 = vmatprep.subr.bf16.mxu0 %v3160_v48  ;;  %v3237_v47 = vld [vmem:[#allocation2 + $0x68] ss:$16 sps:$4 sm:$0xff]   ;;  %v3248_v48 = vld [vmem:[#allocation2 + $0x24c] ss:$16 sps:$4 sm:$0xff]  }
  0x69   :  { %1795 = vmatprep.subr.bf16.mxu1 %v3163_v49  ;;  %v3243_v49 = vld [vmem:[#allocation2 + $0x48] ss:$16 sps:$4 sm:$0xff]  }
  0x6b   :  { %1755 = vmatpush1.bf16.msra.mxu0 %v3158_v50  ;;  %v3246_v50 = vld [vmem:[#allocation2 + $0x248] ss:$16 sps:$4 sm:$0xff]  }
  0x6c   :  { %1796 = vmatpush1.bf16.msra.mxu1 %v3161_v51  ;;  %1756 = vmatprep.subr.bf16.mxu0 %v3166_v52  ;;  %v3251_v51 = vld [vmem:[#allocation2 + $0x2c] ss:$16 sps:$4 sm:$0xff]  }
  0x6d   :  { %1797 = vmatprep.subr.bf16.mxu1 %v3169_v53  ;;  %v3254_v52 = vld [vmem:[#allocation2 + $0x22c] ss:$16 sps:$4 sm:$0xff]   ;;  %v3249_v53 = vld [vmem:[#allocation2 + $0x28] ss:$16 sps:$4 sm:$0xff]  }
  0x6f   :  { %1757 = vmatpush2.bf16.msra.mxu0 %v3164_v54  ;;  %v3252_v54 = vld [vmem:[#allocation2 + $0x228] ss:$16 sps:$4 sm:$0xff]  }
  0x70   :  { %1798 = vmatpush2.bf16.msra.mxu1 %v3167_v55  ;;  %1758 = vmatprep.subr.bf16.mxu0 %v3172_v56  ;;  %v3257_v55 = vld [vmem:[#allocation2 + $0xc] ss:$16 sps:$4 sm:$0xff]  }
  0x71   :  { %1799 = vmatprep.subr.bf16.mxu1 %v3175_v57  ;;  %v3260_v56 = vld [vmem:[#allocation2 + $0x20c] ss:$16 sps:$4 sm:$0xff]   ;;  %v3255_v57 = vld [vmem:[#allocation2 + $0x8] ss:$16 sps:$4 sm:$0xff]  }
  0x73   :  { %1759 = vmatpush2.bf16.msra.mxu0 %v3170_v58  ;;  %v3258_v58 = vld [vmem:[#allocation2 + $0x208] ss:$16 sps:$4 sm:$0xff]  }
  0x74   :  { %1800 = vmatpush2.bf16.msra.mxu1 %v3173_v59  ;;  %1760 = vmatprep.subr.bf16.mxu0 %v3178_v60  ;;  %v3263_v59 = vld [vmem:[#allocation2 + $0x1ec] ss:$16 sps:$4 sm:$0xff]  }
  0x75   :  { %1801 = vmatprep.subr.bf16.mxu1 %v3181_v61  ;;  %v3266_v60 = vld [vmem:[#allocation2 + $0x3ec] ss:$16 sps:$4 sm:$0xff]   ;;  %v3261_v61 = vld [vmem:[#allocation2 + $0x1e8] ss:$16 sps:$4 sm:$0xff]  }
  0x77   :  { %1761 = vmatpush2.bf16.msra.mxu0 %v3176_v0  ;;  %v3264_v0 = vld [vmem:[#allocation2 + $0x3e8] ss:$16 sps:$4 sm:$0xff]  }
  0x78   :  { %1802 = vmatpush2.bf16.msra.mxu1 %v3179_v1  ;;  %1762 = vmatprep.subr.bf16.mxu0 %v3184_v2  ;;  %v3269_v1 = vld [vmem:[#allocation2 + $0x1cc] ss:$16 sps:$4 sm:$0xff]  }
  0x79   :  { %1803 = vmatprep.subr.bf16.mxu1 %v3187_v4  ;;  %v3272_v2 = vld [vmem:[#allocation2 + $0x3cc] ss:$16 sps:$4 sm:$0xff]   ;;  %v3267_v4 = vld [vmem:[#allocation2 + $0x1c8] ss:$16 sps:$4 sm:$0xff]  }
  0x7b   :  { %1763 = vmatpush2.bf16.msra.mxu0 %v3182_v5  ;;  %v3270_v5 = vld [vmem:[#allocation2 + $0x3c8] ss:$16 sps:$4 sm:$0xff]  }
  0x7c   :  { %1804 = vmatpush2.bf16.msra.mxu1 %v3185_v6  ;;  %1764 = vmatprep.subr.bf16.mxu0 %v3190_v7  ;;  %v3275_v6 = vld [vmem:[#allocation2 + $0x1ac] ss:$16 sps:$4 sm:$0xff]  }
  0x7d   :  { %1805 = vmatprep.subr.bf16.mxu1 %v3193_v8  ;;  %v3278_v7 = vld [vmem:[#allocation2 + $0x3ac] ss:$16 sps:$4 sm:$0xff]   ;;  %v3273_v8 = vld [vmem:[#allocation2 + $0x1a8] ss:$16 sps:$4 sm:$0xff]  }
  0x7f   :  { %1765 = vmatpush2.bf16.msra.mxu0 %v3188_v9  ;;  %v3276_v9 = vld [vmem:[#allocation2 + $0x3a8] ss:$16 sps:$4 sm:$0xff]  }
  0x80   :  { %1806 = vmatpush2.bf16.msra.mxu1 %v3191_v10  ;;  %1766 = vmatprep.subr.bf16.mxu0 %v3196_v11  ;;  %v3281_v10 = vld [vmem:[#allocation2 + $0x18c] ss:$16 sps:$4 sm:$0xff]  }
  0x81   :  { %1807 = vmatprep.subr.bf16.mxu1 %v3199_v12  ;;  %v3284_v11 = vld [vmem:[#allocation2 + $0x38c] ss:$16 sps:$4 sm:$0xff]   ;;  %v3279_v12 = vld [vmem:[#allocation2 + $0x188] ss:$16 sps:$4 sm:$0xff]  }
  0x83   :  { %1767 = vmatpush2.bf16.msra.mxu0 %v3194_v13  ;;  %v3282_v13 = vld [vmem:[#allocation2 + $0x388] ss:$16 sps:$4 sm:$0xff]  }
  0x84   :  { %1808 = vmatpush2.bf16.msra.mxu1 %v3197_v15  ;;  %1768 = vmatprep.subr.bf16.mxu0 %v3202_v16  ;;  %v3287_v15 = vld [vmem:[#allocation2 + $0x16c] ss:$16 sps:$4 sm:$0xff]  }
  0x85   :  { %1809 = vmatprep.subr.bf16.mxu1 %v3205_v17  ;;  %v3290_v16 = vld [vmem:[#allocation2 + $0x36c] ss:$16 sps:$4 sm:$0xff]   ;;  %v3285_v17 = vld [vmem:[#allocation2 + $0x168] ss:$16 sps:$4 sm:$0xff]  }
  0x87   :  { %1769 = vmatpush2.bf16.msra.mxu0 %v3200_v20  ;;  %v3288_v20 = vld [vmem:[#allocation2 + $0x368] ss:$16 sps:$4 sm:$0xff]  }
  0x88   :  { %1810 = vmatpush2.bf16.msra.mxu1 %v3203_v21  ;;  %1770 = vmatprep.subr.bf16.mxu0 %v3208_v22  ;;  %v3293_v21 = vld [vmem:[#allocation2 + $0x14c] ss:$16 sps:$4 sm:$0xff]  }
  0x89   :  { %1811 = vmatprep.subr.bf16.mxu1 %v3211_v23  ;;  %v3296_v22 = vld [vmem:[#allocation2 + $0x34c] ss:$16 sps:$4 sm:$0xff]   ;;  %v3291_v23 = vld [vmem:[#allocation2 + $0x148] ss:$16 sps:$4 sm:$0xff]  }
  0x8b   :  { %1771 = vmatpush2.bf16.msra.mxu0 %v3206_v25  ;;  %v3294_v25 = vld [vmem:[#allocation2 + $0x348] ss:$16 sps:$4 sm:$0xff]  }
  0x8c   :  { %1812 = vmatpush2.bf16.msra.mxu1 %v3209_v26  ;;  %1822 = vmatprep.subr.bf16.mxu0 %v3215_v27  ;;  %v3299_v26 = vld [vmem:[#allocation2 + $0x12c] ss:$16 sps:$4 sm:$0xff]  }
  0x8d   :  { %1863 = vmatprep.subr.bf16.mxu1 %v3218_v28  ;;  %v3302_v27 = vld [vmem:[#allocation2 + $0x32c] ss:$16 sps:$4 sm:$0xff]   ;;  %v3297_v28 = vld [vmem:[#allocation2 + $0x128] ss:$16 sps:$4 sm:$0xff]  }
  0x8e   :  { %1773 = vmatmul.mubr.bf16.vlgmr.msra.gmra.mxu0 %v3594_v63 }
  0x8f   :  { %1814 = vmatmul.mubr.bf16.vlgmr.msra.gmra.mxu1 %v3620_v29  ;;  %1823 = vmatpush1.bf16.msra.mxu0 %v3213_v30  ;;  %v3300_v30 = vld [vmem:[#allocation2 + $0x328] ss:$16 sps:$4 sm:$0xff]  }
  0x90   :  { %1864 = vmatpush1.bf16.msra.mxu1 %v3216_v31  ;;  %1824 = vmatprep.subr.bf16.mxu0 %v3221_v32  ;;  %v3305_v31 = vld [vmem:[#allocation2 + $0x10c] ss:$16 sps:$4 sm:$0xff]  }
  0x91   :  { %1865 = vmatprep.subr.bf16.mxu1 %v3224_v33  ;;  %1854 = vmatprep.mubr.bf16.mxu0 %v3592_v62  ;;  %v3240_v62 = vld [vmem:[#allocation2 + $0x268] ss:$16 sps:$4 sm:$0xff]   ;;  %v3308_v32 = vld [vmem:[#allocation2 + $0x30c] ss:$16 sps:$4 sm:$0xff]  }
  0x92   :  { %1895 = vmatprep.mubr.bf16.mxu1 %v3598_v3  ;;  %v3245_v3 = vld [vmem:[#allocation2 + $0x4c] ss:$16 sps:$4 sm:$0xff]   ;;  %v3303_v33 = vld [vmem:[#allocation2 + $0x108] ss:$16 sps:$4 sm:$0xff]  }
  0x93   :  { %1825 = vmatpush1.bf16.msra.mxu0 %v3219_v34  ;;  %v3306_v34 = vld [vmem:[#allocation2 + $0x308] ss:$16 sps:$4 sm:$0xff]  }
  0x94   :  { %1866 = vmatpush1.bf16.msra.mxu1 %v3222_v35  ;;  %1826 = vmatprep.subr.bf16.mxu0 %v3227_v36  ;;  %v3311_v35 = vld [vmem:[#allocation2 + $0x4ec] ss:$16 sps:$4 sm:$0xff]  }
  0x95   :  { %1867 = vmatprep.subr.bf16.mxu1 %v3230_v37  ;;  %v3314_v36 = vld [vmem:[#allocation2 + $0x6ec] ss:$16 sps:$4 sm:$0xff]   ;;  %v3309_v37 = vld [vmem:[#allocation2 + $0x4e8] ss:$16 sps:$4 sm:$0xff]  }
  0x97   :  { %1827 = vmatpush1.bf16.msra.mxu0 %v3225_v38  ;;  %v3312_v38 = vld [vmem:[#allocation2 + $0x6e8] ss:$16 sps:$4 sm:$0xff]  }
  0x98   :  { %1868 = vmatpush1.bf16.msra.mxu1 %v3228_v39  ;;  %1828 = vmatprep.subr.bf16.mxu0 %v3233_v40  ;;  %v3317_v39 = vld [vmem:[#allocation2 + $0x4cc] ss:$16 sps:$4 sm:$0xff]  }
  0x99   :  { %1869 = vmatprep.subr.bf16.mxu1 %v3236_v41  ;;  %v3320_v40 = vld [vmem:[#allocation2 + $0x6cc] ss:$16 sps:$4 sm:$0xff]   ;;  %v3315_v41 = vld [vmem:[#allocation2 + $0x4c8] ss:$16 sps:$4 sm:$0xff]  }
  0x9b   :  { %1829 = vmatpush1.bf16.msra.mxu0 %v3231_v43  ;;  %v3318_v43 = vld [vmem:[#allocation2 + $0x6c8] ss:$16 sps:$4 sm:$0xff]  }
  0x9c   :  { %1870 = vmatpush1.bf16.msra.mxu1 %v3234_v44  ;;  %1830 = vmatprep.subr.bf16.mxu0 %v3239_v45  ;;  %v3323_v44 = vld [vmem:[#allocation2 + $0x4ac] ss:$16 sps:$4 sm:$0xff]  }
  0x9d   :  { %1871 = vmatprep.subr.bf16.mxu1 %v3242_v46  ;;  %v3326_v45 = vld [vmem:[#allocation2 + $0x6ac] ss:$16 sps:$4 sm:$0xff]   ;;  %v3321_v46 = vld [vmem:[#allocation2 + $0x4a8] ss:$16 sps:$4 sm:$0xff]  }
  0x9f   :  { %1831 = vmatpush1.bf16.msra.mxu0 %v3237_v47  ;;  %v3324_v47 = vld [vmem:[#allocation2 + $0x6a8] ss:$16 sps:$4 sm:$0xff]  }
  0xa0   :  { %1872 = vmatpush1.bf16.msra.mxu1 %v3240_v62  ;;  %1832 = vmatprep.subr.bf16.mxu0 %v3245_v3  ;;  %v3329_v62 = vld [vmem:[#allocation2 + $0x48c] ss:$16 sps:$4 sm:$0xff]   ;;  %v3327_v3 = vld [vmem:[#allocation2 + $0x488] ss:$16 sps:$4 sm:$0xff]  }
  0xa1   :  { %1873 = vmatprep.subr.bf16.mxu1 %v3248_v48  ;;  %v3335_v48 = vld [vmem:[#allocation2 + $0x46c] ss:$16 sps:$4 sm:$0xff]  }
  0xa3   :  { %1833 = vmatpush1.bf16.msra.mxu0 %v3243_v49  ;;  %v3338_v49 = vld [vmem:[#allocation2 + $0x66c] ss:$16 sps:$4 sm:$0xff]  }
  0xa4   :  { %1874 = vmatpush1.bf16.msra.mxu1 %v3246_v50  ;;  %1834 = vmatprep.subr.bf16.mxu0 %v3251_v51  ;;  %v3333_v50 = vld [vmem:[#allocation2 + $0x468] ss:$16 sps:$4 sm:$0xff]  }
  0xa5   :  { %1875 = vmatprep.subr.bf16.mxu1 %v3254_v52  ;;  %v3336_v51 = vld [vmem:[#allocation2 + $0x668] ss:$16 sps:$4 sm:$0xff]   ;;  %v3341_v52 = vld [vmem:[#allocation2 + $0x44c] ss:$16 sps:$4 sm:$0xff]  }
  0xa7   :  { %1835 = vmatpush1.bf16.msra.mxu0 %v3249_v53  ;;  %v3342_v53 = vld [vmem:[#allocation2 + $0x648] ss:$16 sps:$4 sm:$0xff]  }
  0xa8   :  { %1876 = vmatpush1.bf16.msra.mxu1 %v3252_v54  ;;  %1836 = vmatprep.subr.bf16.mxu0 %v3257_v55  ;;  %v3347_v54 = vld [vmem:[#allocation2 + $0x42c] ss:$16 sps:$4 sm:$0xff]  }
  0xa9   :  { %1877 = vmatprep.subr.bf16.mxu1 %v3260_v56  ;;  %v3350_v55 = vld [vmem:[#allocation2 + $0x62c] ss:$16 sps:$4 sm:$0xff]   ;;  %v3345_v56 = vld [vmem:[#allocation2 + $0x428] ss:$16 sps:$4 sm:$0xff]  }
  0xab   :  { %1837 = vmatpush1.bf16.msra.mxu0 %v3255_v57  ;;  %v3348_v57 = vld [vmem:[#allocation2 + $0x628] ss:$16 sps:$4 sm:$0xff]  }
  0xac   :  { %1878 = vmatpush1.bf16.msra.mxu1 %v3258_v58  ;;  %1838 = vmatprep.subr.bf16.mxu0 %v3263_v59  ;;  %v3353_v58 = vld [vmem:[#allocation2 + $0x40c] ss:$16 sps:$4 sm:$0xff]  }
  0xad   :  { %1879 = vmatprep.subr.bf16.mxu1 %v3266_v60  ;;  %v3356_v59 = vld [vmem:[#allocation2 + $0x60c] ss:$16 sps:$4 sm:$0xff]   ;;  %v3351_v60 = vld [vmem:[#allocation2 + $0x408] ss:$16 sps:$4 sm:$0xff]  }
  0xaf   :  { %1839 = vmatpush2.bf16.msra.mxu0 %v3261_v61  ;;  %v3354_v61 = vld [vmem:[#allocation2 + $0x608] ss:$16 sps:$4 sm:$0xff]  }
  0xb0   :  { %1880 = vmatpush2.bf16.msra.mxu1 %v3264_v0  ;;  %1840 = vmatprep.subr.bf16.mxu0 %v3269_v1  ;;  %v3359_v0 = vld [vmem:[#allocation2 + $0x5ec] ss:$16 sps:$4 sm:$0xff]  }
  0xb1   :  { %1881 = vmatprep.subr.bf16.mxu1 %v3272_v2  ;;  %v3362_v1 = vld [vmem:[#allocation2 + $0x7ec] ss:$16 sps:$4 sm:$0xff]   ;;  %v3357_v2 = vld [vmem:[#allocation2 + $0x5e8] ss:$16 sps:$4 sm:$0xff]  }
  0xb3   :  { %1841 = vmatpush2.bf16.msra.mxu0 %v3267_v4  ;;  %v3360_v4 = vld [vmem:[#allocation2 + $0x7e8] ss:$16 sps:$4 sm:$0xff]  }
  0xb4   :  { %1882 = vmatpush2.bf16.msra.mxu1 %v3270_v5  ;;  %1842 = vmatprep.subr.bf16.mxu0 %v3275_v6  ;;  %v3365_v5 = vld [vmem:[#allocation2 + $0x5cc] ss:$16 sps:$4 sm:$0xff]  }
  0xb5   :  { %1883 = vmatprep.subr.bf16.mxu1 %v3278_v7  ;;  %v3368_v6 = vld [vmem:[#allocation2 + $0x7cc] ss:$16 sps:$4 sm:$0xff]   ;;  %v3363_v7 = vld [vmem:[#allocation2 + $0x5c8] ss:$16 sps:$4 sm:$0xff]  }
  0xb7   :  { %1843 = vmatpush2.bf16.msra.mxu0 %v3273_v8  ;;  %v3366_v8 = vld [vmem:[#allocation2 + $0x7c8] ss:$16 sps:$4 sm:$0xff]  }
  0xb8   :  { %1884 = vmatpush2.bf16.msra.mxu1 %v3276_v9  ;;  %1844 = vmatprep.subr.bf16.mxu0 %v3281_v10  ;;  %v3371_v9 = vld [vmem:[#allocation2 + $0x5ac] ss:$16 sps:$4 sm:$0xff]  }
  0xb9   :  { %1885 = vmatprep.subr.bf16.mxu1 %v3284_v11  ;;  %v3374_v10 = vld [vmem:[#allocation2 + $0x7ac] ss:$16 sps:$4 sm:$0xff]   ;;  %v3369_v11 = vld [vmem:[#allocation2 + $0x5a8] ss:$16 sps:$4 sm:$0xff]  }
  0xbb   :  { %1845 = vmatpush2.bf16.msra.mxu0 %v3279_v12  ;;  %v3372_v12 = vld [vmem:[#allocation2 + $0x7a8] ss:$16 sps:$4 sm:$0xff]  }
  0xbc   :  { %1886 = vmatpush2.bf16.msra.mxu1 %v3282_v13  ;;  %1846 = vmatprep.subr.bf16.mxu0 %v3287_v15  ;;  %v3377_v13 = vld [vmem:[#allocation2 + $0x58c] ss:$16 sps:$4 sm:$0xff]  }
  0xbd   :  { %1887 = vmatprep.subr.bf16.mxu1 %v3290_v16  ;;  %v3380_v15 = vld [vmem:[#allocation2 + $0x78c] ss:$16 sps:$4 sm:$0xff]   ;;  %v3375_v16 = vld [vmem:[#allocation2 + $0x588] ss:$16 sps:$4 sm:$0xff]  }
  0xbf   :  { %1847 = vmatpush2.bf16.msra.mxu0 %v3285_v17  ;;  %v3378_v17 = vld [vmem:[#allocation2 + $0x788] ss:$16 sps:$4 sm:$0xff]  }
  0xc0   :  { %1888 = vmatpush2.bf16.msra.mxu1 %v3288_v20  ;;  %1848 = vmatprep.subr.bf16.mxu0 %v3293_v21  ;;  %v3383_v20 = vld [vmem:[#allocation2 + $0x56c] ss:$16 sps:$4 sm:$0xff]  }
  0xc1   :  { %1889 = vmatprep.subr.bf16.mxu1 %v3296_v22  ;;  %v3386_v21 = vld [vmem:[#allocation2 + $0x76c] ss:$16 sps:$4 sm:$0xff]   ;;  %v3381_v22 = vld [vmem:[#allocation2 + $0x568] ss:$16 sps:$4 sm:$0xff]  }
  0xc3   :  { %1849 = vmatpush2.bf16.msra.mxu0 %v3291_v23  ;;  %v3384_v23 = vld [vmem:[#allocation2 + $0x768] ss:$16 sps:$4 sm:$0xff]  }
  0xc4   :  { %1890 = vmatpush2.bf16.msra.mxu1 %v3294_v25  ;;  %1850 = vmatprep.subr.bf16.mxu0 %v3299_v26  ;;  %v3389_v25 = vld [vmem:[#allocation2 + $0x54c] ss:$16 sps:$4 sm:$0xff]  }
  0xc5   :  { %1891 = vmatprep.subr.bf16.mxu1 %v3302_v27  ;;  %v3392_v26 = vld [vmem:[#allocation2 + $0x74c] ss:$16 sps:$4 sm:$0xff]   ;;  %v3387_v27 = vld [vmem:[#allocation2 + $0x548] ss:$16 sps:$4 sm:$0xff]  }
  0xc7   :  { %1851 = vmatpush2.bf16.msra.mxu0 %v3297_v28  ;;  %v3390_v28 = vld [vmem:[#allocation2 + $0x748] ss:$16 sps:$4 sm:$0xff]  }
  0xc8   :  { %1892 = vmatpush2.bf16.msra.mxu1 %v3300_v30  ;;  %1852 = vmatprep.subr.bf16.mxu0 %v3305_v31  ;;  %v3395_v30 = vld [vmem:[#allocation2 + $0x52c] ss:$16 sps:$4 sm:$0xff]  }
  0xc9   :  { %1893 = vmatprep.subr.bf16.mxu1 %v3308_v32  ;;  %v3398_v31 = vld [vmem:[#allocation2 + $0x72c] ss:$16 sps:$4 sm:$0xff]   ;;  %v3393_v32 = vld [vmem:[#allocation2 + $0x528] ss:$16 sps:$4 sm:$0xff]  }
  0xcb   :  { %1853 = vmatpush2.bf16.msra.mxu0 %v3303_v33  ;;  %v3396_v33 = vld [vmem:[#allocation2 + $0x728] ss:$16 sps:$4 sm:$0xff]  }
  0xcc   :  { %1894 = vmatpush2.bf16.msra.mxu1 %v3306_v34  ;;  %1904 = vmatprep.subr.bf16.mxu0 %v3311_v35  ;;  %v3401_v34 = vld [vmem:[#allocation2 + $0x50c] ss:$16 sps:$4 sm:$0xff]  }
  0xcd   :  { %1945 = vmatprep.subr.bf16.mxu1 %v3314_v36  ;;  %v3404_v35 = vld [vmem:[#allocation2 + $0x70c] ss:$16 sps:$4 sm:$0xff]   ;;  %v3399_v36 = vld [vmem:[#allocation2 + $0x508] ss:$16 sps:$4 sm:$0xff]  }
  0xce   :  { %1855 = vmatmul.mubr.bf16.vlgmr.msra.gmra.mxu0 %v3602_v14  ;;  %v3332_v14 = vld [vmem:[#allocation2 + $0x68c] ss:$16 sps:$4 sm:$0xff]  }
  0xcf   :  { %1896 = vmatmul.mubr.bf16.vlgmr.msra.gmra.mxu1 %v3608_v19  ;;  %1905 = vmatpush1.bf16.msra.mxu0 %v3309_v37  ;;  %v3330_v19 = vld [vmem:[#allocation2 + $0x688] ss:$16 sps:$4 sm:$0xff]  }
  0xd0   :  { %1946 = vmatpush1.bf16.msra.mxu1 %v3312_v38  ;;  %1906 = vmatprep.subr.bf16.mxu0 %v3317_v39  ;;  %v3402_v37 = vld [vmem:[#allocation2 + $0x708] ss:$16 sps:$4 sm:$0xff]   ;;  %v3407_v38 = vld [vmem:[%s3917_s3 + $0x74] ss:$8 sps:$4 sm:$0xff]  }
  0xd1   :  { %1947 = vmatprep.subr.bf16.mxu1 %v3320_v40  ;;  %1936 = vmatprep.mubr.bf16.mxu0 %v3604_v18  ;;  %v3344_v18 = vld [vmem:[#allocation2 + $0x64c] ss:$16 sps:$4 sm:$0xff]   ;;  %v3405_v39 = vld [vmem:[%s3917_s3 + $0x70] ss:$8 sps:$4 sm:$0xff]  }
  0xd2   :  { %1977 = vmatprep.mubr.bf16.mxu1 %v3612_v24  ;;  %v3339_v24 = vld [vmem:[#allocation2 + $0x448] ss:$16 sps:$4 sm:$0xff]   ;;  %v3410_v40 = vld [vmem:[%s3917_s3 + $0x64] ss:$8 sps:$4 sm:$0xff]  }
  0xd3   :  { %1907 = vmatpush1.bf16.msra.mxu0 %v3315_v41 }
  0xd4   :  { %1948 = vmatpush1.bf16.msra.mxu1 %v3318_v43  ;;  %1908 = vmatprep.subr.bf16.mxu0 %v3323_v44  ;;  %v3408_v44 = vld [vmem:[%s3917_s3 + $0x60] ss:$8 sps:$4 sm:$0xff]  }
  0xd5   :  { %1949 = vmatprep.subr.bf16.mxu1 %v3326_v45 }
  0xd7   :  { %1909 = vmatpush1.bf16.msra.mxu0 %v3321_v46 }
  0xd8   :  { %1950 = vmatpush1.bf16.msra.mxu1 %v3324_v47  ;;  %1910 = vmatprep.subr.bf16.mxu0 %v3329_v62  ;;  %v3413_v47 = vld [vmem:[%s3917_s3 + $0x54] ss:$8 sps:$4 sm:$0xff]  }
  0xd9   :  { %1951 = vmatprep.subr.bf16.mxu1 %v3332_v14 }
  0xdb   :  { %1911 = vmatpush1.bf16.msra.mxu0 %v3327_v3 }
  0xdc   :  { %1952 = vmatpush1.bf16.msra.mxu1 %v3330_v19  ;;  %1912 = vmatprep.subr.bf16.mxu0 %v3335_v48  ;;  %v3416_v19 = vld [vmem:[%s3917_s3 + $0x44] ss:$8 sps:$4 sm:$0xff]   ;;  %v3453_v48 = vld [vmem:[%s3917_s3 + $0x170] ss:$8 sps:$4 sm:$0xff]  }
  0xdd   :  { %1953 = vmatprep.subr.bf16.mxu1 %v3338_v49  ;;  %v3455_v49 = vld [vmem:[%s3917_s3 + $0x174] ss:$8 sps:$4 sm:$0xff]  }
  0xdf   :  { %1913 = vmatpush1.bf16.msra.mxu0 %v3333_v50  ;;  %v3458_v50 = vld [vmem:[%s3917_s3 + $0x164] ss:$8 sps:$4 sm:$0xff]  }
  0xe0   :  { %1954 = vmatpush1.bf16.msra.mxu1 %v3336_v51  ;;  %1914 = vmatprep.subr.bf16.mxu0 %v3341_v52  ;;  %v3414_v51 = vld [vmem:[%s3917_s3 + $0x40] ss:$8 sps:$4 sm:$0xff]  }
  0xe1   :  { %1955 = vmatprep.subr.bf16.mxu1 %v3344_v18  ;;  %v3456_v52 = vld [vmem:[%s3917_s3 + $0x160] ss:$8 sps:$4 sm:$0xff]   ;;  %v3419_v18 = vld [vmem:[%s3917_s3 + $0x34] ss:$8 sps:$4 sm:$0xff]  }
  0xe3   :  { %1915 = vmatpush1.bf16.msra.mxu0 %v3339_v24  ;;  %v3461_v24 = vld [vmem:[%s3917_s3 + $0x154] ss:$8 sps:$4 sm:$0xff]  }
  0xe4   :  { %1956 = vmatpush1.bf16.msra.mxu1 %v3342_v53  ;;  %1916 = vmatprep.subr.bf16.mxu0 %v3347_v54  ;;  %v3417_v53 = vld [vmem:[%s3917_s3 + $0x30] ss:$8 sps:$4 sm:$0xff]  }
  0xe5   :  { %1957 = vmatprep.subr.bf16.mxu1 %v3350_v55  ;;  %v3459_v54 = vld [vmem:[%s3917_s3 + $0x150] ss:$8 sps:$4 sm:$0xff]   ;;  %v3422_v55 = vld [vmem:[%s3917_s3 + $0x24] ss:$8 sps:$4 sm:$0xff]  }
  0xe7   :  { %1917 = vmatpush1.bf16.msra.mxu0 %v3345_v56  ;;  %v3464_v56 = vld [vmem:[%s3917_s3 + $0x144] ss:$8 sps:$4 sm:$0xff]  }
  0xe8   :  { %1958 = vmatpush1.bf16.msra.mxu1 %v3348_v57  ;;  %1918 = vmatprep.subr.bf16.mxu0 %v3353_v58  ;;  %v3420_v57 = vld [vmem:[%s3917_s3 + $0x20] ss:$8 sps:$4 sm:$0xff]  }
  0xe9   :  { %1959 = vmatprep.subr.bf16.mxu1 %v3356_v59  ;;  %v3462_v58 = vld [vmem:[%s3917_s3 + $0x140] ss:$8 sps:$4 sm:$0xff]   ;;  %v3425_v59 = vld [vmem:[%s3917_s3 + $0x14] ss:$8 sps:$4 sm:$0xff]  }
  0xeb   :  { %1919 = vmatpush1.bf16.msra.mxu0 %v3351_v60  ;;  %v3467_v60 = vld [vmem:[%s3917_s3 + $0x134] ss:$8 sps:$4 sm:$0xff]  }
  0xec   :  { %1960 = vmatpush1.bf16.msra.mxu1 %v3354_v61  ;;  %1920 = vmatprep.subr.bf16.mxu0 %v3359_v0  ;;  %v3423_v61 = vld [vmem:[%s3917_s3 + $0x10] ss:$8 sps:$4 sm:$0xff]  }
  0xed   :  { %1961 = vmatprep.subr.bf16.mxu1 %v3362_v1  ;;  %v3465_v0 = vld [vmem:[%s3917_s3 + $0x130] ss:$8 sps:$4 sm:$0xff]   ;;  %v3428_v1 = vld [vmem:[%s3917_s3 + $0x4] ss:$8 sps:$4 sm:$0xff]  }
  0xef   :  { %1921 = vmatpush2.bf16.msra.mxu0 %v3357_v2  ;;  %v3470_v2 = vld [vmem:[%s3917_s3 + $0x124] ss:$8 sps:$4 sm:$0xff]  }
  0xf0   :  { %1962 = vmatpush2.bf16.msra.mxu1 %v3360_v4  ;;  %1922 = vmatprep.subr.bf16.mxu0 %v3365_v5  ;;  %v3426_v4 = vld [vmem:[%s3917_s3] ss:$8 sps:$4 sm:$0xff]  }
  0xf1   :  { %1963 = vmatprep.subr.bf16.mxu1 %v3368_v6  ;;  %v3468_v5 = vld [vmem:[%s3917_s3 + $0x120] ss:$8 sps:$4 sm:$0xff]   ;;  %v3431_v6 = vld [vmem:[%s3917_s3 + $0xf4] ss:$8 sps:$4 sm:$0xff]  }
  0xf3   :  { %1923 = vmatpush2.bf16.msra.mxu0 %v3363_v7  ;;  %v3473_v7 = vld [vmem:[%s3917_s3 + $0x114] ss:$8 sps:$4 sm:$0xff]  }
  0xf4   :  { %1964 = vmatpush2.bf16.msra.mxu1 %v3366_v8  ;;  %1924 = vmatprep.subr.bf16.mxu0 %v3371_v9  ;;  %v3429_v8 = vld [vmem:[%s3917_s3 + $0xf0] ss:$8 sps:$4 sm:$0xff]  }
  0xf5   :  { %1965 = vmatprep.subr.bf16.mxu1 %v3374_v10  ;;  %v3471_v9 = vld [vmem:[%s3917_s3 + $0x110] ss:$8 sps:$4 sm:$0xff]   ;;  %v3434_v10 = vld [vmem:[%s3917_s3 + $0xe4] ss:$8 sps:$4 sm:$0xff]  }
  0xf7   :  { %1925 = vmatpush2.bf16.msra.mxu0 %v3369_v11  ;;  %v3476_v11 = vld [vmem:[%s3917_s3 + $0x104] ss:$8 sps:$4 sm:$0xff]  }
  0xf8   :  { %1966 = vmatpush2.bf16.msra.mxu1 %v3372_v12  ;;  %1926 = vmatprep.subr.bf16.mxu0 %v3377_v13  ;;  %v3432_v12 = vld [vmem:[%s3917_s3 + $0xe0] ss:$8 sps:$4 sm:$0xff]  }
  0xf9   :  { %1967 = vmatprep.subr.bf16.mxu1 %v3380_v15  ;;  %v3474_v13 = vld [vmem:[%s3917_s3 + $0x100] ss:$8 sps:$4 sm:$0xff]   ;;  %v3437_v15 = vld [vmem:[%s3917_s3 + $0xd4] ss:$8 sps:$4 sm:$0xff]  }
  0xfb   :  { %1927 = vmatpush2.bf16.msra.mxu0 %v3375_v16  ;;  %v3479_v16 = vld [vmem:[%s3917_s3 + $0x1f4] ss:$8 sps:$4 sm:$0xff]  }
  0xfc   :  { %1968 = vmatpush2.bf16.msra.mxu1 %v3378_v17  ;;  %1928 = vmatprep.subr.bf16.mxu0 %v3383_v20  ;;  %v3435_v17 = vld [vmem:[%s3917_s3 + $0xd0] ss:$8 sps:$4 sm:$0xff]  }
  0xfd   :  { %1969 = vmatprep.subr.bf16.mxu1 %v3386_v21  ;;  %v3477_v20 = vld [vmem:[%s3917_s3 + $0x1f0] ss:$8 sps:$4 sm:$0xff]   ;;  %v3440_v21 = vld [vmem:[%s3917_s3 + $0xc4] ss:$8 sps:$4 sm:$0xff]  }
  0xff   :  { %1929 = vmatpush2.bf16.msra.mxu0 %v3381_v22  ;;  %v3482_v22 = vld [vmem:[%s3917_s3 + $0x1e4] ss:$8 sps:$4 sm:$0xff]  }
 0x100   :  { %1970 = vmatpush2.bf16.msra.mxu1 %v3384_v23  ;;  %1930 = vmatprep.subr.bf16.mxu0 %v3389_v25  ;;  %v3438_v23 = vld [vmem:[%s3917_s3 + $0xc0] ss:$8 sps:$4 sm:$0xff]  }
 0x101   :  { %1971 = vmatprep.subr.bf16.mxu1 %v3392_v26  ;;  %v3480_v25 = vld [vmem:[%s3917_s3 + $0x1e0] ss:$8 sps:$4 sm:$0xff]   ;;  %v3443_v26 = vld [vmem:[%s3917_s3 + $0xb4] ss:$8 sps:$4 sm:$0xff]  }
 0x103   :  { %1931 = vmatpush2.bf16.msra.mxu0 %v3387_v27  ;;  %v3485_v27 = vld [vmem:[%s3917_s3 + $0x1d4] ss:$8 sps:$4 sm:$0xff]  }
 0x104   :  { %1972 = vmatpush2.bf16.msra.mxu1 %v3390_v28  ;;  %1932 = vmatprep.subr.bf16.mxu0 %v3395_v30  ;;  %v3441_v28 = vld [vmem:[%s3917_s3 + $0xb0] ss:$8 sps:$4 sm:$0xff]  }
 0x105   :  { %1973 = vmatprep.subr.bf16.mxu1 %v3398_v31  ;;  %v3483_v30 = vld [vmem:[%s3917_s3 + $0x1d0] ss:$8 sps:$4 sm:$0xff]   ;;  %v3446_v31 = vld [vmem:[%s3917_s3 + $0xa4] ss:$8 sps:$4 sm:$0xff]  }
 0x107   :  { %1933 = vmatpush2.bf16.msra.mxu0 %v3393_v32  ;;  %v3488_v32 = vld [vmem:[%s3917_s3 + $0x1c4] ss:$8 sps:$4 sm:$0xff]  }
 0x108   :  { %1974 = vmatpush2.bf16.msra.mxu1 %v3396_v33  ;;  %1934 = vmatprep.subr.bf16.mxu0 %v3401_v34  ;;  %v3444_v33 = vld [vmem:[%s3917_s3 + $0xa0] ss:$8 sps:$4 sm:$0xff]  }
 0x109   :  { %1975 = vmatprep.subr.bf16.mxu1 %v3404_v35  ;;  %v3486_v34 = vld [vmem:[%s3917_s3 + $0x1c0] ss:$8 sps:$4 sm:$0xff]   ;;  %v3449_v35 = vld [vmem:[%s3917_s3 + $0x94] ss:$8 sps:$4 sm:$0xff]  }
 0x10b   :  { %1935 = vmatpush2.bf16.msra.mxu0 %v3399_v36  ;;  %v3491_v36 = vld [vmem:[%s3917_s3 + $0x1b4] ss:$8 sps:$4 sm:$0xff]  }
 0x10c   :  { %1976 = vmatpush2.bf16.msra.mxu1 %v3402_v37  ;;  %2390 = vmatprep.subr.bf16.mxu0 %v3407_v38  ;;  %v302_v37 = vsub.s32 0, %v3586_v42  ;;  %v3806_v38 = vld [vmem:[%s3916_s2] sm:$0xf] }
 0x10d   :  { %2431 = vmatprep.subr.bf16.mxu1 %v3455_v49  ;;  %v3492_v49 = vld [vmem:[%s3917_s3 + $0x1a0] ss:$8 sps:$4 sm:$0xff]  }
 0x10e   :  { %v3639_v41 = vpop.f32.mrf.mxu0  ;;  %1937 = vmatmul.mubr.bf16.vlgmr.msra.gmra.mxu0 %v3594_v63  ;;  %v3411_v63 = vld [vmem:[%s3917_s3 + $0x50] ss:$8 sps:$4 sm:$0xff]  }
 0x10f   :  { %v3641_v43 = vpop.f32.mrf.mxu1  ;;  %1978 = vmatmul.mubr.bf16.vlgmr.msra.gmra.mxu1 %v3620_v29  ;;  %2391 = vmatpush1.bf16.msra.mxu0 %v3405_v39  ;;  %v306_v39 = vsub.s32 1, %v3586_v42 }
 0x110   :  { %v3648_v45 = vpop.f32.mrf.mxu0  ;;  %2392 = vmatprep.subr.bf16.mxu0 %v3410_v40  ;;  %2432 = vmatpush1.bf16.msra.mxu1 %v3453_v48  ;;  %v3447_v40 = vld [vmem:[%s3917_s3 + $0x90] ss:$8 sps:$4 sm:$0xff]  }
 0x111   :  { %v3650_v46 = vpop.f32.mrf.mxu1  ;;  %2433 = vmatprep.subr.bf16.mxu1 %v3458_v50 }
 0x112   :  { %v1696_v62 = vpop.f32.mrf.mxu0 }
 0x113   :  { %v1737_v14 = vpop.f32.mrf.mxu1  ;;  %2393 = vmatpush1.bf16.msra.mxu0 %v3408_v44  ;;  %v3489_v44 = vld [vmem:[%s3917_s3 + $0x1b0] ss:$8 sps:$4 sm:$0xff]   ;;  %v303_v62 = vrot.slane %v3806_v38, %v302_v37 }
 0x114   :  { %v1697_v29 = vpop.f32.mrf.mxu0  ;;  %2394 = vmatprep.subr.bf16.mxu0 %v3413_v47  ;;  %2434 = vmatpush1.bf16.msra.mxu1 %v3456_v52  ;;  %v3452_v47 = vld [vmem:[%s3917_s3 + $0x84] ss:$8 sps:$4 sm:$0xff]   ;;  %v307_v14 = vrot.slane %v3806_v38, %v306_v39 }
 0x115   :  { %v1738_v3 = vpop.f32.mrf.mxu1  ;;  %2435 = vmatprep.subr.bf16.mxu1 %v3461_v24  ;;  %v1693_v29 = vadd.f32 %v3639_v41, %v303_v62  ;;  %v3497_v24 = vld [vmem:[%s3917_s3 + $0x194] ss:$8 sps:$4 sm:$0xff]  }
 0x116   :  { %v1695_v3 = vadd.f32 %v3648_v45, %v307_v14 }
 0x117   :  { %2395 = vmatpush1.bf16.msra.mxu0 %v3411_v63  ;;  %v3450_v63 = vld [vmem:[%s3917_s3 + $0x80] ss:$8 sps:$4 sm:$0xff]   ;;  %v1734_v48 = vadd.f32 %v3641_v43, %v1693_v29  ;;  %v3495_v43 = vld [vmem:[%s3917_s3 + $0x190] ss:$8 sps:$4 sm:$0xff]  }
 0x118   :  { %2396 = vmatprep.subr.bf16.mxu0 %v3416_v19  ;;  %2436 = vmatpush1.bf16.msra.mxu1 %v3459_v54  ;;  %v3494_v19 = vld [vmem:[%s3917_s3 + $0x1a4] ss:$8 sps:$4 sm:$0xff]   ;;  %v1736_v52 = vadd.f32 %v3650_v46, %v1695_v3 }
 0x119   :  { %2437 = vmatprep.subr.bf16.mxu1 %v3464_v56 }
 0x11b   :  { %2397 = vmatpush1.bf16.msra.mxu0 %v3414_v51 }
 0x11c   :  { %2398 = vmatprep.subr.bf16.mxu0 %v3419_v18  ;;  %2438 = vmatpush1.bf16.msra.mxu1 %v3462_v58 }
 0x11d   :  { %2439 = vmatprep.subr.bf16.mxu1 %v3467_v60  ;;  %v3500_v60 = vld [vmem:[%s3917_s3 + $0x184] ss:$8 sps:$4 sm:$0xff]  }
 0x11f   :  { %2399 = vmatpush1.bf16.msra.mxu0 %v3417_v53 }
 0x120   :  { %2400 = vmatprep.subr.bf16.mxu0 %v3422_v55  ;;  %2440 = vmatpush1.bf16.msra.mxu1 %v3465_v0  ;;  %v3498_v0 = vld [vmem:[%s3917_s3 + $0x180] ss:$8 sps:$4 sm:$0xff]  }
 0x121   :  { %2441 = vmatprep.subr.bf16.mxu1 %v3470_v2 }
 0x123   :  { %2401 = vmatpush1.bf16.msra.mxu0 %v3420_v57 }
 0x124   :  { %2402 = vmatprep.subr.bf16.mxu0 %v3425_v59  ;;  %2442 = vmatpush1.bf16.msra.mxu1 %v3468_v5 }
 0x125   :  { %2443 = vmatprep.subr.bf16.mxu1 %v3473_v7 }
 0x127   :  { %2403 = vmatpush1.bf16.msra.mxu0 %v3423_v61 }
 0x128   :  { %2404 = vmatprep.subr.bf16.mxu0 %v3428_v1  ;;  %2444 = vmatpush1.bf16.msra.mxu1 %v3471_v9 }
 0x129   :  { %2445 = vmatprep.subr.bf16.mxu1 %v3476_v11 }
 0x12b   :  { %2405 = vmatpush1.bf16.msra.mxu0 %v3426_v4 }
 0x12c   :  { %2406 = vmatprep.subr.bf16.mxu0 %v3431_v6  ;;  %2446 = vmatpush1.bf16.msra.mxu1 %v3474_v13  ;;  %v3502_v13 = vld [vmem:[%s3919_s5 + $0x38] sm:$0xff]  }
 0x12d   :  { %2447 = vmatprep.subr.bf16.mxu1 %v3479_v16  ;;  %v3504_v16 = vld [vmem:[%s3919_s5 + $0x30] sm:$0xff]  }
 0x12f   :  { %2407 = vmatpush2.bf16.msra.mxu0 %v3429_v8 }
 0x130   :  { %2408 = vmatprep.subr.bf16.mxu0 %v3434_v10  ;;  %2448 = vmatpush2.bf16.msra.mxu1 %v3477_v20  ;;  %v3506_v20 = vld [vmem:[%s3919_s5 + $0x28] sm:$0xff]  }
 0x131   :  { %2449 = vmatprep.subr.bf16.mxu1 %v3482_v22  ;;  %v3508_v22 = vld [vmem:[%s3919_s5 + $0x20] sm:$0xff]  }
 0x133   :  { %2409 = vmatpush2.bf16.msra.mxu0 %v3432_v12  ;;  %v3501_v12 = vld [vmem:[%s3919_s5 + $0x78] sm:$0xff]  }
 0x134   :  { %2410 = vmatprep.subr.bf16.mxu0 %v3437_v15  ;;  %2450 = vmatpush2.bf16.msra.mxu1 %v3480_v25  ;;  %v3503_v15 = vld [vmem:[%s3919_s5 + $0x70] sm:$0xff]   ;;  %v3510_v25 = vld [vmem:[%s3919_s5 + $0x18] sm:$0xff]  }
 0x135   :  { %2451 = vmatprep.subr.bf16.mxu1 %v3485_v27  ;;  %v3512_v27 = vld [vmem:[%s3919_s5 + $0x10] sm:$0xff]  }
 0x137   :  { %2411 = vmatpush2.bf16.msra.mxu0 %v3435_v17  ;;  %v3505_v17 = vld [vmem:[%s3919_s5 + $0x68] sm:$0xff]  }
 0x138   :  { %2412 = vmatprep.subr.bf16.mxu0 %v3440_v21  ;;  %2452 = vmatpush2.bf16.msra.mxu1 %v3483_v30  ;;  %v3507_v21 = vld [vmem:[%s3919_s5 + $0x60] sm:$0xff]   ;;  %v314_v30 = vsub.s32 3, %v3586_v42 }
 0x139   :  { %2453 = vmatprep.subr.bf16.mxu1 %v3488_v32 }
 0x13a   :  { %v315_v32 = vrot.slane %v3806_v38, %v314_v30 }
 0x13b   :  { %2413 = vmatpush2.bf16.msra.mxu0 %v3438_v23  ;;  %v3509_v23 = vld [vmem:[%s3919_s5 + $0x58] sm:$0xff]  }
 0x13c   :  { %2414 = vmatprep.subr.bf16.mxu0 %v3443_v26  ;;  %2454 = vmatpush2.bf16.msra.mxu1 %v3486_v34  ;;  %v3511_v26 = vld [vmem:[%s3919_s5 + $0x50] sm:$0xff]  }
 0x13d   :  { %2455 = vmatprep.subr.bf16.mxu1 %v3491_v36 }
 0x13f   :  { %2415 = vmatpush2.bf16.msra.mxu0 %v3441_v28  ;;  %v310_v28 = vsub.s32 2, %v3586_v42  ;;  %v2977_v42 = vld [vmem:[%s3920_s6] ss:$0 sm:$0xff] }
 0x140   :  { %2416 = vmatprep.subr.bf16.mxu0 %v3446_v31  ;;  %2456 = vmatpush2.bf16.msra.mxu1 %v3489_v44 }
 0x141   :  { %2457 = vmatprep.subr.bf16.mxu1 %v3494_v19  ;;  %v311_v31 = vrot.slane %v3806_v38, %v310_v28 }
 0x143   :  { %2417 = vmatpush2.bf16.msra.mxu0 %v3444_v33 }
 0x144   :  { %2418 = vmatprep.subr.bf16.mxu0 %v3449_v35  ;;  %2458 = vmatpush2.bf16.msra.mxu1 %v3492_v49 }
 0x145   :  { %2459 = vmatprep.subr.bf16.mxu1 %v3497_v24  ;;  %v3514_v24 = vld [vmem:[%s3919_s5 + $0x8] sm:$0xff]  }
 0x147   :  { %2419 = vmatpush2.bf16.msra.mxu0 %v3447_v40 }
 0x148   :  { %2420 = vmatprep.subr.bf16.mxu0 %v3452_v47  ;;  %2460 = vmatpush2.bf16.msra.mxu1 %v3495_v43  ;;  %v3515_v43 = vld [vmem:[%s3919_s5 + $0x40] sm:$0xff]  }
 0x149   :  { %2461 = vmatprep.subr.bf16.mxu1 %v3500_v60 }
 0x14b   :  { %2421 = vmatpush2.bf16.msra.mxu0 %v3450_v63 }
 0x14c   :  { %2462 = vmatpush2.bf16.msra.mxu1 %v3498_v0  ;;  %2994 = vmatprep.subr.bf16.mxu0 %v3501_v12 }
 0x14e   :  { %v1774_v50 = vpop.f32.mrf.mxu0 }
 0x14f   :  { %v1815_v51 = vpop.f32.mrf.mxu1  ;;  %v1775_v18 = vadd.f32 %v1774_v50, %v1734_v48 }
 0x150   :  { %v1776_v41 = vpop.f32.mrf.mxu0 }
 0x151   :  { %v1817_v45 = vpop.f32.mrf.mxu1  ;;  %v1816_v53 = vadd.f32 %v1815_v51, %v1775_v18  ;;  %v1777_v54 = vadd.f32 %v1776_v41, %v1736_v52 }
 0x152   :  { %v1778_v55 = vpop.f32.mrf.mxu0 }
 0x153   :  { %v1819_v56 = vpop.f32.mrf.mxu1  ;;  %v1818_v57 = vadd.f32 %v1817_v45, %v1777_v54  ;;  %v1986_v46 = vmax.f32 %v1816_v53, 0.0  ;;  %v3513_v45 = vld [vmem:[%s3919_s5 + $0x48] sm:$0xff]   ;;  %v3516_v55 = vld [vmem:[%s3919_s5] sm:$0xff]  }
 0x154   :  { %v1779_v58 = vpop.f32.mrf.mxu0 }
 0x155   :  { %v1820_v59 = vpop.f32.mrf.mxu1  ;;  %v1987_v61 = vmax.f32 %v1818_v57, 0.0  ;;  %v1990_v2 = vpack.c.bf16 %v1986_v46, %v1986_v46  ;;  %v2058_v57 = vld [vmem:[%s3918_s4] sm:$0x3] }
 0x156   :  { %v2063_v46 = vrot.slane %v2058_v57, %v302_v37  ;;  %v2067_v58 = vrot.slane %v2058_v57, %v306_v39 }
 0x157   :  { %v1991_v1 = vpack.c.bf16 %v1987_v61, %v1987_v61 }
 0x159   :  { %2422 = vmatprep.mubr.bf16.mxu0 %v1991_v1 }
 0x15a   :  { %2423 = vmatmul.mubr.bf16.vlgmr.msra.gmra.mxu0 %v1990_v2 }
 0x15b   :  { %2995 = vmatpush3.bf16.msra.mxu0 %v3502_v13 }
 0x15c   :  { %2996 = vmatprep.subr.bf16.mxu0 %v3503_v15 }
 0x15f   :  { %2997 = vmatpush3.bf16.msra.mxu0 %v3504_v16 }
 0x160   :  { %2998 = vmatprep.subr.bf16.mxu0 %v3505_v17 }
 0x163   :  { %2999 = vmatpush3.bf16.msra.mxu0 %v3506_v20 }
 0x164   :  { %3000 = vmatprep.subr.bf16.mxu0 %v3507_v21 }
 0x167   :  { %3001 = vmatpush3.bf16.msra.mxu0 %v3508_v22 }
 0x168   :  { %3002 = vmatprep.subr.bf16.mxu0 %v3509_v23 }
 0x16b   :  { %3003 = vmatpush3.bf16.msra.mxu0 %v3510_v25 }
 0x16c   :  { %3004 = vmatprep.subr.bf16.mxu0 %v3511_v26 }
 0x16f   :  { %3005 = vmatpush3.bf16.msra.mxu0 %v3512_v27 }
 0x170   :  { %3006 = vmatprep.subr.bf16.mxu0 %v3513_v45 }
 0x173   :  { %3007 = vmatpush3.bf16.msra.mxu0 %v3514_v24 }
 0x174   :  { %3008 = vmatprep.subr.bf16.mxu0 %v3515_v43 }
 0x177   :  { %3009 = vmatpush3.bf16.msra.mxu0 %v3516_v55 }
 0x18e   :  { %v1856_v4 = vpop.f32.mrf.mxu0 }
 0x18f   :  { %v1897_v5 = vpop.f32.mrf.mxu1  ;;  %v1857_v33 = vadd.f32 %v1856_v4, %v311_v31 }
 0x190   :  { %v1858_v6 = vpop.f32.mrf.mxu0 }
 0x191   :  { %v1899_v7 = vpop.f32.mrf.mxu1  ;;  %v1859_v34 = vadd.f32 %v1858_v6, %v315_v32  ;;  %v1898_v35 = vadd.f32 %v1897_v5, %v1857_v33 }
 0x192   :  { %v1860_v8 = vpop.f32.mrf.mxu0 }
 0x193   :  { %v1901_v9 = vpop.f32.mrf.mxu1  ;;  %v1900_v44 = vadd.f32 %v1899_v7, %v1859_v34 }
 0x194   :  { %v1861_v10 = vpop.f32.mrf.mxu0 }
 0x195   :  { %v1902_v11 = vpop.f32.mrf.mxu1 }
 0x1ce   :  { %v1938_v36 = vpop.f32.mrf.mxu0 }
 0x1cf   :  { %v1979_v40 = vpop.f32.mrf.mxu1  ;;  %v1939_v47 = vadd.f32 %v1938_v36, %v1898_v35 }
 0x1d0   :  { %v1940_v62 = vpop.f32.mrf.mxu0 }
 0x1d1   :  { %v1981_v14 = vpop.f32.mrf.mxu1  ;;  %v1980_v63 = vadd.f32 %v1979_v40, %v1939_v47  ;;  %v1941_v29 = vadd.f32 %v1940_v62, %v1900_v44 }
 0x1d2   :  { %v1942_v3 = vpop.f32.mrf.mxu0 }
 0x1d3   :  { %v1983_v19 = vpop.f32.mrf.mxu1  ;;  %v1982_v48 = vadd.f32 %v1981_v14, %v1941_v29  ;;  %v1988_v49 = vmax.f32 %v1980_v63, 0.0 }
 0x1d4   :  { %v1943_v50 = vpop.f32.mrf.mxu0 }
 0x1d5   :  { %v1984_v51 = vpop.f32.mrf.mxu1  ;;  %v1989_v52 = vmax.f32 %v1982_v48, 0.0  ;;  %v1992_v38 = vpack.c.bf16 %v1988_v49, %v1988_v49 }
 0x1d7   :  { %v1993_v18 = vpack.c.bf16 %v1989_v52, %v1989_v52 }
 0x1d9   :  { %2463 = vmatprep.mubr.bf16.mxu1 %v1993_v18 }
 0x1da   :  { %2464 = vmatmul.mubr.bf16.vlgmr.msra.gmra.mxu1 %v1992_v38 }
 0x21a   :  { %v2424_v41 = vpop.f32.mrf.mxu0 }
 0x21b   :  { %v2425_v59 = vadd.f32 %v2424_v41, %v2063_v46 }
 0x21c   :  { %v2426_v53 = vpop.f32.mrf.mxu0 }
 0x21d   :  { %v2427_v61 = vadd.f32 %v2426_v53, %v2067_v58 }
 0x21e   :  { %v2428_v54 = vpop.f32.mrf.mxu0 }
 0x220   :  { %v2429_v56 = vpop.f32.mrf.mxu0 }
 0x29a   :  { %v2465_v60 = vpop.f32.mrf.mxu1 }
 0x29b   :  { %v2466_v0 = vadd.f32 %v2465_v60, %v2425_v59 }
 0x29c   :  { %v2467_v1 = vpop.f32.mrf.mxu1 }
 0x29d   :  { %v2468_v2 = vadd.f32 %v2467_v1, %v2427_v61  ;;  %v2472_v4 = vmax.f32 %v2466_v0, 0.0 }
 0x29e   :  { %v2469_v5 = vpop.f32.mrf.mxu1 }
 0x29f   :  { %v2473_v6 = vmax.f32 %v2468_v2, 0.0  ;;  %v2474_v9 = vpack.c.bf16 %v2472_v4, %v2472_v4 }
 0x2a0   :  { %v2470_v7 = vpop.f32.mrf.mxu1 }
 0x2a1   :  { %v2475_v8 = vpack.c.bf16 %v2473_v6, %v2473_v6 }
 0x2a3   :  { %2643 = vmatprep.mubr.bf16.mxu0 %v2475_v8 }
 0x2a4   :  { %2644 = vmatmul.mubr.bf16.vlgmr.msra.gmra.mxu0 %v2474_v9 }
 0x364   :  { %v3010_v10 = vpop.f32.mrf.mxu0 }
 0x366   :  { %v3011_v37 = vpop.f32.mrf.mxu0 }
 0x367   :  { %v3012_v39 = vadd.f32 %v3011_v37, %v3010_v10 }
 0x368   :  { %v3013_v11 = vpop.f32.mrf.mxu0 }
 0x369   :  { %v2646_v12 = vadd.f32 %v3012_v39, %v2977_v42 }
 0x36a   :  { %v3014_v13 = vpop.f32.mrf.mxu0 }
 0x36b   :  { %2651 = vst [vmem:[%s3921_s7] sm:$0x3] %v2646_v12 }
 0x36c   :  { %2656 = vsyncpa [#allocation3], 1 }

</bundles_post_ra>
